<compile_context>
chip_gen: v5e
topology: v5e:2x2
jax: 0.10.0
libtpu: 0.0.40
codegen_flags: <defaults>
</compile_context>

<pallas_src>
import jax
import jax.numpy as jnp
from jax import lax
from jax.experimental import pallas as pl
from jax.experimental.pallas import tpu as pltpu


# ----------------------------------------------------------------------------
# Pallas kernel: full BaseModel + projection head for the whole (small) batch.
# ----------------------------------------------------------------------------
def _simclr_head_kernel(x_ref,                        # (B, L, Cin)
                        w1_ref, b1_ref,               # (K1*Cin, 32), (1, 32)
                        w2_ref, b2_ref,               # (K2*32, 64),  (1, 64)
                        w3_ref, b3_ref,               # (K3*64, 96),  (1, 96)
                        pw1_ref, pb1_ref,             # (96, 256),    (1, 256)
                        pw2_ref, pb2_ref,             # (256, 128),   (1, 128)
                        pw3_ref, pb3_ref,             # (128, 50),    (1, 50)
                        o_ref):                       # (B, 50)
    batch, length, c_in = x_ref.shape
    c1 = w1_ref.shape[1]
    k1 = w1_ref.shape[0] // c_in
    c2 = w2_ref.shape[1]
    k2 = w2_ref.shape[0] // c1
    c3 = w3_ref.shape[1]
    k3 = w3_ref.shape[0] // c2
    l1 = length - k1 + 1
    l2 = l1 - k2 + 1
    l3 = l2 - k3 + 1

    def im2col(h, l_in, l_out, k_size):
        # h: (batch*l_in, C), samples stacked along rows.
        # Returns (batch*l_out, k_size*C); per sample, tap k occupies the lane
        # block [k*C, (k+1)*C) which matches the (K, Cin, Cout) weight reshape.
        per_sample = []
        for b in range(batch):
            base = b * l_in
            taps = [h[base + k:base + k + l_out, :] for k in range(k_size)]
            per_sample.append(jnp.concatenate(taps, axis=1))
        return jnp.concatenate(per_sample, axis=0)

    def conv_relu(h, l_in, l_out, k_size, w_ref, b_ref):
        a = im2col(h, l_in, l_out, k_size)                       # (B*l_out, K*C)
        y = jnp.dot(a, w_ref[...], preferred_element_type=jnp.float32)
        return jnp.maximum(y + b_ref[...], 0.0)                  # (B*l_out, Cout)

    # Stack the batch on the sublane (M) axis -> each conv layer = ONE matmul.
    x2d = jnp.concatenate(
        [x_ref[b].astype(jnp.float32) for b in range(batch)], axis=0)  # (B*L, Cin)

    h1 = conv_relu(x2d, length, l1, k1, w1_ref, b1_ref)          # (B*l1, 32)
    h2 = conv_relu(h1, l1, l2, k2, w2_ref, b2_ref)               # (B*l2, 64)
    h3 = conv_relu(h2, l2, l3, k3, w3_ref, b3_ref)               # (B*l3, 96)

    # Global max pool over time per sample -> (B, 96).
    feats = [jnp.max(h3[b * l3:(b + 1) * l3, :], axis=0, keepdims=True)
             for b in range(batch)]
    feat = jnp.concatenate(feats, axis=0)

    # Batched projection head: three matmuls for the whole batch.
    p1 = jnp.maximum(
        jnp.dot(feat, pw1_ref[...], preferred_element_type=jnp.float32)
        + pb1_ref[...], 0.0)                                     # (B, 256)
    p2 = jnp.maximum(
        jnp.dot(p1, pw2_ref[...], preferred_element_type=jnp.float32)
        + pb2_ref[...], 0.0)                                     # (B, 128)
    p3 = (jnp.dot(p2, pw3_ref[...], preferred_element_type=jnp.float32)
          + pb3_ref[...])                                        # (B, 50)

    # Single output store (no per-sample masked row stores).
    o_ref[...] = p3.astype(o_ref.dtype)


# ----------------------------------------------------------------------------
# One-time parameter relayout (do NOT call this per forward step).
# ----------------------------------------------------------------------------
def prepare_params(params):
    def conv_w(w):  # PyTorch Conv1d weight (Cout, Cin, K) -> im2col (K*Cin, Cout)
        c_out, c_in, k = w.shape
        return jnp.transpose(w, (2, 1, 0)).reshape(k * c_in, c_out)

    return (
        conv_w(params["conv1_w"]), params["conv1_b"][None, :],
        conv_w(params["conv2_w"]), params["conv2_b"][None, :],
        conv_w(params["conv3_w"]), params["conv3_b"][None, :],
        params["proj1_w"].T, params["proj1_b"][None, :],
        params["proj2_w"].T, params["proj2_b"][None, :],
        params["proj3_w"].T, params["proj3_b"][None, :],
    )


# ----------------------------------------------------------------------------
# Wrapper: input layout glue + pallas_call (no grid — everything fits VMEM).
# ----------------------------------------------------------------------------
def simclr_head_forward(x_ncl, prepared):
    """x_ncl: (B, Cin, L) float32, PyTorch Conv1d layout. Returns (B, hidden_3)."""
    batch, c_in, length = x_ncl.shape
    w1, _, w2, _, w3, _, _, _, _, _, pw3, _ = prepared
    k1 = w1.shape[0] // c_in
    k2 = w2.shape[0] // w1.shape[1]
    k3 = w3.shape[0] // w2.shape[1]
    min_len = k1 + k2 + k3 - 2
    if length < min_len:
        raise ValueError(
            f"Input length {length} too short for conv stack (needs >= {min_len}).")
    n_out = pw3.shape[1]

    x_blc = jnp.transpose(x_ncl, (0, 2, 1))   # NCL -> (B, L, Cin), time-major

    vmem = pl.BlockSpec(memory_space=pltpu.MemorySpace.VMEM)
    return pl.pallas_call(
        _simclr_head_kernel,
        out_shape=jax.ShapeDtypeStruct((batch, n_out), jnp.float32),
        in_specs=[vmem] * (1 + len(prepared)),
        out_specs=vmem,
    )(x_blc, *prepared)


# ----------------------------------------------------------------------------
# Pure-JAX reference (PyTorch semantics) for a correctness check.
# ----------------------------------------------------------------------------
def simclr_head_reference(x_ncl, params):
    def conv_relu(h, w, b):
        y = lax.conv_general_dilated(
            h, w, window_strides=(1,), padding="VALID",
            dimension_numbers=("NCH", "OIH", "NCH"))
        return jnp.maximum(y + b[None, :, None], 0.0)

    h = conv_relu(x_ncl, params["conv1_w"], params["conv1_b"])
    h = conv_relu(h, params["conv2_w"], params["conv2_b"])
    h = conv_relu(h, params["conv3_w"], params["conv3_b"])
    feat = jnp.max(h, axis=2)                                    # (B, 96)
    p1 = jnp.maximum(feat @ params["proj1_w"].T + params["proj1_b"], 0.0)
    p2 = jnp.maximum(p1 @ params["proj2_w"].T + params["proj2_b"], 0.0)
    return p2 @ params["proj3_w"].T + params["proj3_b"]


# ----------------------------------------------------------------------------
# Deterministic parameter init (PyTorch default Linear/Conv uniform bounds).
# ----------------------------------------------------------------------------
def init_params(key, in_channels=6, hidden_1=256, hidden_2=128, hidden_3=50):
    def u(k, shape, fan_in):
        bound = 1.0 / float(fan_in) ** 0.5
        return jax.random.uniform(k, shape, jnp.float32, -bound, bound)

    keys = jax.random.split(key, 12)
    p = {}
    p["conv1_w"] = u(keys[0], (32, in_channels, 24), in_channels * 24)
    p["conv1_b"] = u(keys[1], (32,), in_channels * 24)
    p["conv2_w"] = u(keys[2], (64, 32, 16), 32 * 16)
    p["conv2_b"] = u(keys[3], (64,), 32 * 16)
    p["conv3_w"] = u(keys[4], (96, 64, 8), 64 * 8)
    p["conv3_b"] = u(keys[5], (96,), 64 * 8)
    p["proj1_w"] = u(keys[6], (hidden_1, 96), 96)
    p["proj1_b"] = u(keys[7], (hidden_1,), 96)
    p["proj2_w"] = u(keys[8], (hidden_2, hidden_1), hidden_1)
    p["proj2_b"] = u(keys[9], (hidden_2,), hidden_1)
    p["proj3_w"] = u(keys[10], (hidden_3, hidden_2), hidden_2)
    p["proj3_b"] = u(keys[11], (hidden_3,), hidden_2)
    return p


if __name__ == "__main__":
    key = jax.random.PRNGKey(0)
    k_x, k_p = jax.random.split(key)

    # input_shape = (6 channels, 60 timesteps), batch = 2  -> x: (2, 6, 60) NCL
    batch, in_channels, length = 2, 6, 60
    x = jax.random.normal(k_x, (batch, in_channels, length), jnp.float32)
    params = init_params(k_p, in_channels=in_channels)

    prepared = prepare_params(params)            # one-time weight relayout
    fwd = jax.jit(simclr_head_forward)

    out = fwd(x, prepared)
    out = jax.block_until_ready(out)

    ref = simclr_head_reference(x, params)
    assert out.shape == (batch, 50), out.shape
    assert jnp.allclose(out, ref, rtol=1e-4, atol=1e-4), (
        float(jnp.max(jnp.abs(out - ref))))

    print("KERNEL_OK")
</pallas_src>

<mosaic_0001>
module attributes {stable_mosaic.version = 11 : i64} {
  func.func @_simclr_head_kernel(%arg0: memref<2x60x6xf32, #tpu.memory_space<vmem>>, %arg1: memref<144x32xf32, #tpu.memory_space<vmem>>, %arg2: memref<1x32xf32, #tpu.memory_space<vmem>>, %arg3: memref<512x64xf32, #tpu.memory_space<vmem>>, %arg4: memref<1x64xf32, #tpu.memory_space<vmem>>, %arg5: memref<512x96xf32, #tpu.memory_space<vmem>>, %arg6: memref<1x96xf32, #tpu.memory_space<vmem>>, %arg7: memref<96x256xf32, #tpu.memory_space<vmem>>, %arg8: memref<1x256xf32, #tpu.memory_space<vmem>>, %arg9: memref<256x128xf32, #tpu.memory_space<vmem>>, %arg10: memref<1x128xf32, #tpu.memory_space<vmem>>, %arg11: memref<128x50xf32, #tpu.memory_space<vmem>>, %arg12: memref<1x50xf32, #tpu.memory_space<vmem>>, %arg13: memref<2x50xf32, #tpu.memory_space<vmem>>) attributes {dimension_semantics = [], scalar_prefetch = 0 : i64, scratch_operands = 0 : i64, tpu.core_type = #tpu.core_type<tc>} {
    %c0 = arith.constant 0 : index
    %c0_0 = arith.constant 0 : index
    %c0_1 = arith.constant 0 : index
    %0 = vector.load %arg0[%c0, %c0_0, %c0_1] : memref<2x60x6xf32, #tpu.memory_space<vmem>>, vector<1x60x6xf32>
    %1 = vector.shape_cast %0 : vector<1x60x6xf32> to vector<60x6xf32>
    %c1 = arith.constant 1 : index
    %c0_2 = arith.constant 0 : index
    %c0_3 = arith.constant 0 : index
    %2 = vector.load %arg0[%c1, %c0_2, %c0_3] : memref<2x60x6xf32, #tpu.memory_space<vmem>>, vector<1x60x6xf32>
    %3 = vector.shape_cast %2 : vector<1x60x6xf32> to vector<60x6xf32>
    %4 = tpu.concatenate %1, %3 in 0 : vector<60x6xf32>, vector<60x6xf32> -> vector<120x6xf32>
    %5 = vector.extract_strided_slice %4 {offsets = [0, 0], sizes = [37, 6], strides = [1, 1]} : vector<120x6xf32> to vector<37x6xf32>
    %6 = vector.extract_strided_slice %4 {offsets = [1, 0], sizes = [37, 6], strides = [1, 1]} : vector<120x6xf32> to vector<37x6xf32>
    %7 = vector.extract_strided_slice %4 {offsets = [2, 0], sizes = [37, 6], strides = [1, 1]} : vector<120x6xf32> to vector<37x6xf32>
    %8 = vector.extract_strided_slice %4 {offsets = [3, 0], sizes = [37, 6], strides = [1, 1]} : vector<120x6xf32> to vector<37x6xf32>
    %9 = vector.extract_strided_slice %4 {offsets = [4, 0], sizes = [37, 6], strides = [1, 1]} : vector<120x6xf32> to vector<37x6xf32>
    %10 = vector.extract_strided_slice %4 {offsets = [5, 0], sizes = [37, 6], strides = [1, 1]} : vector<120x6xf32> to vector<37x6xf32>
    %11 = vector.extract_strided_slice %4 {offsets = [6, 0], sizes = [37, 6], strides = [1, 1]} : vector<120x6xf32> to vector<37x6xf32>
    %12 = vector.extract_strided_slice %4 {offsets = [7, 0], sizes = [37, 6], strides = [1, 1]} : vector<120x6xf32> to vector<37x6xf32>
    %13 = vector.extract_strided_slice %4 {offsets = [8, 0], sizes = [37, 6], strides = [1, 1]} : vector<120x6xf32> to vector<37x6xf32>
    %14 = vector.extract_strided_slice %4 {offsets = [9, 0], sizes = [37, 6], strides = [1, 1]} : vector<120x6xf32> to vector<37x6xf32>
    %15 = vector.extract_strided_slice %4 {offsets = [10, 0], sizes = [37, 6], strides = [1, 1]} : vector<120x6xf32> to vector<37x6xf32>
    %16 = vector.extract_strided_slice %4 {offsets = [11, 0], sizes = [37, 6], strides = [1, 1]} : vector<120x6xf32> to vector<37x6xf32>
    %17 = vector.extract_strided_slice %4 {offsets = [12, 0], sizes = [37, 6], strides = [1, 1]} : vector<120x6xf32> to vector<37x6xf32>
    %18 = vector.extract_strided_slice %4 {offsets = [13, 0], sizes = [37, 6], strides = [1, 1]} : vector<120x6xf32> to vector<37x6xf32>
    %19 = vector.extract_strided_slice %4 {offsets = [14, 0], sizes = [37, 6], strides = [1, 1]} : vector<120x6xf32> to vector<37x6xf32>
    %20 = vector.extract_strided_slice %4 {offsets = [15, 0], sizes = [37, 6], strides = [1, 1]} : vector<120x6xf32> to vector<37x6xf32>
    %21 = vector.extract_strided_slice %4 {offsets = [16, 0], sizes = [37, 6], strides = [1, 1]} : vector<120x6xf32> to vector<37x6xf32>
    %22 = vector.extract_strided_slice %4 {offsets = [17, 0], sizes = [37, 6], strides = [1, 1]} : vector<120x6xf32> to vector<37x6xf32>
    %23 = vector.extract_strided_slice %4 {offsets = [18, 0], sizes = [37, 6], strides = [1, 1]} : vector<120x6xf32> to vector<37x6xf32>
    %24 = vector.extract_strided_slice %4 {offsets = [19, 0], sizes = [37, 6], strides = [1, 1]} : vector<120x6xf32> to vector<37x6xf32>
    %25 = vector.extract_strided_slice %4 {offsets = [20, 0], sizes = [37, 6], strides = [1, 1]} : vector<120x6xf32> to vector<37x6xf32>
    %26 = vector.extract_strided_slice %4 {offsets = [21, 0], sizes = [37, 6], strides = [1, 1]} : vector<120x6xf32> to vector<37x6xf32>
    %27 = vector.extract_strided_slice %4 {offsets = [22, 0], sizes = [37, 6], strides = [1, 1]} : vector<120x6xf32> to vector<37x6xf32>
    %28 = vector.extract_strided_slice %4 {offsets = [23, 0], sizes = [37, 6], strides = [1, 1]} : vector<120x6xf32> to vector<37x6xf32>
    %29 = tpu.concatenate %5, %6, %7, %8, %9, %10, %11, %12, %13, %14, %15, %16, %17, %18, %19, %20 in 1 : vector<37x6xf32>, vector<37x6xf32>, vector<37x6xf32>, vector<37x6xf32>, vector<37x6xf32>, vector<37x6xf32>, vector<37x6xf32>, vector<37x6xf32>, vector<37x6xf32>, vector<37x6xf32>, vector<37x6xf32>, vector<37x6xf32>, vector<37x6xf32>, vector<37x6xf32>, vector<37x6xf32>, vector<37x6xf32> -> vector<37x96xf32>
    %30 = tpu.concatenate %21, %22, %23, %24, %25, %26, %27, %28 in 1 : vector<37x6xf32>, vector<37x6xf32>, vector<37x6xf32>, vector<37x6xf32>, vector<37x6xf32>, vector<37x6xf32>, vector<37x6xf32>, vector<37x6xf32> -> vector<37x48xf32>
    %31 = tpu.concatenate %29, %30 in 1 : vector<37x96xf32>, vector<37x48xf32> -> vector<37x144xf32>
    %32 = vector.extract_strided_slice %4 {offsets = [60, 0], sizes = [37, 6], strides = [1, 1]} : vector<120x6xf32> to vector<37x6xf32>
    %33 = vector.extract_strided_slice %4 {offsets = [61, 0], sizes = [37, 6], strides = [1, 1]} : vector<120x6xf32> to vector<37x6xf32>
    %34 = vector.extract_strided_slice %4 {offsets = [62, 0], sizes = [37, 6], strides = [1, 1]} : vector<120x6xf32> to vector<37x6xf32>
    %35 = vector.extract_strided_slice %4 {offsets = [63, 0], sizes = [37, 6], strides = [1, 1]} : vector<120x6xf32> to vector<37x6xf32>
    %36 = vector.extract_strided_slice %4 {offsets = [64, 0], sizes = [37, 6], strides = [1, 1]} : vector<120x6xf32> to vector<37x6xf32>
    %37 = vector.extract_strided_slice %4 {offsets = [65, 0], sizes = [37, 6], strides = [1, 1]} : vector<120x6xf32> to vector<37x6xf32>
    %38 = vector.extract_strided_slice %4 {offsets = [66, 0], sizes = [37, 6], strides = [1, 1]} : vector<120x6xf32> to vector<37x6xf32>
    %39 = vector.extract_strided_slice %4 {offsets = [67, 0], sizes = [37, 6], strides = [1, 1]} : vector<120x6xf32> to vector<37x6xf32>
    %40 = vector.extract_strided_slice %4 {offsets = [68, 0], sizes = [37, 6], strides = [1, 1]} : vector<120x6xf32> to vector<37x6xf32>
    %41 = vector.extract_strided_slice %4 {offsets = [69, 0], sizes = [37, 6], strides = [1, 1]} : vector<120x6xf32> to vector<37x6xf32>
    %42 = vector.extract_strided_slice %4 {offsets = [70, 0], sizes = [37, 6], strides = [1, 1]} : vector<120x6xf32> to vector<37x6xf32>
    %43 = vector.extract_strided_slice %4 {offsets = [71, 0], sizes = [37, 6], strides = [1, 1]} : vector<120x6xf32> to vector<37x6xf32>
    %44 = vector.extract_strided_slice %4 {offsets = [72, 0], sizes = [37, 6], strides = [1, 1]} : vector<120x6xf32> to vector<37x6xf32>
    %45 = vector.extract_strided_slice %4 {offsets = [73, 0], sizes = [37, 6], strides = [1, 1]} : vector<120x6xf32> to vector<37x6xf32>
    %46 = vector.extract_strided_slice %4 {offsets = [74, 0], sizes = [37, 6], strides = [1, 1]} : vector<120x6xf32> to vector<37x6xf32>
    %47 = vector.extract_strided_slice %4 {offsets = [75, 0], sizes = [37, 6], strides = [1, 1]} : vector<120x6xf32> to vector<37x6xf32>
    %48 = vector.extract_strided_slice %4 {offsets = [76, 0], sizes = [37, 6], strides = [1, 1]} : vector<120x6xf32> to vector<37x6xf32>
    %49 = vector.extract_strided_slice %4 {offsets = [77, 0], sizes = [37, 6], strides = [1, 1]} : vector<120x6xf32> to vector<37x6xf32>
    %50 = vector.extract_strided_slice %4 {offsets = [78, 0], sizes = [37, 6], strides = [1, 1]} : vector<120x6xf32> to vector<37x6xf32>
    %51 = vector.extract_strided_slice %4 {offsets = [79, 0], sizes = [37, 6], strides = [1, 1]} : vector<120x6xf32> to vector<37x6xf32>
    %52 = vector.extract_strided_slice %4 {offsets = [80, 0], sizes = [37, 6], strides = [1, 1]} : vector<120x6xf32> to vector<37x6xf32>
    %53 = vector.extract_strided_slice %4 {offsets = [81, 0], sizes = [37, 6], strides = [1, 1]} : vector<120x6xf32> to vector<37x6xf32>
    %54 = vector.extract_strided_slice %4 {offsets = [82, 0], sizes = [37, 6], strides = [1, 1]} : vector<120x6xf32> to vector<37x6xf32>
    %55 = vector.extract_strided_slice %4 {offsets = [83, 0], sizes = [37, 6], strides = [1, 1]} : vector<120x6xf32> to vector<37x6xf32>
    %56 = tpu.concatenate %32, %33, %34, %35, %36, %37, %38, %39, %40, %41, %42, %43, %44, %45, %46, %47 in 1 : vector<37x6xf32>, vector<37x6xf32>, vector<37x6xf32>, vector<37x6xf32>, vector<37x6xf32>, vector<37x6xf32>, vector<37x6xf32>, vector<37x6xf32>, vector<37x6xf32>, vector<37x6xf32>, vector<37x6xf32>, vector<37x6xf32>, vector<37x6xf32>, vector<37x6xf32>, vector<37x6xf32>, vector<37x6xf32> -> vector<37x96xf32>
    %57 = tpu.concatenate %48, %49, %50, %51, %52, %53, %54, %55 in 1 : vector<37x6xf32>, vector<37x6xf32>, vector<37x6xf32>, vector<37x6xf32>, vector<37x6xf32>, vector<37x6xf32>, vector<37x6xf32>, vector<37x6xf32> -> vector<37x48xf32>
    %58 = tpu.concatenate %56, %57 in 1 : vector<37x96xf32>, vector<37x48xf32> -> vector<37x144xf32>
    %59 = tpu.concatenate %31, %58 in 0 : vector<37x144xf32>, vector<37x144xf32> -> vector<74x144xf32>
    %c0_4 = arith.constant 0 : index
    %c0_5 = arith.constant 0 : index
    %60 = vector.load %arg1[%c0_4, %c0_5] : memref<144x32xf32, #tpu.memory_space<vmem>>, vector<144x32xf32>
    %cst = arith.constant dense<0.000000e+00> : vector<74x32xf32>
    %61 = tpu.matmul %59, %60, %cst {dimension_numbers = #tpu.dot_dimension_numbers<[1], [0], [0], [1], [0, 0, 1, 1], [], []>} : vector<74x144xf32>, vector<144x32xf32>, vector<74x32xf32> -> vector<74x32xf32>
    %c0_6 = arith.constant 0 : index
    %c0_7 = arith.constant 0 : index
    %62 = vector.load %arg2[%c0_6, %c0_7] : memref<1x32xf32, #tpu.memory_space<vmem>>, vector<1x32xf32>
    %63 = vector.broadcast %62 : vector<1x32xf32> to vector<74x32xf32>
    %64 = arith.addf %61, %63 : vector<74x32xf32>
    %cst_8 = arith.constant 0.000000e+00 : f32
    %65 = vector.broadcast %cst_8 : f32 to vector<74x32xf32>
    %66 = arith.maximumf %64, %65 : vector<74x32xf32>
    %67 = vector.extract_strided_slice %66 {offsets = [0, 0], sizes = [22, 32], strides = [1, 1]} : vector<74x32xf32> to vector<22x32xf32>
    %68 = vector.extract_strided_slice %66 {offsets = [1, 0], sizes = [22, 32], strides = [1, 1]} : vector<74x32xf32> to vector<22x32xf32>
    %69 = vector.extract_strided_slice %66 {offsets = [2, 0], sizes = [22, 32], strides = [1, 1]} : vector<74x32xf32> to vector<22x32xf32>
    %70 = vector.extract_strided_slice %66 {offsets = [3, 0], sizes = [22, 32], strides = [1, 1]} : vector<74x32xf32> to vector<22x32xf32>
    %71 = vector.extract_strided_slice %66 {offsets = [4, 0], sizes = [22, 32], strides = [1, 1]} : vector<74x32xf32> to vector<22x32xf32>
    %72 = vector.extract_strided_slice %66 {offsets = [5, 0], sizes = [22, 32], strides = [1, 1]} : vector<74x32xf32> to vector<22x32xf32>
    %73 = vector.extract_strided_slice %66 {offsets = [6, 0], sizes = [22, 32], strides = [1, 1]} : vector<74x32xf32> to vector<22x32xf32>
    %74 = vector.extract_strided_slice %66 {offsets = [7, 0], sizes = [22, 32], strides = [1, 1]} : vector<74x32xf32> to vector<22x32xf32>
    %75 = vector.extract_strided_slice %66 {offsets = [8, 0], sizes = [22, 32], strides = [1, 1]} : vector<74x32xf32> to vector<22x32xf32>
    %76 = vector.extract_strided_slice %66 {offsets = [9, 0], sizes = [22, 32], strides = [1, 1]} : vector<74x32xf32> to vector<22x32xf32>
    %77 = vector.extract_strided_slice %66 {offsets = [10, 0], sizes = [22, 32], strides = [1, 1]} : vector<74x32xf32> to vector<22x32xf32>
    %78 = vector.extract_strided_slice %66 {offsets = [11, 0], sizes = [22, 32], strides = [1, 1]} : vector<74x32xf32> to vector<22x32xf32>
    %79 = vector.extract_strided_slice %66 {offsets = [12, 0], sizes = [22, 32], strides = [1, 1]} : vector<74x32xf32> to vector<22x32xf32>
    %80 = vector.extract_strided_slice %66 {offsets = [13, 0], sizes = [22, 32], strides = [1, 1]} : vector<74x32xf32> to vector<22x32xf32>
    %81 = vector.extract_strided_slice %66 {offsets = [14, 0], sizes = [22, 32], strides = [1, 1]} : vector<74x32xf32> to vector<22x32xf32>
    %82 = vector.extract_strided_slice %66 {offsets = [15, 0], sizes = [22, 32], strides = [1, 1]} : vector<74x32xf32> to vector<22x32xf32>
    %83 = tpu.concatenate %67, %68, %69, %70, %71, %72, %73, %74, %75, %76, %77, %78, %79, %80, %81, %82 in 1 : vector<22x32xf32>, vector<22x32xf32>, vector<22x32xf32>, vector<22x32xf32>, vector<22x32xf32>, vector<22x32xf32>, vector<22x32xf32>, vector<22x32xf32>, vector<22x32xf32>, vector<22x32xf32>, vector<22x32xf32>, vector<22x32xf32>, vector<22x32xf32>, vector<22x32xf32>, vector<22x32xf32>, vector<22x32xf32> -> vector<22x512xf32>
    %84 = vector.extract_strided_slice %66 {offsets = [37, 0], sizes = [22, 32], strides = [1, 1]} : vector<74x32xf32> to vector<22x32xf32>
    %85 = vector.extract_strided_slice %66 {offsets = [38, 0], sizes = [22, 32], strides = [1, 1]} : vector<74x32xf32> to vector<22x32xf32>
    %86 = vector.extract_strided_slice %66 {offsets = [39, 0], sizes = [22, 32], strides = [1, 1]} : vector<74x32xf32> to vector<22x32xf32>
    %87 = vector.extract_strided_slice %66 {offsets = [40, 0], sizes = [22, 32], strides = [1, 1]} : vector<74x32xf32> to vector<22x32xf32>
    %88 = vector.extract_strided_slice %66 {offsets = [41, 0], sizes = [22, 32], strides = [1, 1]} : vector<74x32xf32> to vector<22x32xf32>
    %89 = vector.extract_strided_slice %66 {offsets = [42, 0], sizes = [22, 32], strides = [1, 1]} : vector<74x32xf32> to vector<22x32xf32>
    %90 = vector.extract_strided_slice %66 {offsets = [43, 0], sizes = [22, 32], strides = [1, 1]} : vector<74x32xf32> to vector<22x32xf32>
    %91 = vector.extract_strided_slice %66 {offsets = [44, 0], sizes = [22, 32], strides = [1, 1]} : vector<74x32xf32> to vector<22x32xf32>
    %92 = vector.extract_strided_slice %66 {offsets = [45, 0], sizes = [22, 32], strides = [1, 1]} : vector<74x32xf32> to vector<22x32xf32>
    %93 = vector.extract_strided_slice %66 {offsets = [46, 0], sizes = [22, 32], strides = [1, 1]} : vector<74x32xf32> to vector<22x32xf32>
    %94 = vector.extract_strided_slice %66 {offsets = [47, 0], sizes = [22, 32], strides = [1, 1]} : vector<74x32xf32> to vector<22x32xf32>
    %95 = vector.extract_strided_slice %66 {offsets = [48, 0], sizes = [22, 32], strides = [1, 1]} : vector<74x32xf32> to vector<22x32xf32>
    %96 = vector.extract_strided_slice %66 {offsets = [49, 0], sizes = [22, 32], strides = [1, 1]} : vector<74x32xf32> to vector<22x32xf32>
    %97 = vector.extract_strided_slice %66 {offsets = [50, 0], sizes = [22, 32], strides = [1, 1]} : vector<74x32xf32> to vector<22x32xf32>
    %98 = vector.extract_strided_slice %66 {offsets = [51, 0], sizes = [22, 32], strides = [1, 1]} : vector<74x32xf32> to vector<22x32xf32>
    %99 = vector.extract_strided_slice %66 {offsets = [52, 0], sizes = [22, 32], strides = [1, 1]} : vector<74x32xf32> to vector<22x32xf32>
    %100 = tpu.concatenate %84, %85, %86, %87, %88, %89, %90, %91, %92, %93, %94, %95, %96, %97, %98, %99 in 1 : vector<22x32xf32>, vector<22x32xf32>, vector<22x32xf32>, vector<22x32xf32>, vector<22x32xf32>, vector<22x32xf32>, vector<22x32xf32>, vector<22x32xf32>, vector<22x32xf32>, vector<22x32xf32>, vector<22x32xf32>, vector<22x32xf32>, vector<22x32xf32>, vector<22x32xf32>, vector<22x32xf32>, vector<22x32xf32> -> vector<22x512xf32>
    %101 = tpu.concatenate %83, %100 in 0 : vector<22x512xf32>, vector<22x512xf32> -> vector<44x512xf32>
    %c0_9 = arith.constant 0 : index
    %c0_10 = arith.constant 0 : index
    %102 = vector.load %arg3[%c0_9, %c0_10] : memref<512x64xf32, #tpu.memory_space<vmem>>, vector<512x64xf32>
    %cst_11 = arith.constant dense<0.000000e+00> : vector<44x64xf32>
    %103 = tpu.matmul %101, %102, %cst_11 {dimension_numbers = #tpu.dot_dimension_numbers<[1], [0], [0], [1], [0, 0, 1, 1], [], []>} : vector<44x512xf32>, vector<512x64xf32>, vector<44x64xf32> -> vector<44x64xf32>
    %c0_12 = arith.constant 0 : index
    %c0_13 = arith.constant 0 : index
    %104 = vector.load %arg4[%c0_12, %c0_13] : memref<1x64xf32, #tpu.memory_space<vmem>>, vector<1x64xf32>
    %105 = vector.broadcast %104 : vector<1x64xf32> to vector<44x64xf32>
    %106 = arith.addf %103, %105 : vector<44x64xf32>
    %cst_14 = arith.constant 0.000000e+00 : f32
    %107 = vector.broadcast %cst_14 : f32 to vector<44x64xf32>
    %108 = arith.maximumf %106, %107 : vector<44x64xf32>
    %109 = vector.extract_strided_slice %108 {offsets = [0, 0], sizes = [15, 64], strides = [1, 1]} : vector<44x64xf32> to vector<15x64xf32>
    %110 = vector.extract_strided_slice %108 {offsets = [1, 0], sizes = [15, 64], strides = [1, 1]} : vector<44x64xf32> to vector<15x64xf32>
    %111 = vector.extract_strided_slice %108 {offsets = [2, 0], sizes = [15, 64], strides = [1, 1]} : vector<44x64xf32> to vector<15x64xf32>
    %112 = vector.extract_strided_slice %108 {offsets = [3, 0], sizes = [15, 64], strides = [1, 1]} : vector<44x64xf32> to vector<15x64xf32>
    %113 = vector.extract_strided_slice %108 {offsets = [4, 0], sizes = [15, 64], strides = [1, 1]} : vector<44x64xf32> to vector<15x64xf32>
    %114 = vector.extract_strided_slice %108 {offsets = [5, 0], sizes = [15, 64], strides = [1, 1]} : vector<44x64xf32> to vector<15x64xf32>
    %115 = vector.extract_strided_slice %108 {offsets = [6, 0], sizes = [15, 64], strides = [1, 1]} : vector<44x64xf32> to vector<15x64xf32>
    %116 = vector.extract_strided_slice %108 {offsets = [7, 0], sizes = [15, 64], strides = [1, 1]} : vector<44x64xf32> to vector<15x64xf32>
    %117 = tpu.concatenate %109, %110, %111, %112, %113, %114, %115, %116 in 1 : vector<15x64xf32>, vector<15x64xf32>, vector<15x64xf32>, vector<15x64xf32>, vector<15x64xf32>, vector<15x64xf32>, vector<15x64xf32>, vector<15x64xf32> -> vector<15x512xf32>
    %118 = vector.extract_strided_slice %108 {offsets = [22, 0], sizes = [15, 64], strides = [1, 1]} : vector<44x64xf32> to vector<15x64xf32>
    %119 = vector.extract_strided_slice %108 {offsets = [23, 0], sizes = [15, 64], strides = [1, 1]} : vector<44x64xf32> to vector<15x64xf32>
    %120 = vector.extract_strided_slice %108 {offsets = [24, 0], sizes = [15, 64], strides = [1, 1]} : vector<44x64xf32> to vector<15x64xf32>
    %121 = vector.extract_strided_slice %108 {offsets = [25, 0], sizes = [15, 64], strides = [1, 1]} : vector<44x64xf32> to vector<15x64xf32>
    %122 = vector.extract_strided_slice %108 {offsets = [26, 0], sizes = [15, 64], strides = [1, 1]} : vector<44x64xf32> to vector<15x64xf32>
    %123 = vector.extract_strided_slice %108 {offsets = [27, 0], sizes = [15, 64], strides = [1, 1]} : vector<44x64xf32> to vector<15x64xf32>
    %124 = vector.extract_strided_slice %108 {offsets = [28, 0], sizes = [15, 64], strides = [1, 1]} : vector<44x64xf32> to vector<15x64xf32>
    %125 = vector.extract_strided_slice %108 {offsets = [29, 0], sizes = [15, 64], strides = [1, 1]} : vector<44x64xf32> to vector<15x64xf32>
    %126 = tpu.concatenate %118, %119, %120, %121, %122, %123, %124, %125 in 1 : vector<15x64xf32>, vector<15x64xf32>, vector<15x64xf32>, vector<15x64xf32>, vector<15x64xf32>, vector<15x64xf32>, vector<15x64xf32>, vector<15x64xf32> -> vector<15x512xf32>
    %127 = tpu.concatenate %117, %126 in 0 : vector<15x512xf32>, vector<15x512xf32> -> vector<30x512xf32>
    %c0_15 = arith.constant 0 : index
    %c0_16 = arith.constant 0 : index
    %128 = vector.load %arg5[%c0_15, %c0_16] : memref<512x96xf32, #tpu.memory_space<vmem>>, vector<512x96xf32>
    %cst_17 = arith.constant dense<0.000000e+00> : vector<30x96xf32>
    %129 = tpu.matmul %127, %128, %cst_17 {dimension_numbers = #tpu.dot_dimension_numbers<[1], [0], [0], [1], [0, 0, 1, 1], [], []>} : vector<30x512xf32>, vector<512x96xf32>, vector<30x96xf32> -> vector<30x96xf32>
    %c0_18 = arith.constant 0 : index
    %c0_19 = arith.constant 0 : index
    %130 = vector.load %arg6[%c0_18, %c0_19] : memref<1x96xf32, #tpu.memory_space<vmem>>, vector<1x96xf32>
    %131 = vector.broadcast %130 : vector<1x96xf32> to vector<30x96xf32>
    %132 = arith.addf %129, %131 : vector<30x96xf32>
    %cst_20 = arith.constant 0.000000e+00 : f32
    %133 = vector.broadcast %cst_20 : f32 to vector<30x96xf32>
    %134 = arith.maximumf %132, %133 : vector<30x96xf32>
    %135 = vector.extract_strided_slice %134 {offsets = [0, 0], sizes = [15, 96], strides = [1, 1]} : vector<30x96xf32> to vector<15x96xf32>
    %cst_21 = arith.constant dense<0xFF800000> : vector<96xf32>
    %136 = vector.multi_reduction <maximumf>, %135, %cst_21 [0] : vector<15x96xf32> to vector<96xf32>
    %137 = vector.shape_cast %136 : vector<96xf32> to vector<1x96xf32>
    %138 = vector.extract_strided_slice %134 {offsets = [15, 0], sizes = [15, 96], strides = [1, 1]} : vector<30x96xf32> to vector<15x96xf32>
    %cst_22 = arith.constant dense<0xFF800000> : vector<96xf32>
    %139 = vector.multi_reduction <maximumf>, %138, %cst_22 [0] : vector<15x96xf32> to vector<96xf32>
    %140 = vector.shape_cast %139 : vector<96xf32> to vector<1x96xf32>
    %141 = tpu.concatenate %137, %140 in 0 : vector<1x96xf32>, vector<1x96xf32> -> vector<2x96xf32>
    %c0_23 = arith.constant 0 : index
    %c0_24 = arith.constant 0 : index
    %142 = vector.load %arg7[%c0_23, %c0_24] : memref<96x256xf32, #tpu.memory_space<vmem>>, vector<96x256xf32>
    %cst_25 = arith.constant dense<0.000000e+00> : vector<2x256xf32>
    %143 = tpu.matmul %141, %142, %cst_25 {dimension_numbers = #tpu.dot_dimension_numbers<[1], [0], [0], [1], [0, 0, 1, 1], [], []>} : vector<2x96xf32>, vector<96x256xf32>, vector<2x256xf32> -> vector<2x256xf32>
    %c0_26 = arith.constant 0 : index
    %c0_27 = arith.constant 0 : index
    %144 = vector.load %arg8[%c0_26, %c0_27] : memref<1x256xf32, #tpu.memory_space<vmem>>, vector<1x256xf32>
    %145 = vector.broadcast %144 : vector<1x256xf32> to vector<2x256xf32>
    %146 = arith.addf %143, %145 : vector<2x256xf32>
    %cst_28 = arith.constant 0.000000e+00 : f32
    %147 = vector.broadcast %cst_28 : f32 to vector<2x256xf32>
    %148 = arith.maximumf %146, %147 : vector<2x256xf32>
    %c0_29 = arith.constant 0 : index
    %c0_30 = arith.constant 0 : index
    %149 = vector.load %arg9[%c0_29, %c0_30] : memref<256x128xf32, #tpu.memory_space<vmem>>, vector<256x128xf32>
    %cst_31 = arith.constant dense<0.000000e+00> : vector<2x128xf32>
    %150 = tpu.matmul %148, %149, %cst_31 {dimension_numbers = #tpu.dot_dimension_numbers<[1], [0], [0], [1], [0, 0, 1, 1], [], []>} : vector<2x256xf32>, vector<256x128xf32>, vector<2x128xf32> -> vector<2x128xf32>
    %c0_32 = arith.constant 0 : index
    %c0_33 = arith.constant 0 : index
    %151 = vector.load %arg10[%c0_32, %c0_33] : memref<1x128xf32, #tpu.memory_space<vmem>>, vector<1x128xf32>
    %152 = vector.broadcast %151 : vector<1x128xf32> to vector<2x128xf32>
    %153 = arith.addf %150, %152 : vector<2x128xf32>
    %cst_34 = arith.constant 0.000000e+00 : f32
    %154 = vector.broadcast %cst_34 : f32 to vector<2x128xf32>
    %155 = arith.maximumf %153, %154 : vector<2x128xf32>
    %c0_35 = arith.constant 0 : index
    %c0_36 = arith.constant 0 : index
    %156 = vector.load %arg11[%c0_35, %c0_36] : memref<128x50xf32, #tpu.memory_space<vmem>>, vector<128x50xf32>
    %cst_37 = arith.constant dense<0.000000e+00> : vector<2x50xf32>
    %157 = tpu.matmul %155, %156, %cst_37 {dimension_numbers = #tpu.dot_dimension_numbers<[1], [0], [0], [1], [0, 0, 1, 1], [], []>} : vector<2x128xf32>, vector<128x50xf32>, vector<2x50xf32> -> vector<2x50xf32>
    %c0_38 = arith.constant 0 : index
    %c0_39 = arith.constant 0 : index
    %158 = vector.load %arg12[%c0_38, %c0_39] : memref<1x50xf32, #tpu.memory_space<vmem>>, vector<1x50xf32>
    %159 = vector.broadcast %158 : vector<1x50xf32> to vector<2x50xf32>
    %160 = arith.addf %157, %159 : vector<2x50xf32>
    %c0_40 = arith.constant 0 : index
    %c0_41 = arith.constant 0 : index
    %161 = vector.load %arg13[%c0_40, %c0_41] : memref<2x50xf32, #tpu.memory_space<vmem>>, vector<2x50xf32>
    tpu.vector_store %arg13[%c0_40, %c0_41], %160 {strides = array<i32>} : memref<2x50xf32, #tpu.memory_space<vmem>>, vector<2x50xf32>,
    return
  }
}

</mosaic_0001>

<bundles_post_ra>
// kernel: simclr_head_forward.1
= control target key start
LH: loop header
LB: loop body
LE: loop exit
PB: predicated region body
PF: predicated region fallthrough
CT: control target
= control target key end

     0   :  { %vm6500_vm0 = vcmask 1042432   ;;  %vm6503_vm1 = vcmask 1044480   ;;  %s3249_s14 = smov 30   ;;  %vm6498_vm2 = vcmask 1046528   ;;  %s3250_s15 = smov 18   ;;  %vm6501_vm3 = vcmask 1041408   ;;  %s6374_s0 = inlined_call_operand.vmem [shape: f32[2,60,6], index: 0, kind: input, shape index: {}]   ;;  %s6375_s1 = inlined_call_operand.vmem [shape: f32[144,32], index: 1, kind: input, shape index: {}]   ;;  %s6376_s2 = inlined_call_operand.vmem [shape: f32[1,32], index: 2, kind: input, shape index: {}]   ;;  %s6377_s3 = inlined_call_operand.vmem [shape: f32[512,64], index: 3, kind: input, shape index: {}]   ;;  %s6378_s4 = inlined_call_operand.vmem [shape: f32[1,64], index: 4, kind: input, shape index: {}]   ;;  %s6379_s5 = inlined_call_operand.vmem [shape: f32[512,96], index: 5, kind: input, shape index: {}]   ;;  %s6380_s6 = inlined_call_operand.vmem [shape: f32[1,96], index: 6, kind: input, shape index: {}]   ;;  %s6381_s7 = inlined_call_operand.vmem [shape: f32[96,256], index: 7, kind: input, shape index: {}]   ;;  %s6382_s8 = inlined_call_operand.vmem [shape: f32[1,256], index: 8, kind: input, shape index: {}]   ;;  %s6383_s9 = inlined_call_operand.vmem [shape: f32[256,128], index: 9, kind: input, shape index: {}]   ;;  %s6384_s10 = inlined_call_operand.vmem [shape: f32[1,128], index: 10, kind: input, shape index: {}]   ;;  %s6385_s11 = inlined_call_operand.vmem [shape: f32[128,50], index: 11, kind: input, shape index: {}]   ;;  %s6386_s12 = inlined_call_operand.vmem [shape: f32[1,50], index: 12, kind: input, shape index: {}]   ;;  %s6387_s13 = inlined_call_operand.hbm [shape: f32[2,50], index: 13, kind: output, shape index: {}]  }
   0x1   :  { %v3341_v0 = vld [vmem:[%s6374_s0 + $0x10] sm:$0xff]  ;;  %v3346_v1 = vld [vmem:[%s6374_s0 + $0x18] sm:$0xff]  ;;  %v3351_v2 = vld [vmem:[%s6374_s0 + $0x8] sm:$0xff] }
   0x2   :  { %v206_v3 = vrot.slane %v3341_v0, 5  ;;  %v208_v4 = vrot.slane %v3346_v1, 5  ;;  %v6393_v5 = vrot.slane %v3351_v2, 5  ;;  %v154_v6 = vrot.slane %v3341_v0, 3 }
   0x3   :  { %v156_v7 = vrot.slane %v3346_v1, 3  ;;  %v6397_v8 = vrot.slane %v3351_v2, 3  ;;  %v104_v11 = vrot.slane %v3341_v0, 1  ;;  %v106_v16 = vrot.slane %v3346_v1, 1 }
   0x4   :  { %v3362_v9 = vsel %vm6500_vm0, %v206_v3, %v208_v4  ;;  %v3367_v10 = vsel %vm6500_vm0, %v6393_v5, %v206_v3  ;;  %v102_v17 = vrot.slane %v3351_v2, 1  ;;  %v233_v19 = vrot.slane %v3341_v0, 6 }
   0x5   :  { %218 = vrot.lane.b32.xlu2 %v3362_v9, %s3249_s14  ;;  %v3377_v13 = vsel %vm6503_vm1, %v154_v6, %v156_v7  ;;  %v3382_v14 = vsel %vm6503_vm1, %v6397_v8, %v154_v6  ;;  %v3391_v18 = vsel %vm6498_vm2, %v104_v11, %v106_v16  ;;  %v235_v20 = vrot.slane %v3346_v1, 6 }
   0x6   :  { %164 = vrot.lane.b32.xlu1 %v3377_v13, %s3250_s15  ;;  %v6388_v21 = vrot.slane %v3351_v2, 6 }
   0x7   :  { %18 = vsyncpa [#allocation3], 0  ;;  %s3251_s16 = smov 6   ;;  %v3401_v22 = vsel %vm6498_vm2, %v102_v17, %v104_v11  ;;  %v179_v23 = vrot.slane %v3341_v0, 4  ;;  %v3409_v25 = vsel %vm6501_vm3, %v233_v19, %v235_v20  ;;  %vm6497_vm4 = vcmask 1043456   ;;  %v3419_v27 = vld [vmem:[%s6374_s0 + $0x20] sm:$0xff] }
   0x8   :  { %114 = vrot.lane.b32.xlu0 %v3391_v18, %s3251_s16  ;;  %v3414_v26 = vsel %vm6501_vm3, %v6388_v21, %v233_v19  ;;  %v181_v29 = vrot.slane %v3346_v1, 4  ;;  %v6395_v30 = vrot.slane %v3351_v2, 4  ;;  %vm6499_vm5 = vcmask 1045504   ;;  %s3252_s19 = smov 36   ;;  %s3253_s20 = smov 24   ;;  %v3459_v41 = vld [vmem:[%s6374_s0 + $0x28] sm:$0xff] }
   0x9   :  { %v129_v31 = vrot.slane %v3341_v0, 2  ;;  %v131_v32 = vrot.slane %v3346_v1, 2  ;;  %v6399_v33 = vrot.slane %v3351_v2, 2  ;;  %v3439_v36 = vrot.slane %v3419_v27, 2  ;;  %6511 = vst [vmem:[#allocation6_spill] sm:$0xff] %v3459_v41  ;;  %s3254_s23 = smov 12  }
   0xa   :  { %v3431_v34 = vsel %vm6497_vm4, %v179_v23, %v181_v29  ;;  %v3436_v35 = vsel %vm6497_vm4, %v6395_v30, %v179_v23  ;;  %v3454_v40 = vrot.slane %v3419_v27, 1  ;;  %vm6505_vm6 = vcmask 1040384   ;;  %s3255_s24 = smov 42   ;;  %v3620_v60 = vld [vmem:[%s6374_s0 + $0x48] sm:$0xff]  ;;  %v2702_v56 = vld [vmem:[%s6374_s0 + $0x50] sm:$0xff]  ;;  %v2703_v12 = vld [vmem:[%s6374_s0 + $0x58] sm:$0xff] }
   0xb   :  { %v3446_v38 = vsel %vm6499_vm5, %v129_v31, %v131_v32  ;;  %v3451_v39 = vsel %vm6499_vm5, %v6399_v33, %v129_v31  ;;  %v260_v43 = vrot.slane %v3341_v0, 7  ;;  %v262_v44 = vrot.slane %v3346_v1, 7  ;;  %s3256_s17 = smov 48   ;;  %s3257_s18 = smov 54  }
   0xc   :  { %6510 = vst [vmem:[#allocation5_spill] sm:$0xff] %v3454_v40  ;;  %v6389_v45 = vrot.slane %v3351_v2, 7  ;;  %v210_v46 = vrot.slane %v3419_v27, 5  ;;  %v183_v47 = vrot.slane %v3419_v27, 4  ;;  %v3472_v48 = vsel %vm6499_vm5, %v131_v32, %v3439_v36  ;;  %s6466_s21 = smov 66   ;;  %s6468_s22 = smov 60  }
   0xd   :  { %245 = vrot.lane.b32.xlu2 %v3409_v25, %s3252_s19  ;;  %v3475_v49 = vrot.slane %v3419_v27, 3  ;;  %v3478_v50 = vrot.slane %v3459_v41, 1  ;;  %v264_v51 = vrot.slane %v3419_v27, 7  ;;  %v3483_v52 = vsel %vm6498_vm2, %v106_v16, %v3454_v40  ;;  %s6464_s27 = smov 72   ;;  %s6476_s30 = smov 84  }
   0xe   :  { %191 = vrot.lane.b32.xlu1 %v3431_v34, %s3253_s20  ;;  %v3486_v53 = vsel %vm6505_vm6, %v260_v43, %v262_v44  ;;  %v3491_v54 = vsel %vm6505_vm6, %v6389_v45, %v260_v43  ;;  %v237_v55 = vrot.slane %v3419_v27, 6  ;;  %v3499_v57 = vsel %vm6500_vm0, %v208_v4, %v210_v46  ;;  %s6474_s25 = smov 78   ;;  %s3263_s26 = smov 96  }
   0xf   :  { %6512 = vst [vmem:[#allocation7_spill] sm:$0xff] %v3475_v49  ;;  %v3502_v58 = vsel %vm6497_vm4, %v181_v29, %v183_v47  ;;  %v3507_v59 = vsel %vm6498_vm2, %v3454_v40, %v3478_v50  ;;  %v185_v61 = vrot.slane %v3459_v41, 4  ;;  %v3513_v62 = vrot.slane %v3459_v41, 3  ;;  %s3264_s28 = smov 90   ;;  %s6638_s29 = smov 72  }
  0x10   :  { %139 = vrot.lane.b32.xlu0 %v3446_v38, %s3254_s23  ;;  %6513 = vst [vmem:[#allocation8_spill] sm:$0xff] %v3478_v50  ;;  %v3516_v63 = vrot.slane %v3459_v41, 2  ;;  %v3524_v3 = vsel %vm6503_vm1, %v156_v7, %v3475_v49  ;;  %v3527_v4 = vsel %vm6505_vm6, %v262_v44, %v264_v51  ;;  %v266_v6 = vrot.slane %v3459_v41, 7 }
  0x11   :  { %6514 = vst [vmem:[#allocation9_spill] sm:$0xff] %v3513_v62  ;;  %v239_v11 = vrot.slane %v3459_v41, 6  ;;  %v3536_v16 = vsel %vm6497_vm4, %v183_v47, %v185_v61  ;;  %v3541_v7 = vsel %vm6503_vm1, %v3475_v49, %v3513_v62  ;;  %v212_v23 = vrot.slane %v3459_v41, 5 }
  0x12   :  { %6515 = vst [vmem:[#allocation10_spill] sm:$0xff] %v3516_v63  ;;  %v3546_v19 = vsel %vm6499_vm5, %v3439_v36, %v3516_v63  ;;  %v3558_v43 = vsel %vm6505_vm6, %v264_v51, %v266_v6  ;;  %v3563_v44 = vsel %vm6501_vm3, %v235_v20, %v237_v55  ;;  %v6390_v42 = vrot.slane %v3620_v60, 4 }
  0x13   :  { %6516 = vst [vmem:[#allocation11_spill] sm:$0xff] %v3527_v4  ;;  %v3568_v29 = vsel %vm6501_vm3, %v237_v55, %v239_v11  ;;  %v3571_v31 = vsel %vm6500_vm0, %v210_v46, %v212_v23  ;;  %v3600_v46 = vld [vmem:[%s6374_s0 + $0x30] sm:$0xff]  ;;  %v74_v15 = vrot.slane %v2702_v56, 4  ;;  %v76_v21 = vrot.slane %v2703_v12, 4 }
  0x14   :  { %6517 = vst [vmem:[#allocation12_spill] sm:$0xff] %v3558_v43  ;;  %v6396_v55 = vrot.slane %v3600_v46, 3  ;;  %v519_v47 = vrot.slane %v3600_v46, 2  ;;  %v508_v51 = vrot.slane %v3600_v46, 1  ;;  %v6391_v37 = vrot.slane %v3600_v46, 6 }
  0x15   :  { %141 = vrot.lane.b32.xlu2 %v3472_v48, %s3254_s23  ;;  %v6392_v24 = vrot.slane %v3600_v46, 5  ;;  %v3653_v12 = vsel %vm6497_vm4, %v74_v15, %v76_v21  ;;  %vm418_vm7 = vcmask 48128   ;;  %vm424_vm8 = vcmask 97280  }
  0x16   :  { %116 = vrot.lane.b32.xlu1 %v3483_v52, %s3251_s16  ;;  %v531_v20 = vsel %vm6503_vm1, %v3513_v62, %v6396_v55  ;;  %v520_v32 = vsel %vm6499_vm5, %v3516_v63, %v519_v47  ;;  %v509_v28 = vsel %vm6498_vm2, %v3478_v50, %v508_v51  ;;  %v3639_v45 = vsel %vm6501_vm3, %v239_v11, %v6391_v37 }
  0x17   :  { %6518 = vst [vmem:[#allocation13_spill] sm:$0xff] %v3639_v45  ;;  %v3650_v56 = vsel %vm6500_vm0, %v212_v23, %v6392_v24  ;;  %v6398_v23 = vrot.slane %v3600_v46, 7  ;;  %v626_v24 = vrot.slane %v3653_v12, 1  ;;  %v684_v8 = vrot.slane %v3653_v12, 3 }
  0x18   :  { %272 = vrot.lane.b32.xlu0 %v3486_v53, %s3255_s24  ;;  %6519 = vst [vmem:[#allocation14_spill] sm:$0xff] %v3650_v56  ;;  %vm6508_vm9 = vcmask 146432   ;;  %vm436_vm10 = vcmask 195584   ;;  %vm442_vm11 = vcmask 244736   ;;  %vm6509_vm12 = vcmask 293888  }
  0x19   :  { %6520 = vst [vmem:[#allocation15_spill] sm:$0xff] %v3653_v12  ;;  %v3686_v5 = vsel %vm6505_vm6, %v266_v6, %v6398_v23  ;;  %vm6502_vm13 = vcmask 343040   ;;  %vm6504_vm14 = vcmask 130048   ;;  %vm460_vm15 = vcmask 392192  }
  0x1a   :  { %6524 = vst [vmem:[#allocation19_spill] sm:$0xff] %v3686_v5 }
  0x1d   :  { %220 = vrot.lane.b32.xlu2 %v3499_v57, %s3249_s14 }
  0x1e   :  { %193 = vrot.lane.b32.xlu1 %v3502_v58, %s3253_s20 }
  0x20   :  { %166 = vrot.lane.b32.xlu0 %v3524_v3, %s3250_s15 }
  0x25   :  { %510 = vrot.lane.b32.xlu2 %v3507_v59, %s3251_s16 }
  0x26   :  { %274 = vrot.lane.b32.xlu1 %v3527_v4, %s3255_s24 }
  0x28   :  { %247 = vrot.lane.b32.xlu0 %v3563_v44, %s3252_s19 }
  0x2d   :  { %195 = vrot.lane.b32.xlu2 %v3536_v16, %s3253_s20 }
  0x2e   :  { %532 = vrot.lane.b32.xlu1 %v3541_v7, %s3250_s15 }
  0x30   :  { %521 = vrot.lane.b32.xlu0 %v3546_v19, %s3254_s23 }
  0x35   :  { %276 = vrot.lane.b32.xlu2 %v3558_v43, %s3255_s24 }
  0x36   :  { %249 = vrot.lane.b32.xlu1 %v3568_v29, %s3252_s19 }
  0x38   :  { %222 = vrot.lane.b32.xlu0 %v3571_v31, %s3249_s14 }
  0x3d   :  { %534 = vrot.lane.b32.xlu2 %v531_v20, %s3250_s15  ;;  %v3645_v20 = vsel %vm6497_vm4, %v6390_v42, %v74_v15  ;;  %v655_v42 = vrot.slane %v3653_v12, 2 }
  0x3e   :  { %523 = vrot.lane.b32.xlu1 %v520_v32, %s3254_s23  ;;  %v350_v32 = vrot.slane %v3600_v46, 4  ;;  %v6394_v11 = vrot.slane %v3645_v20, 2  ;;  %v6400_v37 = vrot.slane %v3645_v20, 1  ;;  %v6402_v55 = vrot.slane %v3645_v20, 3 }
  0x3f   :  { %v3815_v43 = vrot.slane %v3645_v20, 4 }
  0x40   :  { %512 = vrot.lane.b32.xlu0 %v509_v28, %s3251_s16  ;;  %v3662_v28 = vsel %vm6497_vm4, %v185_v61, %v350_v32  ;;  %v3672_v15 = vsel %vm6499_vm5, %v6394_v11, %v655_v42  ;;  %v3679_v61 = vld [vmem:[%s6374_s0] sm:$0xff]  ;;  %v3696_v30 = vsel %vm6498_vm2, %v6400_v37, %v626_v24  ;;  %v3708_v23 = vsel %vm6503_vm1, %v6402_v55, %v684_v8 }
  0x41   :  { %6521 = vst [vmem:[#allocation16_spill] sm:$0xff] %v3662_v28  ;;  %v101_v11 = vrot.slane %v3679_v61, 1  ;;  %v126_v37 = vrot.slane %v3679_v61, 2  ;;  %v176_v63 = vrot.slane %v3679_v61, 4 }
  0x42   :  { %6522 = vst [vmem:[#allocation17_spill] sm:$0xff] %v3672_v15 }
  0x43   :  { %6523 = vst [vmem:[#allocation18_spill] sm:$0xff] %v3679_v61  ;;  %v103_v6 = vsel %vm6498_vm2, %v101_v11, %v102_v17  ;;  %v6527_v17 = vrot.slane %v3351_v2, 2 }
  0x44   :  { %6525 = vst [vmem:[#allocation20_spill] sm:$0xff] %v3696_v30  ;;  %v2739_v33 = vpack.i.bf16 %v3401_v22, %v103_v6  ;;  %v3725_v6 = vld [vmem:[%s6374_s0 + $0x40] sm:$0xff] }
  0x45   :  { %560 = vrot.lane.b32.xlu2 %v3639_v45, %s3252_s19  ;;  %6526 = vst [vmem:[#allocation21_spill] sm:$0xff] %v3708_v23  ;;  %v128_v11 = vsel %vm6499_vm5, %v126_v37, %v6527_v17  ;;  %v3734_v37 = vrot.slane %v3653_v12, 5  ;;  %v52_v17 = vld [vmem:[%s6374_s0 + $0x38] sm:$0xf] }
  0x46   :  { %552 = vrot.lane.b32.xlu1 %v3650_v56, %s3249_s14  ;;  %v2744_v55 = vpack.i.bf16 %v3451_v39, %v128_v11  ;;  %v6529_v11 = vrot.slane %v3351_v2, 3  ;;  %6539 = vst [vmem:[#allocation28_spill] sm:$0xff] %v3815_v43 }
  0x47   :  { %6528 = vst [vmem:[#allocation22_spill] sm:$0xff] %v3734_v37 }
  0x48   :  { %544 = vrot.lane.b32.xlu0 %v3662_v28, %s3253_s20 }
  0x4d   :  { %665 = vrot.lane.b32.xlu2 %v3672_v15, %s3254_s23 }
  0x4e   :  { %568 = vrot.lane.b32.xlu1 %v3686_v5, %s3255_s24  ;;  %v711_v5 = vrot.slane %v3653_v12, 4 }
  0x50   :  { %636 = vrot.lane.b32.xlu0 %v3696_v30, %s3251_s16 }
  0x55   :  { %694 = vrot.lane.b32.xlu2 %v3708_v23, %s3250_s15  ;;  %v230_v23 = vrot.slane %v3679_v61, 6 }
  0x56   :  { %514 = vrot.lane.b32.xlu1 %v508_v51, %s3251_s16  ;;  %v151_v51 = vrot.slane %v3679_v61, 3 }
  0x58   :  { %2740 = vrot.lane.b32.xlu0 %v2739_v33, %s3251_s16  ;;  %v153_v56 = vsel %vm6503_vm1, %v151_v51, %v6529_v11  ;;  %v6532_v11 = vrot.slane %v3600_v46, 3 }
  0x59   :  { %v2749_v62 = vpack.i.bf16 %v3382_v14, %v153_v56 }
  0x5d   :  { %1099 = vrot.lane.b32.xlu2 %v711_v5, %s3253_s20 }
  0x5e   :  { %525 = vrot.lane.b32.xlu1 %v519_v47, %s3254_s23  ;;  %v3745_v47 = vld [vmem:[%s6374_s0 + $0x60] sm:$0xff] }
  0x5f   :  { %v3729_v33 = vpop.permute.xlu2 %218  ;;  %v6409_v28 = vrot.slane %v3745_v47, 4 }
  0x60   :  { %2745 = vrot.lane.b32.xlu0 %v2744_v55, %s3254_s23  ;;  %v6530_v55 = vrot.slane %v3725_v6, 4 }
  0x61   :  { %v3759_v51 = vsel %vm6497_vm4, %v76_v21, %v6409_v28  ;;  %v3776_v21 = vrot.slane %v3653_v12, 6  ;;  %v6535_v28 = vrot.slane %v3351_v2, 4 }
  0x62   :  { %v3751_v45 = vsel %vm6497_vm4, %v52_v17, %v6530_v55  ;;  %v6413_v50 = vrot.slane %v3759_v51, 1  ;;  %v6418_v4 = vrot.slane %v3759_v51, 2 }
  0x63   :  { %6531 = vst [vmem:[#allocation23_spill] sm:$0xff] %v3751_v45  ;;  %v542_v56 = vrot.slane %v3751_v45, 4  ;;  %v178_v41 = vsel %vm6497_vm4, %v176_v63, %v6535_v28  ;;  %v550_v30 = vrot.slane %v3751_v45, 5  ;;  %v6427_v28 = vrot.slane %v3759_v51, 4 }
  0x64   :  { %v3772_v55 = vsel %vm6498_vm2, %v626_v24, %v6413_v50  ;;  %6534 = vst [vmem:[#allocation25_spill] sm:$0xff] %v3776_v21  ;;  %v2754_v24 = vpack.i.bf16 %v3436_v35, %v178_v41  ;;  %v203_v50 = vrot.slane %v3679_v61, 5  ;;  %v3802_v41 = vsel %vm6499_vm5, %v655_v42, %v6418_v4 }
  0x65   :  { %1113 = vrot.lane.b32.xlu2 %v3734_v37, %s3249_s14  ;;  %6533 = vst [vmem:[#allocation24_spill] sm:$0xff] %v3772_v55  ;;  %v543_v49 = vsel %vm6497_vm4, %v350_v32, %v542_v56  ;;  %v6538_v56 = vrot.slane %v3351_v2, 5  ;;  %v6540_v42 = vrot.slane %v3600_v46, 5  ;;  %v3824_v32 = vsel %vm6497_vm4, %v3815_v43, %v711_v5 }
  0x66   :  { %536 = vrot.lane.b32.xlu1 %v6532_v11, %s3250_s15  ;;  %6537 = vst [vmem:[#allocation27_spill] sm:$0xff] %v3802_v41  ;;  %v6545_v43 = vrot.slane %v3600_v46, 6 }
  0x67   :  { %v3766_v17 = vpop.permute.xlu2 %245  ;;  %6541 = vst [vmem:[#allocation29_spill] sm:$0xff] %v3824_v32 }
  0x68   :  { %2750 = vrot.lane.b32.xlu0 %v2749_v62, %s3250_s15  ;;  %v6416_v62 = vrot.slane %v3759_v51, 3 }
  0x6a   :  { %v3797_v63 = vsel %vm6503_vm1, %v684_v8, %v6416_v62  ;;  %v205_v8 = vsel %vm6500_vm0, %v203_v50, %v6538_v56  ;;  %v257_v62 = vrot.slane %v3679_v61, 7  ;;  %v6542_v50 = vrot.slane %v3351_v2, 7 }
  0x6b   :  { %6536 = vst [vmem:[#allocation26_spill] sm:$0xff] %v3797_v63  ;;  %v2759_v4 = vpack.i.bf16 %v3367_v10, %v205_v8  ;;  %v3838_v8 = vsel %vm6497_vm4, %v711_v5, %v6427_v28  ;;  %v6553_v28 = vpack.i.bf16 %v3446_v38, %v3451_v39 }
  0x6c   :  { %v259_v56 = vsel %vm6505_vm6, %v257_v62, %v6542_v50  ;;  %6543 = vst [vmem:[#allocation30_spill] sm:$0xff] %v3838_v8  ;;  %v6544_v50 = vrot.slane %v3351_v2, 6 }
  0x6d   :  { %1127 = vrot.lane.b32.xlu2 %v3776_v21, %s3252_s19  ;;  %v2769_v62 = vpack.i.bf16 %v3491_v54, %v259_v56  ;;  %v2774_v56 = vpack.i.bf16 %v3341_v0, %v3351_v2  ;;  %v6547_v2 = vrot.slane %v3600_v46, 7  ;;  %v6550_v46 = vpack.i.bf16 %v3391_v18, %v3401_v22 }
  0x6e   :  { %546 = vrot.lane.b32.xlu1 %v543_v49, %s3253_s20  ;;  %v792_v49 = vrot.slane %v3653_v12, 7  ;;  %v232_v12 = vsel %vm6501_vm3, %v230_v23, %v6544_v50  ;;  %v566_v23 = vrot.slane %v3751_v45, 7  ;;  %v3862_v50 = vrot.slane %v3645_v20, 7 }
  0x6f   :  { %v3791_v11 = vpop.permute.xlu2 %141  ;;  %v2764_v5 = vpack.i.bf16 %v3414_v26, %v232_v12  ;;  %v6430_v12 = vrot.slane %v3759_v51, 7  ;;  %v6431_v18 = vrot.slane %v3759_v51, 6 }
  0x70   :  { %2755 = vrot.lane.b32.xlu0 %v2754_v24, %s3253_s20  ;;  %v551_v24 = vsel %vm6500_vm0, %v6540_v42, %v550_v30  ;;  %v558_v30 = vrot.slane %v3751_v45, 6 }
  0x72   :  { %v559_v40 = vsel %vm6501_vm3, %v6545_v43, %v558_v30  ;;  %v567_v30 = vsel %vm6505_vm6, %v6547_v2, %v566_v23 }
  0x75   :  { %1141 = vrot.lane.b32.xlu2 %v792_v49, %s3255_s24 }
  0x76   :  { %554 = vrot.lane.b32.xlu1 %v551_v24, %s3249_s14 }
  0x77   :  { %v3832_v15 = vpop.permute.xlu2 %220 }
  0x78   :  { %v3840_v42 = vpop.permute.xlu1 %164  ;;  %2760 = vrot.lane.b32.xlu0 %v2759_v4, %s3249_s14 }
  0x7a   :  { %v115_v61 = vpop.permute.xlu0 %114 }
  0x7b   :  { %v421_v39 = vsel %vm418_vm7, %v3341_v0, %v115_v61  ;;  %v6557_v0 = vrot.slane %v3745_v47, 4  ;;  %v3959_v61 = vld [vmem:[%s6374_s0 + $0x70] sm:$0xff] }
  0x7d   :  { %2770 = vrot.lane.b32.xlu2 %v2769_v62, %s3255_s24 }
  0x7e   :  { %562 = vrot.lane.b32.xlu1 %v559_v40, %s3252_s19  ;;  %v3867_v40 = vsel %vm6505_vm6, %v3862_v50, %v792_v49 }
  0x7f   :  { %v3855_v24 = vpop.permute.xlu2 %510  ;;  %6546 = vst [vmem:[#allocation31_spill] sm:$0xff] %v3867_v40 }
  0x80   :  { %v192_v4 = vpop.permute.xlu1 %191  ;;  %2765 = vrot.lane.b32.xlu0 %v2764_v5, %s3252_s19  ;;  %v3880_v5 = vsel %vm6505_vm6, %v792_v49, %v6430_v12 }
  0x81   :  { %6549 = vst [vmem:[#allocation33_spill] sm:$0xff] %v3880_v5 }
  0x82   :  { %v140_v43 = vpop.permute.xlu0 %139 }
  0x83   :  { %v427_v40 = vsel %vm424_vm8, %v421_v39, %v140_v43  ;;  %v6436_v39 = vrot.slane %v3959_v61, 4 }
  0x85   :  { %2775 = vrot.lane.b32.xlu2 %v2774_v56, %s3256_s17 }
  0x86   :  { %638 = vrot.lane.b32.xlu1 %v3772_v55, %s3251_s16  ;;  %v6589_v55 = vrot.slane %v3759_v51, 7 }
  0x87   :  { %v3875_v62 = vpop.permute.xlu2 %195 }
  0x88   :  { %6548 = vst [vmem:[#allocation32_spill] sm:$0xff] %v3875_v62  ;;  %v3882_v56 = vpop.permute.xlu1 %116  ;;  %570 = vrot.lane.b32.xlu0 %v567_v30, %s3255_s24  ;;  %v6552_v30 = vpack.i.bf16 %v3377_v13, %v3382_v14  ;;  %v3920_v13 = vsel %vm6501_vm3, %v3776_v21, %v6431_v18  ;;  %v6435_v14 = vrot.slane %v3759_v51, 5 }
  0x89   :  { %6554 = vst [vmem:[#allocation35_spill] sm:$0xff] %v3920_v13 }
  0x8a   :  { %v273_v32 = vpop.permute.xlu0 %272  ;;  %v3940_v18 = vsel %vm6500_vm0, %v3734_v37, %v6435_v14 }
  0x8b   :  { %6556 = vst [vmem:[#allocation36_spill] sm:$0xff] %v3940_v18 }
  0x8d   :  { %696 = vrot.lane.b32.xlu2 %v3797_v63, %s3250_s15 }
  0x8e   :  { %2780 = vrot.lane.b32.xlu1 %v6550_v46, %s3257_s18 }
  0x8f   :  { %v3893_v23 = vpop.permute.xlu2 %276 }
  0x90   :  { %6551 = vst [vmem:[#allocation34_spill] sm:$0xff] %v3893_v23  ;;  %v3895_v49 = vpop.permute.xlu1 %193  ;;  %667 = vrot.lane.b32.xlu0 %v3802_v41, %s3254_s23 }
  0x92   :  { %v3899_v2 = vpop.permute.xlu0 %166 }
  0x95   :  { %2790 = vrot.lane.b32.xlu2 %v6552_v30, %s6466_s21  ;;  %v2705_v30 = vld [vmem:[%s6374_s0 + $0x68] sm:$0xff] }
  0x96   :  { %723 = vrot.lane.b32.xlu1 %v3838_v8, %s3253_s20  ;;  %v80_v38 = vrot.slane %v2705_v30, 4 }
  0x97   :  { %v3908_v22 = vpop.permute.xlu2 %534 }
  0x98   :  { %v3910_v46 = vpop.permute.xlu1 %274  ;;  %2785 = vrot.lane.b32.xlu0 %v6553_v28, %s6468_s22  ;;  %v6555_v28 = vpack.i.bf16 %v3431_v34, %v3436_v35  ;;  %v3952_v34 = vsel %vm6497_vm4, %v6557_v0, %v80_v38  ;;  %v433_v35 = vsel %vm6508_vm9, %v427_v40, %v3840_v42  ;;  %v6560_v42 = vpack.i.bf16 %v3409_v25, %v3414_v26 }
  0x99   :  { %6558 = vst [vmem:[#allocation37_spill] sm:$0xff] %v3952_v34  ;;  %v439_v47 = vsel %vm436_vm10, %v433_v35, %v192_v4  ;;  %v3975_v40 = vsel %vm6497_vm4, %v80_v38, %v6436_v39  ;;  %v6564_v25 = vrot.slane %v3759_v51, 1  ;;  %v6577_v39 = vrot.slane %v3759_v51, 2 }
  0x9a   :  { %v3926_v12 = vpop.permute.xlu0 %247  ;;  %6561 = vst [vmem:[#allocation39_spill] sm:$0xff] %v3975_v40  ;;  %v3980_v0 = vrot.slane %v3975_v40, 1  ;;  %v445_v38 = vsel %vm442_vm11, %v439_v47, %v3729_v33  ;;  %v4089_v21 = vrot.slane %v3952_v34, 6  ;;  %v4136_v37 = vrot.slane %v3975_v40, 6 }
  0x9b   :  { %v451_v33 = vsel %vm6509_vm12, %v445_v38, %v3766_v17  ;;  %v4029_v17 = vrot.slane %v3975_v40, 2 }
  0x9c   :  { %6562 = vst [vmem:[#allocation40_spill] sm:$0xff] %v3980_v0  ;;  %v4010_v47 = vsel %vm6502_vm13, %v451_v33, %v273_v32 }
  0x9d   :  { %777 = vrot.lane.b32.xlu2 %v3920_v13, %s3252_s19  ;;  %6569 = vst [vmem:[#allocation45_spill] sm:$0xff] %v4010_v47 }
  0x9e   :  { %2795 = vrot.lane.b32.xlu1 %v6555_v28, %s6464_s27  ;;  %v3965_v28 = vrot.slane %v3952_v34, 1  ;;  %6574 = vst [vmem:[#allocation50_spill] sm:$0xff] %v4029_v17 }
  0x9f   :  { %v3943_v13 = vpop.permute.xlu2 %560  ;;  %6587 = vst [vmem:[#allocation59_spill] sm:$0xff] %v4089_v21 }
  0xa0   :  { %v3945_v30 = vpop.permute.xlu1 %532  ;;  %750 = vrot.lane.b32.xlu0 %v3940_v18, %s3249_s14  ;;  %6559 = vst [vmem:[#allocation38_spill] sm:$0xff] %v3965_v28  ;;  %v3990_v26 = vsel %vm6498_vm2, %v6564_v25, %v3965_v28  ;;  %v3997_v35 = vsel %vm6498_vm2, %v3965_v28, %v3980_v0  ;;  %v4013_v28 = vrot.slane %v3952_v34, 3 }
  0xa1   :  { %6565 = vst [vmem:[#allocation42_spill] sm:$0xff] %v3990_v26 }
  0xa2   :  { %v3961_v43 = vpop.permute.xlu0 %521  ;;  %6566 = vst [vmem:[#allocation43_spill] sm:$0xff] %v3997_v35 }
  0xa3   :  { %6570 = vst [vmem:[#allocation46_spill] sm:$0xff] %v4013_v28 }
  0xa5   :  { %2805 = vrot.lane.b32.xlu2 %v6560_v42, %s6476_s30  ;;  %v6567_v42 = vpack.i.bf16 %v3362_v9, %v3367_v10  ;;  %v4023_v9 = vrot.slane %v3952_v34, 4  ;;  %v4026_v10 = vrot.slane %v3975_v40, 3 }
  0xa6   :  { %804 = vrot.lane.b32.xlu1 %v3880_v5, %s3255_s24  ;;  %v4016_v5 = vrot.slane %v3952_v34, 2 }
  0xa7   :  { %v3982_v14 = vpop.permute.xlu2 %665  ;;  %6572 = vst [vmem:[#allocation48_spill] sm:$0xff] %v4023_v9 }
  0xa8   :  { %v3984_v4 = vpop.permute.xlu1 %249  ;;  %2800 = vrot.lane.b32.xlu0 %v6567_v42, %s6474_s25  ;;  %6571 = vst [vmem:[#allocation47_spill] sm:$0xff] %v4016_v5  ;;  %v6575_v42 = vrot.slane %v3759_v51, 3  ;;  %v4055_v18 = vsel %vm6499_vm5, %v4016_v5, %v4029_v17 }
  0xa9   :  { %6563 = vst [vmem:[#allocation41_spill] sm:$0xff] %v3984_v4 }
  0xaa   :  { %v4005_v25 = vpop.permute.xlu0 %222  ;;  %6573 = vst [vmem:[#allocation49_spill] sm:$0xff] %v4026_v10  ;;  %v4039_v33 = vsel %vm6503_vm1, %v6575_v42, %v4013_v28  ;;  %v6581_v42 = vpack.i.bf16 %v3486_v53, %v3491_v54  ;;  %v422_v53 = vsel %vm418_vm7, %v3346_v1, %v3882_v56  ;;  %v4081_v54 = vrot.slane %v3952_v34, 7 }
  0xab   :  { %6568 = vst [vmem:[#allocation44_spill] sm:$0xff] %v4005_v25 }
  0xac   :  { %6576 = vst [vmem:[#allocation51_spill] sm:$0xff] %v4039_v33  ;;  %v4110_v41 = vsel %vm6505_vm6, %v6589_v55, %v4081_v54  ;;  %v6594_v55 = vrot.slane %v3759_v51, 5 }
  0xad   :  { %600 = vrot.lane.b32.xlu2 %v4010_v47, %s3263_s26  ;;  %v4050_v47 = vsel %vm6503_vm1, %v4013_v28, %v4026_v10  ;;  %6580 = vst [vmem:[#allocation54_spill] sm:$0xff] %v4055_v18  ;;  %v6582_v28 = vrot.slane %v3759_v51, 4 }
  0xae   :  { %640 = vrot.lane.b32.xlu1 %v3990_v26, %s3251_s16  ;;  %v4045_v26 = vsel %vm6499_vm5, %v6577_v39, %v4016_v5  ;;  %6579 = vst [vmem:[#allocation53_spill] sm:$0xff] %v4050_v47 }
  0xaf   :  { %v4031_v32 = vpop.permute.xlu2 %694  ;;  %6578 = vst [vmem:[#allocation52_spill] sm:$0xff] %v4045_v26  ;;  %v4069_v63 = vsel %vm6497_vm4, %v6582_v28, %v4023_v9 }
  0xb0   :  { %v4033_v38 = vpop.permute.xlu1 %523  ;;  %2810 = vrot.lane.b32.xlu0 %v6581_v42, %s3264_s28  ;;  %6583 = vst [vmem:[#allocation55_spill] sm:$0xff] %v4069_v63  ;;  %v4084_v42 = vrot.slane %v3975_v40, 4 }
  0xb1   :  { %6584 = vst [vmem:[#allocation56_spill] sm:$0xff] %v4081_v54 }
  0xb2   :  { %v4071_v5 = vpop.permute.xlu0 %512  ;;  %6585 = vst [vmem:[#allocation57_spill] sm:$0xff] %v4084_v42  ;;  %v4096_v56 = vsel %vm6497_vm4, %v4023_v9, %v4084_v42  ;;  %v4113_v9 = vrot.slane %v3952_v34, 5 }
  0xb3   :  { %6588 = vst [vmem:[#allocation60_spill] sm:$0xff] %v4096_v56 }
  0xb4   :  { %6590 = vst [vmem:[#allocation61_spill] sm:$0xff] %v4110_v41 }
  0xb5   :  { %725 = vrot.lane.b32.xlu2 %v4069_v63, %s3253_s20  ;;  %6591 = vst [vmem:[#allocation62_spill] sm:$0xff] %v4113_v9 }
  0xb6   :  { %698 = vrot.lane.b32.xlu1 %v4039_v33, %s3250_s15  ;;  %v428_v33 = vsel %vm424_vm8, %v422_v53, %v3791_v11  ;;  %v6592_v11 = vrot.slane %v3759_v51, 6 }
  0xb7   :  { %v4086_v28 = vpop.permute.xlu2 %1099  ;;  %v434_v8 = vsel %vm6508_vm9, %v428_v33, %v3899_v2  ;;  %v4133_v33 = vsel %vm6500_vm0, %v6594_v55, %v4113_v9 }
  0xb8   :  { %6586 = vst [vmem:[#allocation58_spill] sm:$0xff] %v4086_v28  ;;  %v4091_v39 = vpop.permute.xlu1 %552  ;;  %669 = vrot.lane.b32.xlu0 %v4045_v26, %s3254_s23  ;;  %v4121_v53 = vsel %vm6501_vm3, %v6592_v11, %v4089_v21  ;;  %v440_v2 = vsel %vm436_vm10, %v434_v8, %v3895_v49  ;;  %v4139_v11 = vrot.slane %v3975_v40, 5  ;;  %v4150_v26 = vsel %vm6501_vm3, %v4089_v21, %v4136_v37 }
  0xb9   :  { %6593 = vst [vmem:[#allocation63_spill] sm:$0xff] %v4121_v53  ;;  %v446_v8 = vsel %vm442_vm11, %v440_v2, %v3832_v15  ;;  %v2814_v21 = vpack.i.bf16 %v3419_v27, %v3346_v1 }
  0xba   :  { %v4115_v28 = vpop.permute.xlu0 %544  ;;  %6595 = vst [vmem:[#allocation64_spill] sm:$0xff] %v4133_v33  ;;  %v4155_v55 = vsel %vm6500_vm0, %v4113_v9, %v4139_v11  ;;  %v452_v34 = vsel %vm6509_vm12, %v446_v8, %v3926_v12  ;;  %v4177_v12 = vrot.slane %v3975_v40, 7 }
  0xbb   :  { %6597 = vst [vmem:[#allocation66_spill] sm:$0xff] %v4150_v26  ;;  %v4171_v9 = vsel %vm6502_vm13, %v452_v34, %v3910_v46  ;;  %v6602_v46 = vpack.i.bf16 %v3541_v7, %v3524_v3  ;;  %v6604_v3 = vpack.i.bf16 %v3536_v16, %v3502_v58  ;;  %v1262_v16 = vld [vmem:[%s6375_s1 + $0x88] sm:$0xff] }
  0xbc   :  { %6598 = vst [vmem:[#allocation67_spill] sm:$0xff] %v4155_v55  ;;  %v4186_v1 = vsel %vm6505_vm6, %v4081_v54, %v4177_v12  ;;  %1350 = vmatpush.msra.mxu1 %v1262_v16  ;;  %v574_v16 = vsel %vm418_vm7, %v3419_v27, %v3855_v24  ;;  %v1258_v27 = vld [vmem:[%s6375_s1 + $0x68] sm:$0xff] }
  0xbd   :  { %806 = vrot.lane.b32.xlu2 %v4110_v41, %s3255_s24  ;;  %6599 = vst [vmem:[#allocation68_spill] sm:$0xff] %v4171_v9  ;;  %v6609_v24 = vld [vmem:[#allocation5_spill] sm:$0xff] }
  0xbe   :  { %779 = vrot.lane.b32.xlu1 %v4121_v53, %s3252_s19  ;;  %6600 = vst [vmem:[#allocation69_spill] sm:$0xff] %v4186_v1 }
  0xbf   :  { %v4141_v63 = vpop.permute.xlu2 %1113 }
  0xc0   :  { %6596 = vst [vmem:[#allocation65_spill] sm:$0xff] %v4141_v63  ;;  %v4145_v49 = vpop.permute.xlu1 %568  ;;  %752 = vrot.lane.b32.xlu0 %v4133_v33, %s3249_s14 }
  0xc2   :  { %v4167_v63 = vpop.permute.xlu0 %636 }
  0xc5   :  { %602 = vrot.lane.b32.xlu2 %v4171_v9, %s3263_s26 }
  0xc6   :  { %2815 = vrot.lane.b32.xlu1 %v2814_v21, %s3256_s17  ;;  %v6601_v21 = vpack.i.bf16 %v3507_v59, %v3483_v52  ;;  %v6603_v59 = vpack.i.bf16 %v3546_v19, %v3472_v48  ;;  %v650_v19 = vrot.slane %v3751_v45, 2 }
  0xc7   :  { %v4179_v8 = vpop.permute.xlu2 %1127 }
  0xc8   :  { %v4181_v2 = vpop.permute.xlu1 %514  ;;  %1066 = vrot.lane.b32.xlu0 %v3997_v35, %s3251_s16 }
  0xca   :  { %v4192_v34 = vpop.permute.xlu0 %2740 }
  0xcd   :  { %1088 = vrot.lane.b32.xlu2 %v4050_v47, %s3250_s15  ;;  %v6622_v47 = vrot.slane %v3645_v20, 2 }
  0xce   :  { %2820 = vrot.lane.b32.xlu1 %v6601_v21, %s3257_s18 }
  0xcf   :  { %v4200_v15 = vpop.permute.xlu2 %1141 }
  0xd0   :  { %v4202_v54 = vpop.permute.xlu1 %525  ;;  %1077 = vrot.lane.b32.xlu0 %v4055_v18, %s3254_s23 }
  0xd2   :  { %v4206_v40 = vpop.permute.xlu0 %2745 }
  0xd5   :  { %2830 = vrot.lane.b32.xlu2 %v6602_v46, %s6466_s21  ;;  %v6605_v46 = vrot.slane %v3620_v60, 4  ;;  %v1260_v60 = vld [vmem:[%s6375_s1 + $0x78] sm:$0xff] }
  0xd6   :  { %1101 = vrot.lane.b32.xlu1 %v4096_v56, %s3253_s20  ;;  %v6606_v56 = vrot.slane %v3725_v6, 4  ;;  %v6607_v6 = vpack.i.bf16 %v3568_v29, %v3563_v44  ;;  %1289 = vmatpush.msra.mxu0 %v1260_v60  ;;  %v6608_v29 = vpack.i.bf16 %v3571_v31, %v3499_v57  ;;  %v1261_v60 = vld [vmem:[%s6375_s1 + $0x80] sm:$0xff] }
  0xd7   :  { %v4214_v41 = vpop.permute.xlu2 %2770  ;;  %1351 = vmatpush.msra.mxu1 %v1261_v60  ;;  %v6610_v60 = vld [vmem:[#allocation12_spill] sm:$0xff] }
  0xd8   :  { %v4216_v52 = vpop.permute.xlu1 %536  ;;  %2825 = vrot.lane.b32.xlu0 %v6603_v59, %s6468_s22  ;;  %v4237_v33 = vsel %vm6497_vm4, %v6606_v56, %v6605_v46  ;;  %s6629_s22 = smov 60  }
  0xd9   :  { %v6472_v59 = vrot.slane %v4237_v33, 2  ;;  %v6473_v46 = vrot.slane %v4237_v33, 1  ;;  %v708_v57 = vrot.slane %v4237_v33, 4 }
  0xda   :  { %v4222_v21 = vpop.permute.xlu0 %2750 }
  0xdb   :  { %v652_v56 = vsel %vm6499_vm5, %v650_v19, %v6472_v59  ;;  %v1259_v19 = vld [vmem:[%s6375_s1 + $0x70] sm:$0xff] }
  0xdc   :  { %v2859_v44 = vpack.i.bf16 %v3439_v36, %v652_v56  ;;  %1290 = vmatpush.msra.mxu0 %v1259_v19  ;;  %v577_v36 = vsel %vm424_vm8, %v574_v16, %v3961_v43  ;;  %v679_v56 = vrot.slane %v3751_v45, 3  ;;  %v2707_v19 = vld [vmem:[%s6374_s0 + $0x78] sm:$0xf] }
  0xdd   :  { %1129 = vrot.lane.b32.xlu2 %v4150_v26, %s3252_s19  ;;  %v580_v43 = vsel %vm6508_vm9, %v577_v36, %v3945_v30  ;;  %v6611_v16 = vld [vmem:[#allocation11_spill] sm:$0xff]  ;;  %v6614_v30 = vrot.slane %v4237_v33, 3  ;;  %v4328_v26 = vrot.slane %v3645_v20, 6 }
  0xde   :  { %2835 = vrot.lane.b32.xlu1 %v6604_v3, %s6464_s27  ;;  %v621_v3 = vrot.slane %v3751_v45, 1  ;;  %1291 = vmatpush.msra.mxu0 %v1258_v27  ;;  %v6612_v59 = vpack.i.bf16 %v6610_v60, %v6611_v16  ;;  %v583_v60 = vsel %vm436_vm10, %v580_v43, %v3875_v62  ;;  %v1253_v43 = vld [vmem:[%s6375_s1 + $0x40] sm:$0xff]  ;;  %v6621_v62 = vld [vmem:[#allocation18_spill] sm:$0xff]  ;;  %s6631_s27 = smov 66  }
  0xdf   :  { %v4230_v7 = vpop.permute.xlu2 %2775  ;;  %v681_v36 = vsel %vm6503_vm1, %v679_v56, %v6614_v30  ;;  %v586_v56 = vsel %vm442_vm11, %v583_v60, %v4005_v25 }
  0xe0   :  { %v4239_v48 = vpop.permute.xlu1 %546  ;;  %1115 = vrot.lane.b32.xlu0 %v4155_v55, %s3249_s14 }
  0xe2   :  { %v4245_v58 = vpop.permute.xlu0 %2755 }
  0xe5   :  { %2845 = vrot.lane.b32.xlu2 %v6607_v6, %s6476_s30  ;;  %v623_v6 = vsel %vm6498_vm2, %v621_v3, %v6473_v46  ;;  %v6613_v46 = vld [vmem:[#allocation28_spill] sm:$0xff]  ;;  %s6635_s30 = smov 84  }
  0xe6   :  { %1143 = vrot.lane.b32.xlu1 %v4186_v1, %s3255_s24  ;;  %v2849_v3 = vpack.i.bf16 %v6609_v24, %v623_v6  ;;  %v1256_v6 = vld [vmem:[%s6375_s1 + $0x58] sm:$0xff]  ;;  %v1255_v1 = vld [vmem:[%s6375_s1 + $0x50] sm:$0xff] }
  0xe7   :  { %v4264_v55 = vpop.permute.xlu2 %696 }
  0xe8   :  { %v4266_v53 = vpop.permute.xlu1 %554  ;;  %2840 = vrot.lane.b32.xlu0 %v6608_v29, %s6474_s25  ;;  %v710_v29 = vsel %vm6497_vm4, %v708_v57, %v6613_v46  ;;  %s6636_s25 = smov 78  }
  0xe9   :  { %v2869_v16 = vpack.i.bf16 %v710_v29, %v708_v57  ;;  %v6616_v57 = vrot.slane %v3959_v61, 4 }
  0xea   :  { %v4288_v31 = vpop.permute.xlu0 %2760 }
  0xeb   :  { %v2762_v45 = vunpack.i.l.bf16 %v4288_v31 }
  0xed   :  { %2860 = vrot.lane.b32.xlu2 %v2859_v44, %s3254_s23  ;;  %v1257_v44 = vld [vmem:[%s6375_s1 + $0x60] sm:$0xff] }
  0xee   :  { %2855 = vrot.lane.b32.xlu1 %v6612_v59, %s3264_s28  ;;  %1292 = vmatpush.msra.mxu0 %v1257_v44  ;;  %v84_v59 = vrot.slane %v2707_v19, 4  ;;  %v6615_v44 = vld [vmem:[#allocation7_spill] sm:$0xff]  ;;  %v762_v19 = vrot.slane %v4237_v33, 6 }
  0xef   :  { %v4314_v27 = vpop.permute.xlu2 %2790  ;;  %v2864_v30 = vpack.i.bf16 %v6615_v44, %v681_v36  ;;  %v735_v36 = vrot.slane %v4237_v33, 5 }
  0xf0   :  { %v4319_v24 = vpop.permute.xlu1 %562  ;;  %2850 = vrot.lane.b32.xlu0 %v2849_v3, %s3251_s16  ;;  %1293 = vmatpush.msra.mxu0 %v1256_v6  ;;  %v4339_v29 = vsel %vm6497_vm4, %v6616_v57, %v84_v59  ;;  %v1254_v3 = vld [vmem:[%s6375_s1 + $0x48] sm:$0xff]  ;;  %v589_v6 = vsel %vm6509_vm12, %v586_v56, %v3984_v4  ;;  %v764_v61 = vsel %vm6501_vm3, %v762_v19, %v4328_v26  ;;  %v1252_v59 = vld [vmem:[%s6375_s1 + $0x38] sm:$0xff]  ;;  %v1251_v57 = vld [vmem:[%s6375_s1 + $0x30] sm:$0xff] }
  0xf1   :  { %v592_v56 = vsel %vm6502_vm13, %v589_v6, %v3893_v23  ;;  %v789_v6 = vrot.slane %v4237_v33, 7 }
  0xf2   :  { %v4334_v9 = vpop.permute.xlu0 %2765  ;;  %1294 = vmatpush.msra.mxu0 %v1255_v1  ;;  %v4351_v1 = vrot.slane %v3645_v20, 5 }
  0xf4   :  { %1295 = vmatpush.msra.mxu0 %v1254_v3  ;;  %v737_v3 = vsel %vm6500_vm0, %v735_v36, %v4351_v1 }
  0xf5   :  { %2870 = vrot.lane.b32.xlu2 %v2869_v16, %s3253_s20  ;;  %v6482_v16 = vrot.slane %v4339_v29, 1 }
  0xf6   :  { %2865 = vrot.lane.b32.xlu1 %v2864_v30, %s3250_s15  ;;  %1296 = vmatpush.msra.mxu0 %v1253_v43  ;;  %v2879_v30 = vpack.i.bf16 %v764_v61, %v762_v19  ;;  %v1250_v19 = vld [vmem:[%s6375_s1 + $0x28] sm:$0xff]  ;;  %v2874_v61 = vpack.i.bf16 %v737_v3, %v735_v36 }
  0xf7   :  { %v4360_v60 = vpop.permute.xlu2 %777  ;;  %v1065_v43 = vsel %vm6498_vm2, %v3980_v0, %v6482_v16  ;;  %v791_v0 = vsel %vm6505_vm6, %v789_v6, %v3862_v50 }
  0xf8   :  { %6617 = vst [vmem:[#allocation5_spill] sm:$0xff] %v4360_v60  ;;  %v4365_v44 = vpop.permute.xlu1 %638  ;;  %604 = vrot.lane.b32.xlu0 %v592_v56, %s3263_s26  ;;  %1297 = vmatpush.msra.mxu0 %v1252_v59  ;;  %v6485_v59 = vrot.slane %v4339_v29, 3  ;;  %v1249_v56 = vld [vmem:[%s6375_s1 + $0x20] sm:$0xff]  ;;  %v2884_v3 = vpack.i.bf16 %v791_v0, %v789_v6 }
  0xfa   :  { %v4373_v4 = vpop.permute.xlu0 %570  ;;  %1298 = vmatpush.msra.mxu0 %v1251_v57  ;;  %v1248_v57 = vld [vmem:[%s6375_s1 + $0x18] sm:$0xff] }
  0xfc   :  { %1299 = vmatpush.msra.mxu0 %v1250_v19  ;;  %v6486_v19 = vrot.slane %v4339_v29, 2 }
  0xfd   :  { %2880 = vrot.lane.b32.xlu2 %v2879_v30, %s3252_s19  ;;  %v1247_v30 = vld [vmem:[%s6375_s1 + $0x10] sm:$0xff] }
  0xfe   :  { %1068 = vrot.lane.b32.xlu1 %v1065_v43, %s3251_s16  ;;  %1300 = vmatpush.msra.mxu0 %v1249_v56  ;;  %v1087_v43 = vsel %vm6503_vm1, %v4026_v10, %v6485_v59  ;;  %v1245_v56 = vld [vmem:[%s6375_s1] sm:$0xff]  ;;  %v1076_v0 = vsel %vm6499_vm5, %v4029_v17, %v6486_v19  ;;  %v6620_v19 = vld [vmem:[#allocation6_spill] sm:$0xff]  ;;  %v2742_v17 = vunpack.i.l.bf16 %v4192_v34 }
  0xff   :  { %v4392_v16 = vpop.permute.xlu2 %2805  ;;  %v575_v10 = vsel %vm418_vm7, %v6620_v19, %v4071_v5 }
 0x100   :  { %v4396_v36 = vpop.permute.xlu1 %2780  ;;  %2875 = vrot.lane.b32.xlu0 %v2874_v61, %s3249_s14  ;;  %1301 = vmatpush.msra.mxu0 %v1248_v57  ;;  %v1246_v61 = vld [vmem:[%s6375_s1 + $0x8] sm:$0xff]  ;;  %v6489_v57 = vrot.slane %v4339_v29, 4  ;;  %v419_v35 = vsel %vm418_vm7, %v6621_v62, %v2742_v17  ;;  %v6623_v62 = vrot.slane %v4237_v33, 2 }
 0x102   :  { %v4407_v23 = vpop.permute.xlu0 %667  ;;  %1302 = vmatpush.msra.mxu0 %v1247_v30  ;;  %v4473_v17 = vsel %vm6499_vm5, %v6623_v62, %v6622_v47  ;;  %v2758_v47 = vunpack.i.h.bf16 %v4245_v58  ;;  %vm478_vm5 = vcmask 539648  }
 0x104   :  { %1303 = vmatpush.msra.mxu0 %v1246_v61 }
 0x105   :  { %1090 = vrot.lane.b32.xlu2 %v1087_v43, %s3250_s15  ;;  %v6618_v43 = vrot.slane %v3645_v20, 1 }
 0x106   :  { %2885 = vrot.lane.b32.xlu1 %v2884_v3, %s3255_s24  ;;  %1304 = vmatpush.msra.mxu0 %v1245_v56  ;;  %v6619_v3 = vrot.slane %v4237_v33, 1  ;;  %v1098_v56 = vsel %vm6497_vm4, %v4084_v42, %v6489_v57  ;;  %v578_v57 = vsel %vm424_vm8, %v575_v10, %v4033_v38  ;;  %v2757_v42 = vunpack.i.l.bf16 %v4245_v58 }
 0x107   :  { %v4421_v6 = vpop.permute.xlu2 %600  ;;  %v581_v10 = vsel %vm6508_vm9, %v578_v57, %v3908_v22  ;;  %v2743_v38 = vunpack.i.h.bf16 %v4192_v34  ;;  %v6624_v22 = vrot.slane %v4339_v29, 5  ;;  %v2753_v57 = vunpack.i.h.bf16 %v4222_v21 }
 0x108   :  { %v4424_v30 = vpop.permute.xlu1 %723  ;;  %2708 = vmatmul.msk.f32.vlgmr.msra.gmra.mxu1 %vm6504_vm14, %v4421_v6  ;;  %1079 = vrot.lane.b32.xlu0 %v1076_v0, %s3254_s23  ;;  %v625_v61 = vsel %vm6498_vm2, %v6619_v3, %v6618_v43  ;;  %v2747_v0 = vunpack.i.l.bf16 %v4206_v40  ;;  %v2889_v43 = vpack.i.bf16 %v6620_v19, %v4237_v33  ;;  %v2752_v3 = vunpack.i.l.bf16 %v4222_v21 }
 0x109   :  { %v1112_v34 = vsel %vm6500_vm0, %v4139_v11, %v6624_v22  ;;  %v2763_v58 = vunpack.i.h.bf16 %v4288_v31  ;;  %vm466_vm4 = vcmask 441344   ;;  %vm472_vm2 = vcmask 490496  }
 0x10a   :  { %v4434_v59 = vpop.permute.xlu0 %2785  ;;  %v425_v19 = vsel %vm424_vm8, %v419_v35, %v2747_v0  ;;  %v584_v35 = vsel %vm436_vm10, %v581_v10, %v4115_v28  ;;  %v2748_v0 = vunpack.i.h.bf16 %v4206_v40  ;;  %v6625_v28 = vld [vmem:[#allocation8_spill] sm:$0xff]  ;;  %vm484_vm0 = vcmask 588800  }
 0x10b   :  { %v431_v5 = vsel %vm6508_vm9, %v425_v19, %v2752_v3  ;;  %v2894_v10 = vpack.i.bf16 %v6625_v28, %v625_v61  ;;  %v587_v40 = vsel %vm442_vm11, %v584_v35, %v4091_v39  ;;  %v1125_v39 = vrot.slane %v4339_v29, 6 }
 0x10d   :  { %634 = vrot.lane.b32.xlu2 %v625_v61, %s3251_s16 }
 0x10e   :  { %1103 = vrot.lane.b32.xlu1 %v1098_v56, %s3253_s20  ;;  %v2767_v56 = vunpack.i.l.bf16 %v4334_v9 }
 0x10f   :  { %v4453_v25 = vpop.permute.xlu2 %725 }
 0x110   :  { %v4459_v18 = vpop.permute.xlu1 %2795  ;;  %2890 = vrot.lane.b32.xlu0 %v2889_v43, %s3256_s17  ;;  %v437_v43 = vsel %vm436_vm10, %v431_v5, %v2757_v42  ;;  %v3219_v42 = vld [vmem:[%s6374_s0 + $0x8] sm:$0xff]  ;;  %v2777_v5 = vunpack.i.l.bf16 %v4230_v7 }
 0x111   :  { %v443_v3 = vsel %vm442_vm11, %v437_v43, %v2762_v45  ;;  %v420_v21 = vsel %vm418_vm7, %v3219_v42, %v2743_v38  ;;  %v2772_v45 = vunpack.i.l.bf16 %v4214_v41  ;;  %v2782_v43 = vunpack.i.l.bf16 %v4396_v36 }
 0x112   :  { %v4479_v60 = vpop.permute.xlu0 %750  ;;  %v449_v19 = vsel %vm6509_vm12, %v443_v3, %v2767_v56  ;;  %v426_v61 = vsel %vm424_vm8, %v420_v21, %v2748_v0  ;;  %v2768_v56 = vunpack.i.h.bf16 %v4334_v9  ;;  %v2787_v0 = vunpack.i.l.bf16 %v4434_v59  ;;  %v6626_v21 = vld [vmem:[#allocation10_spill] sm:$0xff] }
 0x113   :  { %v432_v35 = vsel %vm6508_vm9, %v426_v61, %v2753_v57  ;;  %v455_v38 = vsel %vm6502_vm13, %v449_v19, %v2772_v45  ;;  %v590_v9 = vsel %vm6509_vm12, %v587_v40, %v3943_v13  ;;  %v2773_v3 = vunpack.i.h.bf16 %v4214_v41 }
 0x114   :  { %v438_v22 = vsel %vm436_vm10, %v432_v35, %v2758_v47  ;;  %v593_v57 = vsel %vm6502_vm13, %v590_v9, %v4145_v49  ;;  %v461_v47 = vsel %vm460_vm15, %v455_v38, %v2777_v5  ;;  %v2778_v13 = vunpack.i.h.bf16 %v4230_v7 }
 0x115   :  { %663 = vrot.lane.b32.xlu2 %v4473_v17, %s3254_s23  ;;  %v2792_v40 = vunpack.i.l.bf16 %v4314_v27  ;;  %v467_v42 = vsel %vm466_vm4, %v461_v47, %v2782_v43  ;;  %v2797_v41 = vunpack.i.l.bf16 %v4459_v18  ;;  %v2899_v45 = vpack.i.bf16 %v6626_v21, %v4473_v17 }
 0x116   :  { %1117 = vrot.lane.b32.xlu1 %v1112_v34, %s3249_s14  ;;  %v444_v34 = vsel %vm442_vm11, %v438_v22, %v2763_v58  ;;  %v473_v49 = vsel %vm472_vm2, %v467_v42, %v2787_v0  ;;  %v2783_v61 = vunpack.i.h.bf16 %v4396_v36  ;;  %v1139_v5 = vrot.slane %v4339_v29, 7 }
 0x117   :  { %v4504_v62 = vpop.permute.xlu2 %806  ;;  %v450_v19 = vsel %vm6509_vm12, %v444_v34, %v2768_v56  ;;  %v2788_v56 = vunpack.i.h.bf16 %v4434_v59  ;;  %v6627_v38 = vrot.slane %v3645_v20, 3  ;;  %v6628_v43 = vrot.slane %v4237_v33, 3 }
 0x118   :  { %v4510_v31 = vpop.permute.xlu1 %804  ;;  %2895 = vrot.lane.b32.xlu0 %v2894_v10, %s3257_s18  ;;  %v1126_v10 = vsel %vm6501_vm3, %v4136_v37, %v1125_v39  ;;  %v456_v58 = vsel %vm6502_vm13, %v450_v19, %v2773_v3  ;;  %vm6507_vm3 = vcmask 637952   ;;  %v479_v22 = vsel %vm478_vm5, %v473_v49, %v2792_v40 }
 0x119   :  { %v683_v17 = vsel %vm6503_vm1, %v6628_v43, %v6627_v38  ;;  %v462_v36 = vsel %vm460_vm15, %v456_v58, %v2778_v13  ;;  %v485_v9 = vsel %vm484_vm0, %v479_v22, %v2797_v41  ;;  %vm496_vm13 = vcmask 687104  }
 0x11a   :  { %v2801_v28 = vpop.permute.xlu0 %2800  ;;  %v468_v59 = vsel %vm466_vm4, %v462_v36, %v2783_v61  ;;  %v1140_v19 = vsel %vm6505_vm6, %v4177_v12, %v1139_v5  ;;  %v2807_v47 = vunpack.i.l.bf16 %v4392_v16  ;;  %v2798_v13 = vunpack.i.h.bf16 %v4459_v18 }
 0x11b   :  { %v2802_v7 = vunpack.i.l.bf16 %v2801_v28  ;;  %vm502_vm1 = vcmask 736256   ;;  %v2793_v42 = vunpack.i.h.bf16 %v4314_v27  ;;  %v2803_v49 = vunpack.i.h.bf16 %v2801_v28 }
 0x11c   :  { %v2808_v36 = vunpack.i.h.bf16 %v4392_v16  ;;  %vm6641_vm6 = vcmask 343040  }
 0x11d   :  { %606 = vrot.lane.b32.xlu2 %v593_v57, %s3263_s26  ;;  %v491_v34 = vsel %vm6507_vm3, %v485_v9, %v2802_v7  ;;  %v6630_v57 = vld [vmem:[#allocation9_spill] sm:$0xff]  ;;  %v6633_v9 = vld [vmem:[#allocation14_spill] sm:$0xff] }
 0x11e   :  { %1131 = vrot.lane.b32.xlu1 %v1126_v10, %s3252_s19  ;;  %v2904_v3 = vpack.i.bf16 %v6630_v57, %v683_v17  ;;  %v474_v10 = vsel %vm472_vm2, %v468_v59, %v2788_v56  ;;  %v497_v21 = vsel %vm496_vm13, %v491_v34, %v2807_v47  ;;  %v6637_v47 = vld [vmem:[#allocation58_spill] sm:$0xff] }
 0x11f   :  { %v603_v35 = vpop.permute.xlu2 %602  ;;  %v480_v58 = vsel %vm478_vm5, %v474_v10, %v2793_v42 }
 0x120   :  { %v641_v0 = vpop.permute.xlu1 %640  ;;  %2709 = vmatmul.msk.f32.gmra.mxu1 %vm6504_vm14, %v603_v35  ;;  %2900 = vrot.lane.b32.xlu0 %v2899_v45, %s6629_s22  ;;  %vm6506_vm14 = vcmask 785408   ;;  %v976_v45 = vsel %vm418_vm7, %v3645_v20, %v4167_v63  ;;  %v486_v18 = vsel %vm484_vm0, %v480_v58, %v2798_v13  ;;  %v6632_v63 = vld [vmem:[#allocation13_spill] sm:$0xff] }
 0x121   :  { %v492_v7 = vsel %vm6507_vm3, %v486_v18, %v2803_v49  ;;  %v2919_v43 = vpack.i.bf16 %v6632_v63, %v4328_v26  ;;  %v982_v22 = vsel %vm424_vm8, %v976_v45, %v3982_v14  ;;  %v6634_v14 = vld [vmem:[#allocation16_spill] sm:$0xff]  ;;  %v6640_v49 = vld [vmem:[#allocation15_spill] sm:$0xff] }
 0x122   :  { %v2811_v40 = vpop.permute.xlu0 %2810  ;;  %v498_v34 = vsel %vm496_vm13, %v492_v7, %v2808_v36  ;;  %v4586_v57 = vsel %vm6508_vm9, %v982_v22, %v4031_v32  ;;  %v2909_v16 = vpack.i.bf16 %v6634_v14, %v6613_v46  ;;  %v6639_v46 = vld [vmem:[#allocation65_spill] sm:$0xff]  ;;  %v6642_v18 = vld [vmem:[#allocation19_spill] sm:$0xff]  ;;  %v6653_v14 = vld [vmem:[#allocation22_spill] sm:$0xff] }
 0x123   :  { %v2812_v41 = vunpack.i.l.bf16 %v2811_v40  ;;  %v2813_v56 = vunpack.i.h.bf16 %v2811_v40  ;;  %v1162_v10 = vsel %vm436_vm10, %v4586_v57, %v6637_v47  ;;  %v6645_v22 = vld [vmem:[#allocation17_spill] sm:$0xff]  ;;  %v6655_v47 = vld [vmem:[#allocation26_spill] sm:$0xff] }
 0x124   :  { %v1166_v42 = vsel %vm442_vm11, %v1162_v10, %v6639_v46  ;;  %v6656_v10 = vld [vmem:[#allocation21_spill] sm:$0xff]  ;;  %v6660_v46 = vld [vmem:[#allocation36_spill] sm:$0xff] }
 0x125   :  { %1145 = vrot.lane.b32.xlu2 %v1140_v19, %s3255_s24  ;;  %v503_v61 = vsel %vm502_vm1, %v497_v21, %v2812_v41  ;;  %v504_v19 = vsel %vm502_vm1, %v498_v34, %v2813_v56  ;;  %v2929_v41 = vpack.i.bf16 %v6640_v49, %v3645_v20  ;;  %v1170_v21 = vsel %vm6509_vm12, %v1166_v42, %v4179_v8  ;;  %v6650_v34 = vld [vmem:[#allocation30_spill] sm:$0xff] }
 0x126   :  { %2905 = vrot.lane.b32.xlu1 %v2904_v3, %s6631_s27  ;;  %v616_v27 = vsel %vm6506_vm14, %v503_v61, %v4421_v6  ;;  %v2914_v6 = vpack.i.bf16 %v6633_v9, %v4351_v1  ;;  %v978_v3 = vsel %vm418_vm7, %v3759_v51, %v641_v0  ;;  %v617_v32 = vsel %vm6506_vm14, %v504_v19, %v603_v35  ;;  %vm6643_vm14 = vmmov %vm6641_vm6 }
 0x127   :  { %v4572_v28 = vpop.permute.xlu2 %1088  ;;  %1305 = vmatmul.f32.vlgmr.msra.gmra.mxu0 %v616_v27  ;;  %v1174_v61 = vsel %vm6641_vm6, %v1170_v21, %v4200_v15  ;;  %v2924_v27 = vpack.i.bf16 %v6642_v18, %v3862_v50 }
 0x128   :  { %v699_v38 = vpop.permute.xlu1 %698  ;;  %692 = vrot.lane.b32.xlu0 %v683_v17, %s3250_s15 }
 0x12a   :  { %v670_v59 = vpop.permute.xlu0 %669 }
 0x12b   :  { %v984_v17 = vsel %vm424_vm8, %v978_v3, %v670_v59  ;;  %v6651_v3 = vld [vmem:[#allocation29_spill] sm:$0xff] }
 0x12c   :  { %v990_v0 = vsel %vm6508_vm9, %v984_v17, %v699_v38  ;;  %v6652_v19 = vpack.i.bf16 %v6650_v34, %v6651_v3 }
 0x12d   :  { %2920 = vrot.lane.b32.xlu2 %v2919_v43, %s6635_s30  ;;  %v996_v35 = vsel %vm436_vm10, %v990_v0, %v4453_v25  ;;  %v3220_v25 = vld [vmem:[%s6374_s0 + $0x30] sm:$0xff]  ;;  %v6658_v0 = vld [vmem:[#allocation25_spill] sm:$0xff] }
 0x12e   :  { %2915 = vrot.lane.b32.xlu1 %v2914_v6, %s6636_s25  ;;  %v576_v15 = vsel %vm418_vm7, %v3220_v25, %v4181_v2  ;;  %v6648_v6 = vld [vmem:[#allocation20_spill] sm:$0xff] }
 0x12f   :  { %v4600_v13 = vpop.permute.xlu2 %2830  ;;  %1308 = vmatmul.f32.gmra.mxu0 %v617_v32  ;;  %v579_v50 = vsel %vm424_vm8, %v576_v15, %v4202_v54  ;;  %v6644_v54 = vld [vmem:[#allocation27_spill] sm:$0xff]  ;;  %v6657_v32 = vpack.i.bf16 %v6655_v47, %v6656_v10 }
 0x130   :  { %v780_v40 = vpop.permute.xlu1 %779  ;;  %2910 = vrot.lane.b32.xlu0 %v2909_v16, %s6638_s29  ;;  %v582_v38 = vsel %vm6508_vm9, %v579_v50, %v4216_v52  ;;  %v6646_v36 = vpack.i.bf16 %v6644_v54, %v6645_v22  ;;  %v6667_v22 = vld [vmem:[#allocation45_spill] sm:$0xff]  ;;  %v2832_v34 = vunpack.i.l.bf16 %v4600_v13  ;;  %v6670_v47 = vld [vmem:[#allocation51_spill] sm:$0xff] }
 0x132   :  { %v753_v45 = vpop.permute.xlu0 %752 }
 0x133   :  { %v1002_v58 = vsel %vm442_vm11, %v996_v35, %v753_v45  ;;  %v6661_v45 = vld [vmem:[#allocation35_spill] sm:$0xff] }
 0x134   :  { %v1008_v7 = vsel %vm6509_vm12, %v1002_v58, %v780_v40 }
 0x135   :  { %1184 = vrot.lane.b32.xlu2 %v1174_v61, %s3263_s26  ;;  %v4622_v20 = vsel %vm6643_vm14, %v1008_v7, %v4504_v62  ;;  %v585_v62 = vsel %vm436_vm10, %v582_v38, %v4239_v48  ;;  %vm6654_vm14 = vcmask 1042432   ;;  %v6663_v61 = vld [vmem:[#allocation31_spill] sm:$0xff]  ;;  %v6665_v38 = vld [vmem:[#allocation37_spill] sm:$0xff] }
 0x136   :  { %2930 = vrot.lane.b32.xlu1 %v2929_v41, %s3256_s17  ;;  %v588_v63 = vsel %vm442_vm11, %v585_v62, %v4266_v53  ;;  %v6647_v53 = vld [vmem:[#allocation24_spill] sm:$0xff]  ;;  %v739_v16 = vsel %vm6654_vm14, %v4351_v1, %v6653_v14  ;;  %v2969_v62 = vpack.i.bf16 %v6665_v38, %v3759_v51  ;;  %v6666_v51 = vld [vmem:[#allocation5_spill] sm:$0xff]  ;;  %vm6668_vm14 = vcmask 343040  }
 0x137   :  { %v4629_v8 = vpop.permute.xlu2 %1129  ;;  %v591_v2 = vsel %vm6509_vm12, %v588_v63, %v4319_v24  ;;  %v6649_v59 = vpack.i.bf16 %v6647_v53, %v6648_v6  ;;  %v2954_v42 = vpack.i.bf16 %v6660_v46, %v739_v16 }
 0x138   :  { %v4633_v56 = vpop.permute.xlu1 %2815  ;;  %2925 = vrot.lane.b32.xlu0 %v2924_v27, %s3264_s28  ;;  %v594_v52 = vsel %vm6641_vm6, %v591_v2, %v4373_v4  ;;  %vm6659_vm6 = vcmask 1041408   ;;  %v977_v27 = vsel %vm418_vm7, %v6640_v49, %v4365_v44 }
 0x139   :  { %v766_v40 = vsel %vm6659_vm6, %v4328_v26, %v6658_v0  ;;  %v6662_v26 = vld [vmem:[#allocation33_spill] sm:$0xff]  ;;  %v983_v7 = vsel %vm424_vm8, %v977_v27, %v4407_v23  ;;  %v2817_v63 = vunpack.i.l.bf16 %v4633_v56  ;;  %v6672_v0 = vld [vmem:[#allocation54_spill] sm:$0xff]  ;;  %vm6680_vm6 = vcmask 130048  }
 0x13a   :  { %v4642_v43 = vpop.permute.xlu0 %1066  ;;  %v2959_v58 = vpack.i.bf16 %v6661_v45, %v766_v40  ;;  %v6664_v18 = vpack.i.bf16 %v6662_v26, %v6663_v61  ;;  %v989_v50 = vsel %vm6508_vm9, %v983_v7, %v4264_v55 }
 0x13b   :  { %v995_v44 = vsel %vm436_vm10, %v989_v50, %v4424_v30 }
 0x13c   :  { %v1001_v23 = vsel %vm442_vm11, %v995_v44, %v4479_v60  ;;  %v6676_v44 = vld [vmem:[#allocation43_spill] sm:$0xff] }
 0x13d   :  { %2940 = vrot.lane.b32.xlu2 %v6646_v36, %s6629_s22  ;;  %v1007_v54 = vsel %vm6509_vm12, %v1001_v23, %v6666_v51  ;;  %v463_v36 = vsel %vm460_vm15, %v6667_v22, %v2817_v63  ;;  %v6677_v23 = vld [vmem:[#allocation42_spill] sm:$0xff]  ;;  %v1153_v22 = vsel %vm418_vm7, %v6665_v38, %v4642_v43 }
 0x13e   :  { %608 = vrot.lane.b32.xlu1 %v594_v52, %s3263_s26  ;;  %v4736_v60 = vsel %vm6668_vm14, %v1007_v54, %v4510_v31  ;;  %v6678_v63 = vpack.i.bf16 %v6676_v44, %v6677_v23  ;;  %vm6681_vm14 = vcmask 785408  }
 0x13f   :  { %v4653_v9 = vpop.permute.xlu2 %2845 }
 0x140   :  { %v4655_v48 = vpop.permute.xlu1 %2820  ;;  %2935 = vrot.lane.b32.xlu0 %v6649_v59, %s3257_s18  ;;  %v2847_v27 = vunpack.i.l.bf16 %v4653_v9  ;;  %v2848_v44 = vunpack.i.h.bf16 %v4653_v9 }
 0x141   :  { %v2822_v2 = vunpack.i.l.bf16 %v4655_v48 }
 0x142   :  { %v4661_v24 = vpop.permute.xlu0 %1077 }
 0x143   :  { %v469_v53 = vsel %vm466_vm4, %v463_v36, %v2822_v2 }
 0x145   :  { %2950 = vrot.lane.b32.xlu2 %v6652_v19, %s6638_s29 }
 0x146   :  { %721 = vrot.lane.b32.xlu1 %v6651_v3, %s3253_s20 }
 0x147   :  { %v4669_v4 = vpop.permute.xlu2 %2860 }
 0x148   :  { %v4674_v17 = vpop.permute.xlu1 %1101  ;;  %2945 = vrot.lane.b32.xlu0 %v6657_v32, %s6631_s27  ;;  %v2862_v7 = vunpack.i.l.bf16 %v4669_v4 }
 0x14a   :  { %v4684_v41 = vpop.permute.xlu0 %2825 }
 0x14b   :  { %v2827_v55 = vunpack.i.l.bf16 %v4684_v41 }
 0x14d   :  { %775 = vrot.lane.b32.xlu2 %v766_v40, %s3252_s19  ;;  %v475_v6 = vsel %vm472_vm2, %v469_v53, %v2827_v55  ;;  %v6673_v40 = vld [vmem:[#allocation52_spill] sm:$0xff]  ;;  %v2828_v55 = vunpack.i.h.bf16 %v4684_v41  ;;  %v1156_v41 = vsel %vm424_vm8, %v1153_v22, %v4661_v24  ;;  %v6695_v22 = vld [vmem:[#allocation61_spill] sm:$0xff] }
 0x14e   :  { %2955 = vrot.lane.b32.xlu1 %v2954_v42, %s6636_s25  ;;  %v481_v14 = vsel %vm478_vm5, %v475_v6, %v2832_v34  ;;  %v6674_v46 = vpack.i.bf16 %v6672_v0, %v6673_v40  ;;  %v6679_v6 = vld [vmem:[#allocation68_spill] sm:$0xff] }
 0x14f   :  { %v4688_v1 = vpop.permute.xlu2 %2870  ;;  %v6686_v0 = vld [vmem:[#allocation64_spill] sm:$0xff] }
 0x150   :  { %v4690_v21 = vpop.permute.xlu1 %2835  ;;  %748 = vrot.lane.b32.xlu0 %v739_v16, %s3249_s14  ;;  %v6669_v16 = vld [vmem:[#allocation53_spill] sm:$0xff]  ;;  %v2872_v51 = vunpack.i.l.bf16 %v4688_v1 }
 0x151   :  { %v2837_v59 = vunpack.i.l.bf16 %v4690_v21  ;;  %v6671_v10 = vpack.i.bf16 %v6669_v16, %v6670_v47  ;;  %v6683_v16 = vld [vmem:[#allocation63_spill] sm:$0xff]  ;;  %v2838_v24 = vunpack.i.h.bf16 %v4690_v21 }
 0x152   :  { %v4693_v35 = vpop.permute.xlu0 %1115 }
 0x153   :  { %v487_v32 = vsel %vm484_vm0, %v481_v14, %v2837_v59  ;;  %v6682_v14 = vld [vmem:[#allocation66_spill] sm:$0xff] }
 0x154   :  { %v6684_v47 = vpack.i.bf16 %v6682_v14, %v6683_v16 }
 0x155   :  { %2965 = vrot.lane.b32.xlu2 %v6664_v18, %s3264_s28  ;;  %v2818_v18 = vunpack.i.h.bf16 %v4633_v56 }
 0x156   :  { %802 = vrot.lane.b32.xlu1 %v6663_v61, %s3255_s24 }
 0x157   :  { %v4707_v25 = vpop.permute.xlu2 %2880  ;;  %v464_v59 = vsel %vm460_vm15, %v6679_v6, %v2818_v18 }
 0x158   :  { %v4709_v15 = vpop.permute.xlu1 %1143  ;;  %2960 = vrot.lane.b32.xlu0 %v2959_v58, %s6635_s30  ;;  %v6675_v58 = vld [vmem:[#allocation23_spill] sm:$0xff] }
 0x15a   :  { %v4718_v49 = vpop.permute.xlu0 %2840 }
 0x15b   :  { %v2842_v3 = vunpack.i.l.bf16 %v4718_v49 }
 0x15d   :  { %1188 = vrot.lane.b32.xlu2 %v4622_v20, %s3263_s26  ;;  %v493_v42 = vsel %vm6507_vm3, %v487_v32, %v2842_v3  ;;  %v6685_v32 = vld [vmem:[#allocation67_spill] sm:$0xff] }
 0x15e   :  { %2970 = vrot.lane.b32.xlu1 %v2969_v62, %s3256_s17  ;;  %v2823_v62 = vunpack.i.h.bf16 %v4655_v48  ;;  %v499_v54 = vsel %vm496_vm13, %v493_v42, %v2847_v27  ;;  %v6687_v40 = vpack.i.bf16 %v6685_v32, %v6686_v0  ;;  %v2843_v42 = vunpack.i.h.bf16 %v4718_v49  ;;  %v6689_v27 = vld [vmem:[#allocation55_spill] sm:$0xff]  ;;  %v6702_v32 = vld [vmem:[#allocation38_spill] sm:$0xff] }
 0x15f   :  { %v4730_v30 = vpop.permute.xlu2 %1090 }
 0x160   :  { %v4738_v52 = vpop.permute.xlu1 %2855  ;;  %1186 = vrot.lane.b32.xlu0 %v4736_v60, %s3263_s26 }
 0x161   :  { %v2857_v45 = vunpack.i.l.bf16 %v4738_v52 }
 0x162   :  { %v4747_v19 = vpop.permute.xlu0 %2850 }
 0x163   :  { %v2852_v31 = vunpack.i.l.bf16 %v4747_v19  ;;  %v505_v53 = vsel %vm502_vm1, %v499_v54, %v2857_v45 }
 0x165   :  { %2985 = vrot.lane.b32.xlu2 %v6671_v10, %s6631_s27  ;;  %v974_v26 = vsel %vm418_vm7, %v6675_v58, %v2852_v31  ;;  %v470_v31 = vsel %vm466_vm4, %v464_v59, %v2823_v62  ;;  %v6698_v59 = vrot.slane %v4339_v29, 1 }
 0x166   :  { %2980 = vrot.lane.b32.xlu1 %v6674_v46, %s6629_s22  ;;  %v980_v56 = vsel %vm424_vm8, %v974_v26, %v2862_v7  ;;  %v476_v10 = vsel %vm472_vm2, %v470_v31, %v2828_v55  ;;  %v2833_v46 = vunpack.i.h.bf16 %v4600_v13  ;;  %v6688_v13 = vld [vmem:[#allocation60_spill] sm:$0xff]  ;;  %v6700_v31 = vrot.slane %v4339_v29, 4 }
 0x167   :  { %v635_v61 = vpop.permute.xlu2 %634  ;;  %v6690_v7 = vpack.i.bf16 %v6688_v13, %v6689_v27 }
 0x168   :  { %v4767_v50 = vpop.permute.xlu1 %2865  ;;  %2975 = vrot.lane.b32.xlu0 %v6678_v63, %s3257_s18  ;;  %v975_v43 = vsel %vm418_vm7, %v4237_v33, %v635_v61  ;;  %v1159_v33 = vsel %vm6508_vm9, %v1156_v41, %v4572_v28  ;;  %v482_v21 = vsel %vm478_vm5, %v476_v10, %v2833_v46  ;;  %v2882_v63 = vunpack.i.l.bf16 %v4707_v25 }
 0x169   :  { %v2867_v2 = vunpack.i.l.bf16 %v4767_v50  ;;  %v1163_v58 = vsel %vm436_vm10, %v1159_v33, %v4674_v17  ;;  %v488_v28 = vsel %vm484_vm0, %v482_v21, %v2838_v24  ;;  %v2858_v17 = vunpack.i.h.bf16 %v4738_v52 }
 0x16a   :  { %v605_v36 = vpop.permute.xlu0 %604  ;;  %v1167_v18 = vsel %vm442_vm11, %v1163_v58, %v4693_v35  ;;  %v494_v49 = vsel %vm6507_vm3, %v488_v28, %v2843_v42  ;;  %vm6693_vm3 = vcmask 785408   ;;  %v2863_v21 = vunpack.i.h.bf16 %v4669_v4  ;;  %v6705_v28 = vld [vmem:[#allocation46_spill] sm:$0xff] }
 0x16b   :  { %v986_v48 = vsel %vm6508_vm9, %v980_v56, %v2867_v2  ;;  %2710 = vmatmul.msk.f32.gmra.mxu1 %vm6680_vm6, %v605_v36  ;;  %v618_v34 = vsel %vm6681_vm14, %v505_v53, %v605_v36  ;;  %v1171_v35 = vsel %vm6509_vm12, %v1167_v18, %v4629_v8  ;;  %vm6691_vm6 = vcmask 343040   ;;  %v6704_v18 = vld [vmem:[#allocation48_spill] sm:$0xff] }
 0x16c   :  { %v992_v3 = vsel %vm436_vm10, %v986_v48, %v2872_v51  ;;  %1311 = vmatmul.f32.gmra.mxu0 %v618_v34  ;;  %v1175_v2 = vsel %vm6691_vm6, %v1171_v35, %v4709_v15  ;;  %v500_v52 = vsel %vm496_vm13, %v494_v49, %v2848_v44  ;;  %vm6692_vm14 = vcmask 130048   ;;  %v6694_v15 = vld [vmem:[#allocation69_spill] sm:$0xff] }
 0x16d   :  { %3000 = vrot.lane.b32.xlu2 %v6684_v47, %s6635_s30  ;;  %v506_v56 = vsel %vm502_vm1, %v500_v52, %v2858_v17  ;;  %v6696_v48 = vpack.i.bf16 %v6694_v15, %v6695_v22  ;;  %v6697_v53 = vrot.slane %v4339_v29, 2  ;;  %v6699_v34 = vrot.slane %v4339_v29, 5  ;;  %v6706_v17 = vld [vmem:[#allocation32_spill] sm:$0xff] }
 0x16e   :  { %2995 = vrot.lane.b32.xlu1 %v6687_v40, %s6636_s25  ;;  %v2853_v40 = vunpack.i.h.bf16 %v4747_v19  ;;  %v2873_v49 = vunpack.i.h.bf16 %v4688_v1  ;;  %v6707_v4 = vrot.slane %v4339_v29, 3 }
 0x16f   :  { %v664_v45 = vpop.permute.xlu2 %663 }
 0x170   :  { %v1069_v26 = vpop.permute.xlu1 %1068  ;;  %v4811_v61 = vsel %vm424_vm8, %v975_v43, %v664_v45  ;;  %2990 = vrot.lane.b32.xlu0 %v6690_v7, %s6638_s29  ;;  %v6701_v43 = vld [vmem:[#allocation39_spill] sm:$0xff] }
 0x171   :  { %v1154_v14 = vsel %vm418_vm7, %v6701_v43, %v1069_v26  ;;  %v2868_v26 = vunpack.i.h.bf16 %v4767_v50 }
 0x172   :  { %v4823_v62 = vpop.permute.xlu0 %2875 }
 0x173   :  { %v2877_v23 = vunpack.i.l.bf16 %v4823_v62 }
 0x175   :  { %v998_v55 = vsel %vm442_vm11, %v992_v3, %v2877_v23  ;;  %v2878_v23 = vunpack.i.h.bf16 %v4823_v62 }
 0x176   :  { %1190 = vrot.lane.b32.xlu1 %v1175_v2, %s3263_s26  ;;  %v4836_v51 = vsel %vm6509_vm12, %v998_v55, %v2882_v63  ;;  %v2883_v63 = vunpack.i.h.bf16 %v4707_v25  ;;  %v6708_v55 = vld [vmem:[#allocation44_spill] sm:$0xff] }
 0x177   :  { %v607_v9 = vpop.permute.xlu2 %606 }
 0x178   :  { %v4839_v54 = vpop.permute.xlu1 %2885  ;;  %2711 = vmatmul.msk.f32.gmra.mxu1 %vm6692_vm14, %v607_v9  ;;  %v619_v8 = vsel %vm6693_vm3, %v506_v56, %v607_v9  ;;  %3005 = vrot.lane.b32.xlu0 %v6696_v48, %s3264_s28  ;;  %vm6703_vm3 = vmmov %vm6691_vm6 }
 0x179   :  { %1314 = vmatmul.f32.gmra.mxu0 %v619_v8  ;;  %v2888_v52 = vunpack.i.h.bf16 %v4839_v54  ;;  %v2887_v9 = vunpack.i.l.bf16 %v4839_v54  ;;  %v6709_v8 = vld [vmem:[#allocation56_spill] sm:$0xff]  ;;  %vm6710_vm6 = vmmov %vm6703_vm3 }
 0x17a   :  { %v1080_v36 = vpop.permute.xlu0 %1079  ;;  %vm6713_vm14 = vmmov %vm6703_vm3 }
 0x17b   :  { %v1157_v16 = vsel %vm424_vm8, %v1154_v14, %v1080_v36  ;;  %v6711_v36 = vld [vmem:[#allocation41_spill] sm:$0xff] }
 0x17c   :  { %v1160_v24 = vsel %vm6508_vm9, %v1157_v16, %v4730_v30  ;;  %v3221_v30 = vld [vmem:[%s6374_s0 + $0x20] sm:$0xff]  ;;  %s3267_s0 = smov [#allocation2]  }
 0x17d   :  { %v423_v19 = vsel %vm418_vm7, %v3221_v30, %v2853_v40 }
 0x17e   :  { %1081 = vrot.lane.b32.xlu1 %v6697_v53, %s3254_s23 }
 0x17f   :  { %v1146_v10 = vpop.permute.xlu2 %1145 }
 0x180   :  { %v1104_v6 = vpop.permute.xlu1 %1103  ;;  %1070 = vrot.lane.b32.xlu0 %v6698_v59, %s3251_s16  ;;  %v6712_v59 = vld [vmem:[#allocation59_spill] sm:$0xff] }
 0x181   :  { %v1164_v0 = vsel %vm436_vm10, %v1160_v24, %v1104_v6 }
 0x182   :  { %v4853_v41 = vpop.permute.xlu0 %2890 }
 0x183   :  { %v2892_v62 = vunpack.i.l.bf16 %v4853_v41  ;;  %v2893_v48 = vunpack.i.h.bf16 %v4853_v41  ;;  %v6714_v41 = vld [vmem:[#allocation34_spill] sm:$0xff] }
 0x185   :  { %v1353_v30 = vpop.f32.mrf.mxu1 }
 0x186   :  { %1119 = vrot.lane.b32.xlu1 %v6699_v34, %s3249_s14  ;;  %v1010_v34 = vsel %vm6713_vm14, %v4836_v51, %v2887_v9 }
 0x187   :  { %v4888_v13 = vpop.permute.xlu2 %2920  ;;  %v1016_v14 = vsel %vm460_vm15, %v1010_v34, %v2892_v62 }
 0x188   :  { %v1118_v3 = vpop.permute.xlu1 %1117  ;;  %1105 = vrot.lane.b32.xlu0 %v6700_v31, %s3253_s20 }
 0x189   :  { %v1168_v46 = vsel %vm442_vm11, %v1164_v0, %v1118_v3 }
 0x18a   :  { %v4864_v47 = vpop.permute.xlu0 %2895 }
 0x18b   :  { %v2897_v25 = vunpack.i.l.bf16 %v4864_v47  ;;  %v2898_v3 = vunpack.i.h.bf16 %v4864_v47 }
 0x18e   :  { %642 = vrot.lane.b32.xlu1 %v6702_v32, %s3251_s16  ;;  %v1022_v32 = vsel %vm466_vm4, %v1016_v14, %v2897_v25 }
 0x18f   :  { %v4920_v53 = vpop.permute.xlu2 %1184 }
 0x190   :  { %v1132_v33 = vpop.permute.xlu1 %1131  ;;  %1147 = vrot.lane.b32.xlu0 %v1139_v5, %s3255_s24  ;;  %v429_v5 = vsel %vm424_vm8, %v423_v19, %v2863_v21 }
 0x191   :  { %v1172_v42 = vsel %vm6509_vm12, %v1168_v46, %v1132_v33  ;;  %v435_v27 = vsel %vm6508_vm9, %v429_v5, %v2868_v26 }
 0x192   :  { %v1176_v45 = vsel %vm6703_vm3, %v1172_v42, %v1146_v10  ;;  %v2901_v58 = vpop.permute.xlu0 %2900  ;;  %v441_v50 = vsel %vm436_vm10, %v435_v27, %v6706_v17  ;;  %v2922_v27 = vunpack.i.l.bf16 %v4888_v13  ;;  %v4953_v17 = vld [vmem:[%s6376_s2] ss:$0 sm:$0xff] }
 0x193   :  { %1192 = vrot.lane.b32.xlu2 %v1176_v45, %s3263_s26  ;;  %v447_v1 = vsel %vm442_vm11, %v441_v50, %v6708_v55  ;;  %v2902_v6 = vunpack.i.l.bf16 %v2901_v58  ;;  %v2903_v16 = vunpack.i.h.bf16 %v2901_v58  ;;  %v2923_v50 = vunpack.i.h.bf16 %v4888_v13 }
 0x194   :  { %v453_v54 = vsel %vm6509_vm12, %v447_v1, %v6711_v36  ;;  %v1215_v13 = vrot.slane %v4920_v53, 7 }
 0x195   :  { %v459_v24 = vsel %vm6703_vm3, %v453_v54, %v6714_v41  ;;  %v1028_v47 = vsel %vm472_vm2, %v1022_v32, %v2902_v6  ;;  %vm6720_vm3 = vcmask 785408   ;;  %v6721_v54 = vld [vmem:[#allocation57_spill] sm:$0xff] }
 0x196   :  { %727 = vrot.lane.b32.xlu1 %v6704_v18, %s3253_s20  ;;  %v465_v51 = vsel %vm460_vm15, %v459_v24, %v2893_v48  ;;  %s2691_s20 = sshll.u32 %s6387_s13, 4  ;;  %s2692_s20 = int_to_ptr.hbm [resolvable:$true] %s2691_s20 }
 0x197   :  { %v471_v42 = vsel %vm466_vm4, %v465_v51, %v2898_v3 }
 0x198   :  { %v2906_v7 = vpop.permute.xlu1 %2905  ;;  %700 = vrot.lane.b32.xlu0 %v6705_v28, %s3250_s15  ;;  %v477_v19 = vsel %vm472_vm2, %v471_v42, %v2903_v16  ;;  %v6716_v28 = vld [vmem:[#allocation40_spill] sm:$0xff] }
 0x199   :  { %v2907_v31 = vunpack.i.l.bf16 %v2906_v7  ;;  %v2908_v0 = vunpack.i.h.bf16 %v2906_v7 }
 0x19a   :  { %v693_v44 = vpop.permute.xlu0 %692 }
 0x19b   :  { %1092 = vrot.lane.b32.xlu2 %v6707_v4, %s3250_s15  ;;  %v987_v35 = vsel %vm6508_vm9, %v4811_v61, %v693_v44  ;;  %v1034_v45 = vsel %vm478_vm5, %v1028_v47, %v2907_v31  ;;  %v483_v21 = vsel %vm478_vm5, %v477_v19, %v2908_v0  ;;  %v4956_v44 = vpop.permute.xlu2 %2940  ;;  %vm6724_vm9 = vcmask 130048   ;;  %v6726_v31 = vld [vmem:[#allocation62_spill] sm:$0xff] }
 0x19c   :  { %v993_v2 = vsel %vm436_vm10, %v987_v35, %v2873_v49 }
 0x19d   :  { %v999_v56 = vsel %vm442_vm11, %v993_v2, %v2878_v23  ;;  %v6718_v23 = vld [vmem:[#allocation47_spill] sm:$0xff] }
 0x19e   :  { %808 = vrot.lane.b32.xlu1 %v6709_v8, %s3255_s24  ;;  %v1005_v61 = vsel %vm6509_vm12, %v999_v56, %v2883_v63  ;;  %v1356_v8 = vpop.f32.mrf.mxu1 }
 0x19f   :  { %v4915_v22 = vsel %vm6710_vm6, %v1005_v61, %v2888_v52  ;;  %vm6717_vm6 = vcmask 637952  }
 0x1a0   :  { %v2916_v15 = vpop.permute.xlu1 %2915  ;;  %781 = vrot.lane.b32.xlu0 %v6712_v59, %s3252_s19  ;;  %vm6719_vm14 = vmmov %vm6717_vm6 }
 0x1a1   :  { %v2917_v58 = vunpack.i.l.bf16 %v2916_v15  ;;  %v2918_v18 = vunpack.i.h.bf16 %v2916_v15 }
 0x1a2   :  { %v2911_v10 = vpop.permute.xlu0 %2910 }
 0x1a3   :  { %1133 = vrot.lane.b32.xlu2 %v1125_v39, %s3252_s19  ;;  %v2912_v40 = vunpack.i.l.bf16 %v2911_v10  ;;  %v2913_v46 = vunpack.i.h.bf16 %v2911_v10  ;;  %v6715_v39 = vld [vmem:[#allocation50_spill] sm:$0xff]  ;;  %v2951_v16 = vpop.permute.xlu2 %2950  ;;  %s3266_s19 = smov 32  }
 0x1a4   :  { %v1306_v33 = vpop.f32.mrf.mxu0 }
 0x1a5   :  { %v1040_v26 = vsel %vm484_vm0, %v1034_v45, %v2912_v40  ;;  %v489_v7 = vsel %vm484_vm0, %v483_v21, %v2913_v46  ;;  %v1307_v52 = vadd.f32 %v4953_v17, %v1306_v33 }
 0x1a6   :  { %866 = vrot.lane.b32.xlu1 %v6715_v39, %s6629_s22  ;;  %v1046_v49 = vsel %vm6717_vm6, %v1040_v26, %v2917_v58  ;;  %v495_v2 = vsel %vm6719_vm14, %v489_v7, %v2918_v18  ;;  %vm6722_vm6 = vmmov %vm6720_vm3  ;;  %vm6723_vm14 = vcmask 1044480   ;;  %v2942_v26 = vunpack.i.l.bf16 %v4956_v44 }
 0x1a7   :  { %v1052_v55 = vsel %vm496_vm13, %v1046_v49, %v2922_v27  ;;  %v501_v62 = vsel %vm496_vm13, %v495_v2, %v2923_v50  ;;  %v1354_v59 = vadd.f32 %v1353_v30, %v1307_v52  ;;  %v2943_v7 = vunpack.i.h.bf16 %v4956_v44 }
 0x1a8   :  { %v4943_v5 = vpop.permute.xlu1 %2930  ;;  %846 = vrot.lane.b32.xlu0 %v6716_v28, %s3257_s18 }
 0x1a9   :  { %v4989_v10 = vmax.f32 %v1354_v59, 0.0  ;;  %v2933_v28 = vunpack.i.h.bf16 %v4943_v5 }
 0x1aa   :  { %v2926_v4 = vpop.permute.xlu0 %2925 }
 0x1ab   :  { %671 = vrot.lane.b32.xlu2 %v6718_v23, %s3254_s23  ;;  %v2928_v35 = vunpack.i.h.bf16 %v2926_v4  ;;  %v2927_v63 = vunpack.i.l.bf16 %v2926_v4  ;;  %v1410_v0 = vrot.slane %v4989_v10, 2  ;;  %v1467_v40 = vrot.slane %v4989_v10, 6  ;;  %v776_v33 = vpop.permute.xlu2 %775 }
 0x1ac   :  { %v1309_v1 = vpop.f32.mrf.mxu0  ;;  %v2953_v4 = vunpack.i.h.bf16 %v2951_v16  ;;  %v2952_v23 = vunpack.i.l.bf16 %v2951_v16 }
 0x1ad   :  { %v1058_v9 = vsel %vm502_vm1, %v1052_v55, %v2927_v63  ;;  %v1310_v56 = vadd.f32 %v4953_v17, %v1309_v1  ;;  %v507_v48 = vsel %vm502_vm1, %v501_v62, %v2928_v35 }
 0x1ae   :  { %926 = vrot.lane.b32.xlu1 %v4139_v11, %s6636_s25  ;;  %v4971_v61 = vsel %vm6720_vm3, %v1058_v9, %v4920_v53  ;;  %vm6725_vm3 = vmmov %vm6723_vm14 }
 0x1af   :  { %v1357_v25 = vadd.f32 %v1356_v8, %v1310_v56  ;;  %v1214_v36 = vrot.slane %v4971_v61, 7 }
 0x1b0   :  { %v609_v15 = vpop.permute.xlu1 %608  ;;  %906 = vrot.lane.b32.xlu0 %v6721_v54, %s6638_s29 }
 0x1b1   :  { %v620_v11 = vsel %vm6722_vm6, %v507_v48, %v609_v15  ;;  %v1244_v6 = vsel %vm6723_vm14, %v609_v15, %v1215_v13  ;;  %v4987_v14 = vmax.f32 %v1357_v25, 0.0  ;;  %vm6728_vm6 = vcmask 1041408  }
 0x1b2   :  { %2712 = vmatmul.msk.f32.gmra.mxu1 %vm6724_vm9, %v1244_v6  ;;  %v1243_v34 = vsel %vm6725_vm3, %v620_v11, %v1214_v36  ;;  %v2936_v3 = vpop.permute.xlu0 %2935  ;;  %vm6727_vm9 = vcmask 1045504   ;;  %vm6730_vm14 = vcmask 343040   ;;  %v1396_v25 = vrot.slane %v4989_v10, 1 }
 0x1b3   :  { %754 = vrot.lane.b32.xlu2 %v6726_v31, %s3249_s14  ;;  %1317 = vmatmul.f32.gmra.mxu0 %v1243_v34  ;;  %v1411_v24 = vrot.slane %v4987_v14, 2  ;;  %v1468_v32 = vrot.slane %v4987_v14, 6  ;;  %s3265_s14 = smov 64   ;;  %v2937_v58 = vunpack.i.l.bf16 %v2936_v3  ;;  %v2938_v35 = vunpack.i.h.bf16 %v2936_v3 }
 0x1b4   :  { %v1397_v55 = vrot.slane %v4987_v14, 1  ;;  %v1452_v1 = vrot.slane %v4987_v14, 5  ;;  %v1451_v15 = vrot.slane %v4989_v10, 5  ;;  %vm6731_vm3 = vcmask 1046528  }
 0x1b5   :  { %v1412_v47 = vsel %vm6727_vm9, %v1410_v0, %v1411_v24  ;;  %v1469_v46 = vsel %vm6728_vm6, %v1467_v40, %v1468_v32  ;;  %vm6732_vm9 = vcmask 1042432   ;;  %vm6733_vm6 = vcmask 637952  }
 0x1b6   :  { %v3014_v42 = vpack.i.bf16 %v1469_v46, %v1412_v47  ;;  %v1398_v59 = vsel %vm6731_vm3, %v1396_v25, %v1397_v55  ;;  %vm6735_vm3 = vcmask 785408  }
 0x1b8   :  { %v722_v41 = vpop.permute.xlu1 %721  ;;  %966 = vrot.lane.b32.xlu0 %v4177_v12, %s3264_s28  ;;  %v2932_v12 = vunpack.i.l.bf16 %v4943_v5 }
 0x1b9   :  { %v994_v30 = vsel %vm436_vm10, %v4586_v57, %v722_v41  ;;  %v2966_v57 = vpop.permute.xlu2 %2965 }
 0x1ba   :  { %v2946_v51 = vpop.permute.xlu0 %2945  ;;  %v1017_v21 = vsel %vm460_vm15, %v4915_v22, %v2932_v12  ;;  %v2967_v34 = vunpack.i.l.bf16 %v2966_v57  ;;  %v2968_v40 = vunpack.i.h.bf16 %v2966_v57 }
 0x1bb   :  { %826 = vrot.lane.b32.xlu2 %v6701_v43, %s3256_s17  ;;  %v6729_v43 = vld [vmem:[#allocation49_spill] sm:$0xff]  ;;  %v1023_v18 = vsel %vm466_vm4, %v1017_v21, %v2937_v58  ;;  %v2947_v27 = vunpack.i.l.bf16 %v2946_v51  ;;  %v2948_v44 = vunpack.i.h.bf16 %v2946_v51 }
 0x1bc   :  { %v1029_v2 = vsel %vm472_vm2, %v1023_v18, %v2942_v26 }
 0x1bd   :  { %v1035_v5 = vsel %vm478_vm5, %v1029_v2, %v2947_v27 }
 0x1be   :  { %v1041_v11 = vsel %vm484_vm0, %v1035_v5, %v2952_v23 }
 0x1c0   :  { %v2956_v45 = vpop.permute.xlu1 %2955  ;;  %3015 = vrot.lane.b32.xlu0 %v3014_v42, %s3265_s14 }
 0x1c1   :  { %v2957_v52 = vunpack.i.l.bf16 %v2956_v45  ;;  %v2958_v48 = vunpack.i.h.bf16 %v2956_v45  ;;  %v1189_v46 = vpop.permute.xlu2 %1188 }
 0x1c2   :  { %v749_v39 = vpop.permute.xlu0 %748 }
 0x1c3   :  { %886 = vrot.lane.b32.xlu2 %v6729_v43, %s6631_s27  ;;  %v1000_v19 = vsel %vm442_vm11, %v994_v30, %v749_v39  ;;  %v1047_v3 = vsel %vm6733_vm6, %v1041_v11, %v2957_v52 }
 0x1c4   :  { %v1006_v50 = vsel %vm6509_vm12, %v1000_v19, %v776_v33  ;;  %vm6739_vm12 = vmmov %vm6735_vm3 }
 0x1c8   :  { %v803_v49 = vpop.permute.xlu1 %802 }
 0x1c9   :  { %v1012_v63 = vsel %vm6730_vm14, %v1006_v50, %v803_v49  ;;  %vm6734_vm14 = vmmov %vm6733_vm6  ;;  %vm6737_vm6 = vcmask 130048   ;;  %v2986_v27 = vpop.permute.xlu2 %2985 }
 0x1ca   :  { %v1018_v22 = vsel %vm460_vm15, %v1012_v63, %v2933_v28  ;;  %v2961_v56 = vpop.permute.xlu0 %2960  ;;  %v1222_v28 = vrot.slane %v1189_v46, 7 }
 0x1cb   :  { %v1024_v9 = vsel %vm466_vm4, %v1018_v22, %v2938_v35  ;;  %946 = vrot.lane.b32.xlu2 %v4136_v37, %s6635_s30  ;;  %v2962_v62 = vunpack.i.l.bf16 %v2961_v56  ;;  %v1453_v37 = vsel %vm6732_vm9, %v1451_v15, %v1452_v1  ;;  %v2963_v16 = vunpack.i.h.bf16 %v2961_v56 }
 0x1cc   :  { %v1030_v8 = vsel %vm472_vm2, %v1024_v9, %v2943_v7  ;;  %v3009_v51 = vpack.i.bf16 %v1453_v37, %v1398_v59  ;;  %vm6736_vm9 = vcmask 1040384   ;;  %v2987_v22 = vunpack.i.l.bf16 %v2986_v27 }
 0x1cd   :  { %v1036_v54 = vsel %vm478_vm5, %v1030_v8, %v2948_v44  ;;  %v1053_v0 = vsel %vm496_vm13, %v1047_v3, %v2962_v62 }
 0x1ce   :  { %v1042_v6 = vsel %vm484_vm0, %v1036_v54, %v2953_v4  ;;  %v1059_v42 = vsel %vm502_vm1, %v1053_v0, %v2967_v34 }
 0x1cf   :  { %v1048_v31 = vsel %vm6734_vm14, %v1042_v6, %v2958_v48  ;;  %vm6738_vm14 = vmmov %vm6736_vm9 }
 0x1d0   :  { %v2971_v41 = vpop.permute.xlu1 %2970  ;;  %v1054_v47 = vsel %vm496_vm13, %v1048_v31, %v2963_v16 }
 0x1d1   :  { %v1060_v39 = vsel %vm502_vm1, %v1054_v47, %v2968_v40  ;;  %v2972_v21 = vunpack.i.l.bf16 %v2971_v41  ;;  %v2973_v49 = vunpack.i.h.bf16 %v2971_v41  ;;  %v3001_v8 = vpop.permute.xlu2 %3000 }
 0x1d2   :  { %v1187_v33 = vpop.permute.xlu0 %1186  ;;  %v5056_v26 = vsel %vm6739_vm12, %v1060_v39, %v1189_v46  ;;  %v3002_v6 = vunpack.i.l.bf16 %v3001_v8  ;;  %vm6743_vm12 = vcmask 637952   ;;  %v3003_v3 = vunpack.i.h.bf16 %v3001_v8 }
 0x1d3   :  { %3010 = vrot.lane.b32.xlu2 %v3009_v51, %s3266_s19  ;;  %v1203_v45 = vsel %vm6735_vm3, %v1059_v42, %v1187_v33  ;;  %v1218_v12 = vrot.slane %v1187_v33, 7  ;;  %v1220_v7 = vrot.slane %v5056_v26, 7  ;;  %vm6740_vm3 = vmmov %vm6736_vm9  ;;  %v1019_v61 = vsel %vm460_vm15, %v4736_v60, %v2972_v21 }
 0x1d4   :  { %v1216_v58 = vrot.slane %v1203_v45, 7  ;;  %v1020_v35 = vsel %vm460_vm15, %v4622_v20, %v2973_v49  ;;  %v2988_v60 = vunpack.i.h.bf16 %v2986_v27  ;;  %v1484_v8 = vrot.slane %v4987_v14, 7 }
 0x1d5   :  { %v1219_v43 = vsel %vm6736_vm9, %v1215_v13, %v1218_v12  ;;  %v1223_v50 = vsel %vm6740_vm3, %v1218_v12, %v1222_v28  ;;  %vm6741_vm9 = vmmov %vm6737_vm6 }
 0x1d6   :  { %2713 = vmatmul.msk.f32.gmra.mxu1 %vm6737_vm6, %v1219_v43  ;;  %v1217_v30 = vsel %vm6738_vm14, %v1214_v36, %v1216_v58  ;;  %vm6742_vm6 = vmmov %vm6740_vm3 }
 0x1d7   :  { %1320 = vmatmul.f32.gmra.mxu0 %v1217_v30  ;;  %v1221_v4 = vsel %vm6742_vm6, %v1216_v58, %v1220_v7  ;;  %vm6744_vm14 = vmmov %vm6740_vm3  ;;  %vm6747_vm6 = vcmask 785408  }
 0x1d8   :  { %v2981_v19 = vpop.permute.xlu1 %2980  ;;  %vm6745_vm3 = vmmov %vm6741_vm9 }
 0x1d9   :  { %v2982_v36 = vunpack.i.l.bf16 %v2981_v19  ;;  %v2983_v63 = vunpack.i.h.bf16 %v2981_v19 }
 0x1da   :  { %v2976_v18 = vpop.permute.xlu0 %2975 }
 0x1db   :  { %v2977_v53 = vunpack.i.l.bf16 %v2976_v18  ;;  %v2978_v13 = vunpack.i.h.bf16 %v2976_v18 }
 0x1dd   :  { %v1025_v23 = vsel %vm466_vm4, %v1019_v61, %v2977_v53  ;;  %v1026_v2 = vsel %vm466_vm4, %v1020_v35, %v2978_v13 }
 0x1de   :  { %2714 = vmatmul.msk.f32.gmra.mxu1 %vm6741_vm9, %v1223_v50  ;;  %v1031_v44 = vsel %vm472_vm2, %v1025_v23, %v2982_v36  ;;  %v1032_v9 = vsel %vm472_vm2, %v1026_v2, %v2983_v63  ;;  %vm6746_vm9 = vmmov %vm6743_vm12 }
 0x1df   :  { %1323 = vmatmul.f32.gmra.mxu0 %v1221_v4  ;;  %v1037_v62 = vsel %vm478_vm5, %v1031_v44, %v2987_v22  ;;  %v1038_v20 = vsel %vm478_vm5, %v1032_v9, %v2988_v60 }
 0x1e0   :  { %v2996_v57 = vpop.permute.xlu1 %2995 }
 0x1e1   :  { %v2997_v25 = vunpack.i.l.bf16 %v2996_v57  ;;  %v2998_v48 = vunpack.i.h.bf16 %v2996_v57 }
 0x1e2   :  { %v2991_v5 = vpop.permute.xlu0 %2990 }
 0x1e3   :  { %v2992_v52 = vunpack.i.l.bf16 %v2991_v5  ;;  %v2993_v56 = vunpack.i.h.bf16 %v2991_v5 }
 0x1e5   :  { %v1043_v15 = vsel %vm484_vm0, %v1037_v62, %v2992_v52  ;;  %v1044_v11 = vsel %vm484_vm0, %v1038_v20, %v2993_v56  ;;  %v1426_v56 = vrot.slane %v4987_v14, 3  ;;  %v1425_v62 = vrot.slane %v4989_v10, 3 }
 0x1e6   :  { %v1049_v37 = vsel %vm6743_vm12, %v1043_v15, %v2997_v25  ;;  %v1050_v47 = vsel %vm6746_vm9, %v1044_v11, %v2998_v48  ;;  %vm6748_vm12 = vmmov %vm6747_vm6  ;;  %vm6750_vm9 = vcmask 1045504   ;;  %v1483_v25 = vrot.slane %v4989_v10, 7 }
 0x1e7   :  { %v1055_v46 = vsel %vm496_vm13, %v1049_v37, %v3002_v6  ;;  %v1056_v39 = vsel %vm496_vm13, %v1050_v47, %v3003_v3  ;;  %v1882_v3 = vld [vmem:[%s6377_s3 + $0xf8] sm:$0xff] }
 0x1e8   :  { %v1191_v54 = vpop.permute.xlu1 %1190  ;;  %v1359_v0 = vpop.f32.mrf.mxu1  ;;  %1954 = vmatpush.msra.mxu3 %v1882_v3 }
 0x1e9   :  { %v1226_v59 = vrot.slane %v1191_v54, 7  ;;  %v1312_v34 = vpop.f32.mrf.mxu0 }
 0x1ea   :  { %v1313_v31 = vadd.f32 %v4953_v17, %v1312_v34  ;;  %v3006_v16 = vpop.permute.xlu0 %3005  ;;  %v1866_v34 = vld [vmem:[%s6377_s3 + $0x78] sm:$0xff] }
 0x1eb   :  { %v1227_v41 = vsel %vm6744_vm14, %v1222_v28, %v1226_v59  ;;  %v3008_v40 = vunpack.i.h.bf16 %v3006_v16  ;;  %v3007_v51 = vunpack.i.l.bf16 %v3006_v16  ;;  %1919 = vmatpush.msra.mxu2 %v1866_v34  ;;  %v1881_v16 = vld [vmem:[%s6377_s3 + $0xf0] sm:$0xff] }
 0x1ec   :  { %2715 = vmatmul.msk.f32.gmra.mxu1 %vm6745_vm3, %v1227_v41  ;;  %v1360_v33 = vadd.f32 %v1359_v0, %v1313_v31  ;;  %vm6749_vm3 = vmmov %vm6744_vm14  ;;  %v1865_v31 = vld [vmem:[%s6377_s3 + $0x70] sm:$0xff]  ;;  %v1864_v0 = vld [vmem:[%s6377_s3 + $0x68] sm:$0xff]  ;;  %1955 = vmatpush.msra.mxu3 %v1881_v16 }
 0x1ed   :  { %v5080_v42 = vpop.permute.xlu2 %1192  ;;  %v1061_v45 = vsel %vm502_vm1, %v1055_v46, %v3007_v51  ;;  %v1062_v30 = vsel %vm502_vm1, %v1056_v39, %v3008_v40  ;;  %v1880_v40 = vld [vmem:[%s6377_s3 + $0xe8] sm:$0xff]  ;;  %1920 = vmatpush.msra.mxu2 %v1865_v31  ;;  %v1879_v39 = vld [vmem:[%s6377_s3 + $0xe0] sm:$0xff] }
 0x1ee   :  { %v1230_v12 = vrot.slane %v5080_v42, 7  ;;  %v5084_v58 = vmax.f32 %v1360_v33, 0.0  ;;  %v1205_v43 = vsel %vm6747_vm6, %v1061_v45, %v1191_v54  ;;  %v5099_v28 = vsel %vm6748_vm12, %v1062_v30, %v5080_v42  ;;  %1956 = vmatpush.msra.mxu3 %v1880_v40  ;;  %v1863_v45 = vld [vmem:[%s6377_s3 + $0x60] sm:$0xff]  ;;  %v1878_v30 = vld [vmem:[%s6377_s3 + $0xd8] sm:$0xff] }
 0x1ef   :  { %v1224_v19 = vrot.slane %v1205_v43, 7  ;;  %vm6751_vm6 = vcmask 1041408   ;;  %vm6752_vm12 = vcmask 1046528   ;;  %v1228_v57 = vrot.slane %v5099_v28, 7  ;;  %1921 = vmatpush.msra.mxu2 %v1864_v0  ;;  %v1862_v43 = vld [vmem:[%s6377_s3 + $0x58] sm:$0xff]  ;;  %v1871_v0 = vld [vmem:[%s6377_s3 + $0xa0] sm:$0xff] }
 0x1f0   :  { %v5090_v26 = vrot.slane %v5084_v58, 2  ;;  %v1470_v21 = vrot.slane %v5084_v58, 6  ;;  %v5094_v18 = vrot.slane %v5084_v58, 1  ;;  %v1454_v27 = vrot.slane %v5084_v58, 5  ;;  %1957 = vmatpush.msra.mxu3 %v1879_v39 }
 0x1f1   :  { %v1225_v53 = vsel %vm6744_vm14, %v1220_v7, %v1224_v19  ;;  %v1231_v49 = vsel %vm6749_vm3, %v1226_v59, %v1230_v12  ;;  %vm6753_vm14 = vcmask 1042432   ;;  %vm6754_vm3 = vcmask 130048   ;;  %1922 = vmatpush.msra.mxu2 %v1863_v45 }
 0x1f2   :  { %v1071_v13 = vpop.permute.xlu0 %1070  ;;  %1326 = vmatmul.f32.gmra.mxu0 %v1225_v53  ;;  %v1414_v50 = vsel %vm6750_vm9, %v1411_v24, %v5090_v26  ;;  %v1471_v61 = vsel %vm6751_vm6, %v1468_v32, %v1470_v21  ;;  %v1400_v7 = vsel %vm6752_vm12, %v1397_v55, %v5094_v18  ;;  %v1455_v36 = vsel %vm6753_vm14, %v1452_v1, %v1454_v27  ;;  %v1082_v24 = vpop.permute.xlu1 %1081  ;;  %v1861_v53 = vld [vmem:[%s6377_s3 + $0x50] sm:$0xff] }
 0x1f3   :  { %v3029_v4 = vpack.i.bf16 %v1471_v61, %v1414_v50  ;;  %v3024_v23 = vpack.i.bf16 %v1455_v36, %v1400_v7  ;;  %v1155_v55 = vsel %vm418_vm7, %v4339_v29, %v1071_v13  ;;  %vm6755_vm9 = vcmask 1040384   ;;  %1923 = vmatpush.msra.mxu2 %v1862_v43  ;;  %1958 = vmatpush.msra.mxu3 %v1878_v30  ;;  %v1854_v43 = vld [vmem:[%s6377_s3 + $0x18] sm:$0xff] }
 0x1f4   :  { %2716 = vmatmul.msk.f32.gmra.mxu1 %vm6754_vm3, %v1231_v49  ;;  %v1229_v35 = vsel %vm6755_vm9, %v1224_v19, %v1228_v57  ;;  %v1158_v63 = vsel %vm424_vm8, %v1155_v55, %v1082_v24  ;;  %vm6756_vm6 = vcmask 146432   ;;  %vm6757_vm12 = vcmask 293888   ;;  %v1877_v49 = vld [vmem:[%s6377_s3 + $0xd0] sm:$0xff]  ;;  %v1860_v55 = vld [vmem:[%s6377_s3 + $0x48] sm:$0xff]  ;;  %v1870_v30 = vld [vmem:[%s6377_s3 + $0x98] sm:$0xff] }
 0x1f5   :  { %3030 = vrot.lane.b32.xlu0 %v3029_v4, %s3265_s14  ;;  %3025 = vrot.lane.b32.xlu2 %v3024_v23, %s3266_s19  ;;  %v1093_v32 = vpop.permute.xlu2 %1092  ;;  %vm6758_vm14 = vcmask 343040   ;;  %vm6759_vm3 = vcmask 1044480   ;;  %v1485_v20 = vsel %vm6755_vm9, %v1483_v25, %v1484_v8  ;;  %v1428_v54 = vrot.slane %v5084_v58, 3  ;;  %v1362_v51 = vpop.f32.mrf.mxu1 }
 0x1f6   :  { %v1161_v2 = vsel %vm6756_vm6, %v1158_v63, %v1093_v32  ;;  %v1427_v15 = vsel %vm6759_vm3, %v1425_v62, %v1426_v56  ;;  %v1486_v11 = vrot.slane %v5084_v58, 7  ;;  %vm6760_vm6 = vmmov %vm6759_vm3  ;;  %v1315_v41 = vpop.f32.mrf.mxu0  ;;  %1924 = vmatpush.msra.mxu2 %v1861_v53  ;;  %1959 = vmatpush.msra.mxu3 %v1877_v49  ;;  %v1859_v63 = vld [vmem:[%s6377_s3 + $0x40] sm:$0xff] }
 0x1f7   :  { %v3019_v48 = vpack.i.bf16 %v1485_v20, %v1427_v15  ;;  %v1429_v6 = vsel %vm6760_vm6, %v1426_v56, %v1428_v54  ;;  %v1316_v50 = vadd.f32 %v4953_v17, %v1315_v41  ;;  %v1855_v41 = vld [vmem:[%s6377_s3 + $0x20] sm:$0xff] }
 0x1f8   :  { %1925 = vmatpush.msra.mxu2 %v1860_v55  ;;  %v1851_v55 = vld [vmem:[%s6377_s3] sm:$0xff] }
 0x1f9   :  { %v1363_v4 = vadd.f32 %v1362_v51, %v1316_v50 }
 0x1fa   :  { %v1106_v1 = vpop.permute.xlu0 %1105  ;;  %1329 = vmatmul.f32.gmra.mxu0 %v1229_v35  ;;  %v1120_v44 = vpop.permute.xlu1 %1119  ;;  %v1876_v35 = vld [vmem:[%s6377_s3 + $0xc8] sm:$0xff]  ;;  %1926 = vmatpush.msra.mxu2 %v1859_v63 }
 0x1fb   :  { %v1165_v22 = vsel %vm436_vm10, %v1161_v2, %v1106_v1  ;;  %1960 = vmatpush.msra.mxu3 %v1876_v35  ;;  %v1875_v2 = vld [vmem:[%s6377_s3 + $0xc0] sm:$0xff] }
 0x1fc   :  { %v1169_v60 = vsel %vm442_vm11, %v1165_v22, %v1120_v44  ;;  %v5210_v44 = vmax.f32 %v1363_v4, 0.0 }
 0x1fd   :  { %v1134_v5 = vpop.permute.xlu2 %1133  ;;  %1961 = vmatpush.msra.mxu3 %v1875_v2 }
 0x1fe   :  { %v1173_v52 = vsel %vm6757_vm12, %v1169_v60, %v1134_v5  ;;  %vm6761_vm12 = vmmov %vm6755_vm9  ;;  %v1456_v63 = vrot.slane %v5210_v44, 5 }
 0x1ff   :  { %v1487_v59 = vsel %vm6761_vm12, %v1484_v8, %v1486_v11  ;;  %v1873_v8 = vld [vmem:[%s6377_s3 + $0xb0] sm:$0xff] }
 0x200   :  { %v3034_v37 = vpack.i.bf16 %v1487_v59, %v1429_v6  ;;  %v1856_v6 = vld [vmem:[%s6377_s3 + $0x28] sm:$0xff] }
 0x201   :  { %v1872_v59 = vld [vmem:[%s6377_s3 + $0xa8] sm:$0xff] }
 0x202   :  { %v1148_v9 = vpop.permute.xlu0 %1147  ;;  %v643_v47 = vpop.permute.xlu1 %642 }
 0x203   :  { %v1177_v29 = vsel %vm6758_vm14, %v1173_v52, %v1148_v9  ;;  %v979_v19 = vsel %vm418_vm7, %v6665_v38, %v643_v47  ;;  %vm6762_vm7 = vcmask 146432   ;;  %v1858_v52 = vld [vmem:[%s6377_s3 + $0x38] sm:$0xff] }
 0x204   :  { %1194 = vrot.lane.b32.xlu1 %v1177_v29, %s3263_s26  ;;  %v1874_v9 = vld [vmem:[%s6377_s3 + $0xb8] sm:$0xff]  ;;  %v1857_v29 = vld [vmem:[%s6377_s3 + $0x30] sm:$0xff]  ;;  %1927 = vmatpush.msra.mxu2 %v1858_v52 }
 0x205   :  { %v672_v46 = vpop.permute.xlu2 %671  ;;  %1962 = vmatpush.msra.mxu3 %v1874_v9  ;;  %v1867_v9 = vld [vmem:[%s6377_s3 + $0x80] sm:$0xff] }
 0x206   :  { %v985_v7 = vsel %vm424_vm8, %v979_v19, %v672_v46  ;;  %1928 = vmatpush.msra.mxu2 %v1857_v29  ;;  %vm6763_vm8 = vcmask 293888  }
 0x207   :  { %1963 = vmatpush.msra.mxu3 %v1873_v8 }
 0x208   :  { %1929 = vmatpush.msra.mxu2 %v1856_v6 }
 0x209   :  { %1964 = vmatpush.msra.mxu3 %v1872_v59 }
 0x20a   :  { %v701_v33 = vpop.permute.xlu0 %700  ;;  %v728_v36 = vpop.permute.xlu1 %727  ;;  %1930 = vmatpush.msra.mxu2 %v1855_v41 }
 0x20b   :  { %v991_v32 = vsel %vm6762_vm7, %v985_v7, %v701_v33  ;;  %1965 = vmatpush.msra.mxu3 %v1871_v0  ;;  %v1853_v7 = vld [vmem:[%s6377_s3 + $0x10] sm:$0xff] }
 0x20c   :  { %3020 = vrot.lane.b32.xlu1 %v3019_v48, %s3263_s26  ;;  %v997_v22 = vsel %vm436_vm10, %v991_v32, %v728_v36  ;;  %v1430_v48 = vrot.slane %v5210_v44, 3  ;;  %vm6764_vm10 = vmmov %vm6758_vm14  ;;  %vm6766_vm14 = vcmask 1045504   ;;  %1931 = vmatpush.msra.mxu2 %v1854_v43  ;;  %v1868_v32 = vld [vmem:[%s6377_s3 + $0x88] sm:$0xff] }
 0x20d   :  { %v755_v23 = vpop.permute.xlu2 %754  ;;  %1966 = vmatpush.msra.mxu3 %v1870_v30 }
 0x20e   :  { %v1003_v25 = vsel %vm442_vm11, %v997_v22, %v755_v23  ;;  %vm6765_vm11 = vmmov %vm6759_vm3  ;;  %vm6767_vm3 = vcmask 1046528   ;;  %1932 = vmatpush.msra.mxu2 %v1853_v7  ;;  %v1852_v23 = vld [vmem:[%s6377_s3 + $0x8] sm:$0xff] }
 0x20f   :  { %v1431_v39 = vsel %vm6765_vm11, %v1428_v54, %v1430_v48 }
 0x210   :  { %1933 = vmatpush.msra.mxu2 %v1852_v23  ;;  %v1441_v23 = vrot.slane %v4989_v10, 4 }
 0x212   :  { %v782_v24 = vpop.permute.xlu0 %781  ;;  %v809_v20 = vpop.permute.xlu1 %808  ;;  %1934 = vmatpush.msra.mxu2 %v1851_v55 }
 0x214   :  { %3035 = vrot.lane.b32.xlu1 %v3034_v37, %s3263_s26  ;;  %v1009_v37 = vsel %vm6763_vm8, %v1003_v25, %v782_v24  ;;  %v1488_v24 = vrot.slane %v5210_v44, 7  ;;  %vm6775_vm8 = vmmov %vm6767_vm3 }
 0x215   :  { %v827_v3 = vpop.permute.xlu2 %826  ;;  %v1015_v33 = vsel %vm6764_vm10, %v1009_v37, %v809_v20  ;;  %vm6777_vm10 = vcmask 637952  }
 0x216   :  { %v1021_v36 = vsel %vm460_vm15, %v1015_v33, %v827_v3  ;;  %vm6768_vm15 = vmmov %vm6755_vm9  ;;  %vm6770_vm9 = vcmask 1042432  }
 0x217   :  { %v1489_v8 = vsel %vm6768_vm15, %v1486_v11, %v1488_v24  ;;  %v1457_v6 = vsel %vm6770_vm9, %v1454_v27, %v1456_v63  ;;  %vm6784_vm15 = vcmask 130048  }
 0x21a   :  { %v847_v31 = vpop.permute.xlu0 %846  ;;  %v867_v2 = vpop.permute.xlu1 %866 }
 0x21b   :  { %v1027_v22 = vsel %vm466_vm4, %v1021_v36, %v847_v31  ;;  %vm6769_vm4 = vcmask 1041408  }
 0x21c   :  { %v1033_v25 = vsel %vm472_vm2, %v1027_v22, %v867_v2  ;;  %vm6771_vm2 = vmmov %vm6760_vm6 }
 0x21d   :  { %v887_v29 = vpop.permute.xlu2 %886  ;;  %vm6772_vm6 = vmmov %vm6761_vm12 }
 0x21e   :  { %v1039_v41 = vsel %vm478_vm5, %v1033_v25, %v887_v29  ;;  %vm6773_vm12 = vmmov %vm6766_vm14 }
 0x21f   :  { %vm6774_vm7 = vmmov %vm6769_vm4 }
 0x220   :  { %vm6776_vm5 = vmmov %vm6770_vm9 }
 0x221   :  { %vm6781_vm11 = vmmov %vm6772_vm6 }
 0x222   :  { %v927_v30 = vpop.permute.xlu1 %926  ;;  %vm6786_vm9 = vmmov %vm6775_vm8 }
 0x22f   :  { %v1365_v61 = vpop.f32.mrf.mxu1 }
 0x230   :  { %v1318_v13 = vpop.f32.mrf.mxu0 }
 0x231   :  { %v1319_v38 = vadd.f32 %v4953_v17, %v1318_v13 }
 0x233   :  { %v1366_v1 = vadd.f32 %v1365_v61, %v1319_v38  ;;  %v1869_v38 = vld [vmem:[%s6377_s3 + $0x90] sm:$0xff] }
 0x234   :  { %1967 = vmatpush.msra.mxu3 %v1869_v38 }
 0x235   :  { %v5225_v62 = vmax.f32 %v1366_v1, 0.0  ;;  %v1472_v1 = vrot.slane %v5210_v44, 6 }
 0x236   :  { %1968 = vmatpush.msra.mxu3 %v1868_v32  ;;  %v1442_v32 = vrot.slane %v4987_v14, 4 }
 0x237   :  { %v1590_v16 = vrot.slane %v5225_v62, 2  ;;  %v1571_v47 = vrot.slane %v5225_v62, 1  ;;  %v1473_v20 = vsel %vm6769_vm4, %v1470_v21, %v1472_v1 }
 0x238   :  { %1969 = vmatpush.msra.mxu3 %v1867_v9 }
 0x253   :  { %v1368_v5 = vpop.f32.mrf.mxu1 }
 0x254   :  { %v1321_v60 = vpop.f32.mrf.mxu0 }
 0x255   :  { %v1322_v56 = vadd.f32 %v4953_v17, %v1321_v60 }
 0x257   :  { %v1369_v15 = vadd.f32 %v1368_v5, %v1322_v56  ;;  %v907_v56 = vpop.permute.xlu0 %906 }
 0x259   :  { %v5236_v34 = vmax.f32 %v1369_v15, 0.0 }
 0x25b   :  { %v1609_v40 = vrot.slane %v5236_v34, 3  ;;  %v1591_v51 = vrot.slane %v5236_v34, 2  ;;  %v1572_v46 = vrot.slane %v5236_v34, 1  ;;  %v1371_v13 = vpop.f32.mrf.mxu1  ;;  %v1672_v35 = vrot.slane %v5236_v34, 7 }
 0x25c   :  { %v1324_v45 = vpop.f32.mrf.mxu0  ;;  %v1653_v60 = vrot.slane %v5236_v34, 6  ;;  %v1635_v52 = vrot.slane %v5236_v34, 5 }
 0x25d   :  { %v1325_v19 = vadd.f32 %v4953_v17, %v1324_v45  ;;  %v3049_v53 = vpack.i.bf16 %v1431_v39, %v1609_v40  ;;  %v1592_v49 = vsel %vm6766_vm14, %v1590_v16, %v1591_v51  ;;  %v1573_v54 = vsel %vm6767_vm3, %v1571_v47, %v1572_v46  ;;  %vm6782_vm14 = vmmov %vm6773_vm12 }
 0x25e   :  { %v3044_v50 = vpack.i.bf16 %v5090_v26, %v1592_v49  ;;  %v3039_v61 = vpack.i.bf16 %v5094_v18, %v1573_v54  ;;  %v3064_v15 = vpack.i.bf16 %v1489_v8, %v1672_v35  ;;  %v3059_v59 = vpack.i.bf16 %v1473_v20, %v1653_v60  ;;  %vm6783_vm3 = vmmov %vm6769_vm4 }
 0x25f   :  { %v1372_v4 = vadd.f32 %v1371_v13, %v1325_v19  ;;  %3050 = vrot.lane.b32.xlu1 %v3049_v53, %s3263_s26  ;;  %v3054_v37 = vpack.i.bf16 %v1457_v6, %v1635_v52  ;;  %v947_v53 = vpop.permute.xlu2 %946  ;;  %v967_v49 = vpop.permute.xlu0 %966  ;;  %vm6785_vm4 = vmmov %vm6772_vm6 }
 0x260   :  { %3045 = vrot.lane.b32.xlu0 %v3044_v50, %s3265_s14  ;;  %3040 = vrot.lane.b32.xlu2 %v3039_v61, %s3266_s19 }
 0x261   :  { %v5296_v5 = vmax.f32 %v1372_v4, 0.0 }
 0x263   :  { %v5320_v11 = vrot.slane %v5296_v5, 3  ;;  %v5323_v3 = vrot.slane %v5296_v5, 7  ;;  %v1593_v31 = vrot.slane %v5296_v5, 2  ;;  %v5328_v21 = vrot.slane %v5296_v5, 6 }
 0x264   :  { %v1574_v16 = vrot.slane %v5296_v5, 1  ;;  %v5332_v27 = vrot.slane %v5296_v5, 5 }
 0x265   :  { %v1611_v0 = vsel %vm6771_vm2, %v1609_v40, %v5320_v11  ;;  %v1674_v47 = vsel %vm6772_vm6, %v1672_v35, %v5323_v3  ;;  %v1594_v33 = vsel %vm6773_vm12, %v1591_v51, %v1593_v31  ;;  %v1655_v45 = vsel %vm6774_vm7, %v1653_v60, %v5328_v21 }
 0x266   :  { %v1575_v39 = vsel %vm6775_vm8, %v1572_v46, %v1574_v16  ;;  %v1637_v43 = vsel %vm6776_vm5, %v1635_v52, %v5332_v27  ;;  %v1045_v40 = vsel %vm484_vm0, %v1039_v41, %v907_v56  ;;  %v3079_v19 = vpack.i.bf16 %v1674_v47, %v1611_v0  ;;  %vm6789_vm8 = vmmov %vm6785_vm4 }
 0x267   :  { %3065 = vrot.lane.b32.xlu1 %v3064_v15, %s3263_s26  ;;  %v3074_v54 = vpack.i.bf16 %v1655_v45, %v1594_v33  ;;  %v3069_v13 = vpack.i.bf16 %v1637_v43, %v1575_v39  ;;  %v1051_v51 = vsel %vm6777_vm10, %v1045_v40, %v927_v30  ;;  %vm6778_vm0 = vcmask 785408   ;;  %v3011_v25 = vpop.permute.xlu2 %3010 }
 0x268   :  { %3060 = vrot.lane.b32.xlu0 %v3059_v59, %s3265_s14  ;;  %3055 = vrot.lane.b32.xlu2 %v3054_v37, %s3266_s19  ;;  %v1057_v46 = vsel %vm496_vm13, %v1051_v51, %v947_v53  ;;  %vm6780_vm13 = vmmov %vm6772_vm6  ;;  %v3016_v37 = vpop.permute.xlu0 %3015  ;;  %v3013_v30 = vunpack.i.h.bf16 %v3011_v25  ;;  %vm1539_vm6 = vcmask 261120   ;;  %vm1543_vm12 = vcmask 523264  }
 0x269   :  { %v1374_v50 = vpop.f32.mrf.mxu1  ;;  %v1063_v4 = vsel %vm502_vm1, %v1057_v46, %v967_v49  ;;  %vm6779_vm1 = vmmov %vm6771_vm2  ;;  %v3018_v40 = vunpack.i.h.bf16 %v3016_v37  ;;  %vm6788_vm7 = vcmask 1043456  }
 0x26a   :  { %vm6787_vm2 = vmmov %vm6776_vm5 }
 0x26b   :  { %vm6790_vm5 = vmmov %vm6783_vm3 }
 0x26c   :  { %vm6791_vm10 = vmmov %vm6778_vm0 }
 0x26f   :  { %v1327_v61 = vpop.f32.mrf.mxu0  ;;  %3080 = vrot.lane.b32.xlu1 %v3079_v19, %s3263_s26  ;;  %v3017_v19 = vunpack.i.l.bf16 %v3016_v37  ;;  %v1516_v37 = vrot.slane %v5225_v62, 3 }
 0x270   :  { %v1328_v7 = vadd.f32 %v4953_v17, %v1327_v61  ;;  %3075 = vrot.lane.b32.xlu0 %v3074_v54, %s3265_s14  ;;  %3070 = vrot.lane.b32.xlu2 %v3069_v13, %s3266_s19 }
 0x271   :  { %v1377_v41 = vpop.f32.mrf.mxu1 }
 0x272   :  { %v1375_v38 = vadd.f32 %v1374_v50, %v1328_v7  ;;  %v3026_v7 = vpop.permute.xlu2 %3025 }
 0x274   :  { %v5360_v36 = vmax.f32 %v1375_v38, 0.0 }
 0x276   :  { %v1195_v55 = vpop.permute.xlu1 %1194  ;;  %v5366_v35 = vrot.slane %v5360_v36, 3  ;;  %v1675_v2 = vrot.slane %v5360_v36, 7  ;;  %v5370_v22 = vrot.slane %v5360_v36, 2  ;;  %v1656_v60 = vrot.slane %v5360_v36, 6 }
 0x277   :  { %v1207_v52 = vsel %vm6778_vm0, %v1063_v4, %v1195_v55  ;;  %v1234_v9 = vrot.slane %v1195_v55, 7  ;;  %v1330_v29 = vpop.f32.mrf.mxu0  ;;  %v5375_v56 = vrot.slane %v5360_v36, 1  ;;  %v5378_v8 = vrot.slane %v5360_v36, 5  ;;  %v3031_v55 = vpop.permute.xlu0 %3030 }
 0x278   :  { %v1232_v15 = vrot.slane %v1207_v52, 7  ;;  %v1331_v20 = vadd.f32 %v4953_v17, %v1330_v29  ;;  %v1613_v6 = vsel %vm6779_vm1, %v5320_v11, %v5366_v35  ;;  %v1676_v59 = vsel %vm6780_vm13, %v5323_v3, %v1675_v2  ;;  %vm6792_vm1 = vmmov %vm6788_vm7 }
 0x279   :  { %v1235_v0 = vsel %vm6781_vm11, %v1230_v12, %v1234_v9  ;;  %v3094_v47 = vpack.i.bf16 %v1676_v59, %v1613_v6  ;;  %v1596_v33 = vsel %vm6782_vm14, %v1593_v31, %v5370_v22  ;;  %v1657_v17 = vsel %vm6783_vm3, %v5328_v21, %v1656_v60  ;;  %vm6793_vm13 = vmmov %vm6782_vm14 }
 0x27a   :  { %v1378_v45 = vadd.f32 %v1377_v41, %v1331_v20  ;;  %2717 = vmatmul.msk.f32.gmra.mxu1 %vm6784_vm15, %v1235_v0  ;;  %v1233_v39 = vsel %vm6785_vm4, %v1228_v57, %v1232_v15  ;;  %v3089_v43 = vpack.i.bf16 %v1657_v17, %v1596_v33  ;;  %v1577_v42 = vsel %vm6786_vm9, %v1574_v16, %v5375_v56  ;;  %vm6795_vm14 = vmmov %vm6778_vm0 }
 0x27b   :  { %v3012_v12 = vunpack.i.l.bf16 %v3011_v25  ;;  %1332 = vmatmul.f32.gmra.mxu0 %v1233_v39  ;;  %3095 = vrot.lane.b32.xlu1 %v3094_v47, %s3263_s26  ;;  %v1639_v31 = vsel %vm6787_vm2, %v5332_v27, %v5378_v8  ;;  %v1443_v16 = vsel %vm6788_vm7, %v1441_v23, %v1442_v32  ;;  %v1444_v25 = vrot.slane %v5084_v58, 4  ;;  %vm6796_vm3 = vmmov %vm6778_vm0 }
 0x27c   :  { %v5403_v53 = vmax.f32 %v1378_v45, 0.0  ;;  %3090 = vrot.lane.b32.xlu0 %v3089_v43, %s3265_s14  ;;  %v3084_v28 = vpack.i.bf16 %v1639_v31, %v1577_v42  ;;  %v1550_v61 = vsel %vm1539_vm6, %v1443_v16, %v3013_v30  ;;  %v1507_v15 = vrot.slane %v5210_v44, 2  ;;  %vm6797_vm15 = vmmov %vm6786_vm9 }
 0x27d   :  { %v1540_v50 = vsel %vm1539_vm6, %v4989_v10, %v3012_v12  ;;  %v1553_v38 = vsel %vm1543_vm12, %v1550_v61, %v3018_v40  ;;  %v3027_v20 = vunpack.i.l.bf16 %v3026_v7  ;;  %v3032_v6 = vunpack.i.l.bf16 %v3031_v55  ;;  %vm6798_vm9 = vmmov %vm6790_vm5 }
 0x27e   :  { %3085 = vrot.lane.b32.xlu2 %v3084_v28, %s3266_s19  ;;  %v3021_v57 = vpop.permute.xlu1 %3020  ;;  %v1677_v49 = vrot.slane %v5403_v53, 7  ;;  %v1658_v54 = vrot.slane %v5403_v53, 6  ;;  %v1544_v46 = vsel %vm1543_vm12, %v1540_v50, %v3017_v19  ;;  %v3099_v59 = vpack.i.bf16 %v5378_v8, %v5375_v56  ;;  %vm6799_vm7 = vmmov %vm6797_vm15 }
 0x27f   :  { %v3023_v13 = vunpack.i.h.bf16 %v3021_v57  ;;  %v3022_v51 = vunpack.i.l.bf16 %v3021_v57  ;;  %v1499_v41 = vrot.slane %v5210_v44, 1  ;;  %v1445_v47 = vsel %vm6792_vm1, %v1442_v32, %v1444_v25  ;;  %vm6803_vm1 = vmmov %vm6778_vm0 }
 0x280   :  { %v1678_v4 = vsel %vm6789_vm8, %v1675_v2, %v1677_v49  ;;  %v1659_v23 = vsel %vm6790_vm5, %v1656_v60, %v1658_v54  ;;  %v3028_v2 = vunpack.i.h.bf16 %v3026_v7  ;;  %v3033_v60 = vunpack.i.h.bf16 %v3031_v55  ;;  %vm6800_vm8 = vmmov %vm6787_vm2  ;;  %v1912_v55 = vld [vmem:[%s6377_s3 + $0x1e8] sm:$0xff] }
 0x281   :  { %v1547_v52 = vsel %vm6791_vm10, %v1544_v46, %v3022_v51  ;;  %v1556_v10 = vsel %vm6778_vm0, %v1553_v38, %v3023_v13  ;;  %v3109_v9 = vpack.i.bf16 %v1678_v4, %v5366_v35  ;;  %v3104_v29 = vpack.i.bf16 %v1659_v23, %v5370_v22  ;;  %vm6802_vm10 = vmmov %vm6793_vm13  ;;  %v1914_v38 = vld [vmem:[%s6377_s3 + $0x1f8] sm:$0xff]  ;;  %v1913_v4 = vld [vmem:[%s6377_s3 + $0x1f0] sm:$0xff] }
 0x282   :  { %1935 = vmatmul.f32.vlgmr.msra.gmra.mxu2 %v1547_v52  ;;  %1970 = vmatmul.f32.vlgmr.msra.gmra.mxu3 %v1556_v10  ;;  %v1508_v33 = vsel %vm6793_vm13, %v5090_v26, %v1507_v15  ;;  %v1541_v39 = vsel %vm1539_vm6, %v4987_v14, %v3027_v20  ;;  %v1551_v43 = vsel %vm1539_vm6, %v1445_v47, %v3028_v2  ;;  %vm6794_vm11 = vcmask 1044480   ;;  %v1896_v23 = vld [vmem:[%s6377_s3 + $0x168] sm:$0xff]  ;;  %v1895_v52 = vld [vmem:[%s6377_s3 + $0x160] sm:$0xff]  ;;  %v1894_v20 = vld [vmem:[%s6377_s3 + $0x158] sm:$0xff] }
 0x283   :  { %3110 = vrot.lane.b32.xlu1 %v3109_v9, %s3263_s26  ;;  %v1545_v42 = vsel %vm1543_vm12, %v1541_v39, %v3032_v6  ;;  %v1554_v30 = vsel %vm1543_vm12, %v1551_v43, %v3033_v60  ;;  %v1517_v12 = vsel %vm6794_vm11, %v1430_v48, %v1516_v37  ;;  %v1500_v14 = vsel %vm6797_vm15, %v5094_v18, %v1499_v41  ;;  %vm6801_vm5 = vmmov %vm6794_vm11  ;;  %v1911_v10 = vld [vmem:[%s6377_s3 + $0x1e0] sm:$0xff]  ;;  %v1910_v60 = vld [vmem:[%s6377_s3 + $0x1d8] sm:$0xff] }
 0x284   :  { %3105 = vrot.lane.b32.xlu0 %v3104_v29, %s3265_s14  ;;  %v3124_v31 = vpack.i.bf16 %v1517_v12, %v5320_v11  ;;  %v3119_v40 = vpack.i.bf16 %v1507_v15, %v1508_v33  ;;  %v3114_v48 = vpack.i.bf16 %v1499_v41, %v1500_v14  ;;  %v1534_v19 = vrot.slane %v5225_v62, 7  ;;  %2024 = vmatpush.msrb.mxu3 %v1914_v38  ;;  %v1893_v41 = vld [vmem:[%s6377_s3 + $0x150] sm:$0xff]  ;;  %v1908_v39 = vld [vmem:[%s6377_s3 + $0x1c8] sm:$0xff]  ;;  %v1907_v14 = vld [vmem:[%s6377_s3 + $0x1c0] sm:$0xff] }
 0x285   :  { %v1529_v28 = vrot.slane %v5225_v62, 6  ;;  %v1524_v11 = vrot.slane %v5225_v62, 5  ;;  %vm6804_vm13 = vmmov %vm6802_vm10  ;;  %vm6805_vm11 = vcmask 1043456  }
 0x286   :  { %3100 = vrot.lane.b32.xlu2 %v3099_v59, %s3266_s19  ;;  %v3036_v0 = vpop.permute.xlu1 %3035  ;;  %v1535_v18 = vsel %vm6785_vm4, %v1488_v24, %v1534_v19  ;;  %v1691_v24 = vrot.slane %v5403_v53, 1  ;;  %2025 = vmatpush.msrb.mxu3 %v1913_v4  ;;  %v1888_v4 = vld [vmem:[%s6377_s3 + $0x128] sm:$0xff]  ;;  %vm6808_vm15 = vmmov %vm6802_vm10 }
 0x287   :  { %v3038_v17 = vunpack.i.h.bf16 %v3036_v0  ;;  %v3037_v45 = vunpack.i.l.bf16 %v3036_v0  ;;  %v3139_v57 = vpack.i.bf16 %v1535_v18, %v5323_v3  ;;  %v1530_v16 = vsel %vm6798_vm9, %v1472_v1, %v1529_v28  ;;  %v1909_v0 = vld [vmem:[%s6377_s3 + $0x1d0] sm:$0xff]  ;;  %vm6809_vm4 = vmmov %vm6805_vm11 }
 0x288   :  { %v3134_v13 = vpack.i.bf16 %v1530_v16, %v5328_v21  ;;  %v1525_v51 = vsel %vm6787_vm2, %v1456_v63, %v1524_v11  ;;  %v1723_v3 = vrot.slane %v5403_v53, 5  ;;  %v1707_v1 = vrot.slane %v5403_v53, 3  ;;  %2026 = vmatpush.msrb.mxu3 %v1912_v55  ;;  %vm6810_vm9 = vmmov %vm6778_vm0 }
 0x289   :  { %v5452_v32 = vsel %vm6795_vm14, %v1545_v42, %v3037_v45  ;;  %v5455_v26 = vsel %vm6796_vm3, %v1554_v30, %v3038_v17  ;;  %v3129_v50 = vpack.i.bf16 %v1525_v51, %v5332_v27  ;;  %v1699_v21 = vrot.slane %v5403_v53, 2  ;;  %v1892_v45 = vld [vmem:[%s6377_s3 + $0x148] sm:$0xff]  ;;  %v1890_v51 = vld [vmem:[%s6377_s3 + $0x138] sm:$0xff]  ;;  %vm6806_vm14 = vmmov %vm6778_vm0 }
 0x28a   :  { %1938 = vmatmul.f32.gmra.mxu2 %v5452_v32  ;;  %1973 = vmatmul.f32.gmra.mxu3 %v5455_v26  ;;  %v1692_v61 = vsel %vm6799_vm7, %v5375_v56, %v1691_v24  ;;  %v1724_v63 = vsel %vm6800_vm8, %v5378_v8, %v1723_v3  ;;  %v1708_v27 = vsel %vm6801_vm5, %v5366_v35, %v1707_v1  ;;  %v1898_v35 = vld [vmem:[%s6377_s3 + $0x178] sm:$0xff]  ;;  %v1626_v16 = vrot.slane %v5236_v34, 4  ;;  %vm6807_vm3 = vmmov %vm6778_vm0 }
 0x28b   :  { %3125 = vrot.lane.b32.xlu1 %v3124_v31, %s3263_s26  ;;  %v1700_v7 = vsel %vm6802_vm10, %v5370_v22, %v1699_v21  ;;  %v3144_v46 = vpack.i.bf16 %v1724_v63, %v1692_v61  ;;  %v3149_v56 = vpack.i.bf16 %v1723_v3, %v1691_v24  ;;  %1989 = vmatpush.msrb.mxu2 %v1898_v35  ;;  %v1897_v22 = vld [vmem:[%s6377_s3 + $0x170] sm:$0xff]  ;;  %v1891_v31 = vld [vmem:[%s6377_s3 + $0x140] sm:$0xff]  ;;  %v5602_v55 = vrot.slane %v5296_v5, 4  ;;  %vm6811_vm2 = vmmov %vm6778_vm0 }
 0x28c   :  { %3120 = vrot.lane.b32.xlu0 %v3119_v40, %s3265_s14  ;;  %2027 = vmatpush.msrb.mxu3 %v1911_v10  ;;  %v1446_v40 = vrot.slane %v5210_v44, 4  ;;  %vm6812_vm7 = vcmask 1040384   ;;  %vm6814_vm5 = vmmov %vm6809_vm4 }
 0x28d   :  { %1990 = vmatpush.msrb.mxu2 %v1897_v22  ;;  %vm6813_vm8 = vmmov %vm6812_vm7 }
 0x28e   :  { %3115 = vrot.lane.b32.xlu2 %v3114_v48, %s3266_s19  ;;  %2028 = vmatpush.msrb.mxu3 %v1910_v60  ;;  %v1447_v24 = vsel %vm6805_vm11, %v1444_v25, %v1446_v40  ;;  %vm6815_vm10 = vmmov %vm6778_vm0 }
 0x28f   :  { %1991 = vmatpush.msrb.mxu2 %v1896_v23  ;;  %v1904_v23 = vld [vmem:[%s6377_s3 + $0x1a8] sm:$0xff]  ;;  %vm6818_vm11 = vmmov %vm6778_vm0 }
 0x290   :  { %2029 = vmatpush.msrb.mxu3 %v1909_v0  ;;  %v1628_v0 = vsel %vm6809_vm4, %v1626_v16, %v5602_v55 }
 0x291   :  { %1992 = vmatpush.msrb.mxu2 %v1895_v52 }
 0x292   :  { %2030 = vmatpush.msrb.mxu3 %v1908_v39 }
 0x293   :  { %3140 = vrot.lane.b32.xlu1 %v3139_v57, %s3263_s26  ;;  %1993 = vmatpush.msrb.mxu2 %v1894_v20  ;;  %v1903_v20 = vld [vmem:[%s6377_s3 + $0x1a0] sm:$0xff] }
 0x294   :  { %3135 = vrot.lane.b32.xlu0 %v3134_v13, %s3265_s14  ;;  %2031 = vmatpush.msrb.mxu3 %v1907_v14  ;;  %v1884_v14 = vld [vmem:[%s6377_s3 + $0x108] sm:$0xff] }
 0x295   :  { %1994 = vmatpush.msrb.mxu2 %v1893_v41  ;;  %v1902_v41 = vld [vmem:[%s6377_s3 + $0x198] sm:$0xff] }
 0x296   :  { %3130 = vrot.lane.b32.xlu2 %v3129_v50, %s3266_s19  ;;  %v1906_v50 = vld [vmem:[%s6377_s3 + $0x1b8] sm:$0xff] }
 0x297   :  { %1995 = vmatpush.msrb.mxu2 %v1892_v45  ;;  %2032 = vmatpush.msrb.mxu3 %v1906_v50  ;;  %v1901_v45 = vld [vmem:[%s6377_s3 + $0x190] sm:$0xff] }
 0x299   :  { %1996 = vmatpush.msrb.mxu2 %v1891_v31 }
 0x29b   :  { %1711 = vrot.lane.b32.xlu1 %v1708_v27, %s3263_s26  ;;  %1997 = vmatpush.msrb.mxu2 %v1890_v51 }
 0x29c   :  { %1701 = vrot.lane.b32.xlu0 %v1700_v7, %s3265_s14 }
 0x29e   :  { %3145 = vrot.lane.b32.xlu2 %v3144_v46, %s3266_s19  ;;  %v1889_v46 = vld [vmem:[%s6377_s3 + $0x130] sm:$0xff] }
 0x29f   :  { %1998 = vmatpush.msrb.mxu2 %v1889_v46 }
 0x2a1   :  { %1999 = vmatpush.msrb.mxu2 %v1888_v4 }
 0x2a6   :  { %3150 = vrot.lane.b32.xlu2 %v3149_v56, %s3266_s19  ;;  %v1905_v56 = vld [vmem:[%s6377_s3 + $0x1b0] sm:$0xff] }
 0x2a7   :  { %2033 = vmatpush.msrb.mxu3 %v1905_v56 }
 0x2a9   :  { %2034 = vmatpush.msrb.mxu3 %v1904_v23 }
 0x2ab   :  { %2035 = vmatpush.msrb.mxu3 %v1903_v20 }
 0x2ad   :  { %2036 = vmatpush.msrb.mxu3 %v1902_v41 }
 0x2af   :  { %2037 = vmatpush.msrb.mxu3 %v1901_v45 }
 0x2ba   :  { %v3041_v8 = vpop.permute.xlu2 %3040 }
 0x2bb   :  { %v3043_v9 = vunpack.i.h.bf16 %v3041_v8  ;;  %v3042_v29 = vunpack.i.l.bf16 %v3041_v8 }
 0x2bd   :  { %v1542_v47 = vsel %vm1539_vm6, %v5084_v58, %v3043_v9  ;;  %v1751_v33 = vsel %vm1539_vm6, %v5225_v62, %v3042_v29 }
 0x2c2   :  { %v3056_v6 = vpop.permute.xlu2 %3055 }
 0x2c3   :  { %v3058_v19 = vunpack.i.h.bf16 %v3056_v6  ;;  %v3057_v28 = vunpack.i.l.bf16 %v3056_v6 }
 0x2c5   :  { %v1552_v63 = vsel %vm1539_vm6, %v1447_v24, %v3058_v19  ;;  %v1763_v27 = vsel %vm1539_vm6, %v1626_v16, %v3057_v28  ;;  %v1900_v19 = vld [vmem:[%s6377_s3 + $0x188] sm:$0xff]  ;;  %v1883_v16 = vld [vmem:[%s6377_s3 + $0x100] sm:$0xff] }
 0x2c6   :  { %2038 = vmatpush.msrb.mxu3 %v1900_v19 }
 0x2ca   :  { %v3071_v8 = vpop.permute.xlu2 %3070 }
 0x2cb   :  { %v3073_v10 = vunpack.i.h.bf16 %v3071_v8  ;;  %v3072_v9 = vunpack.i.l.bf16 %v3071_v8 }
 0x2cd   :  { %v1764_v39 = vsel %vm1539_vm6, %v1628_v0, %v3073_v10 }
 0x2d1   :  { %v5527_v15 = vpop.permute.xlu1 %3050 }
 0x2d2   :  { %v3046_v2 = vpop.permute.xlu0 %3045  ;;  %v3052_v17 = vunpack.i.l.bf16 %v5527_v15  ;;  %v3053_v30 = vunpack.i.h.bf16 %v5527_v15 }
 0x2d3   :  { %v3048_v59 = vunpack.i.h.bf16 %v3046_v2  ;;  %v3047_v37 = vunpack.i.l.bf16 %v3046_v2  ;;  %v1887_v2 = vld [vmem:[%s6377_s3 + $0x120] sm:$0xff] }
 0x2d4   :  { %2000 = vmatpush.msrb.mxu2 %v1887_v2 }
 0x2d5   :  { %v1755_v43 = vsel %vm1543_vm12, %v1751_v33, %v3047_v37  ;;  %v1546_v42 = vsel %vm1543_vm12, %v1542_v47, %v3048_v59  ;;  %v1886_v37 = vld [vmem:[%s6377_s3 + $0x118] sm:$0xff] }
 0x2d6   :  { %v5556_v12 = vsel %vm6778_vm0, %v1755_v43, %v3052_v17  ;;  %v1549_v11 = vsel %vm6803_vm1, %v1546_v42, %v3053_v30  ;;  %2001 = vmatpush.msrb.mxu2 %v1886_v37  ;;  %v1885_v17 = vld [vmem:[%s6377_s3 + $0x110] sm:$0xff]  ;;  %v1752_v43 = vsel %vm1539_vm6, %v5236_v34, %v3072_v9  ;;  %vm6816_vm1 = vmmov %vm6812_vm7 }
 0x2d7   :  { %v1805_v48 = vrot.slane %v5556_v12, 7  ;;  %vm6822_vm4 = vmmov %vm6816_vm1 }
 0x2d8   :  { %v3086_v28 = vpop.permute.xlu2 %3085  ;;  %2002 = vmatpush.msrb.mxu2 %v1885_v17 }
 0x2d9   :  { %v3066_v18 = vpop.permute.xlu1 %3065  ;;  %v1847_v57 = vsel %vm6804_vm13, %v1549_v11, %v1805_v48  ;;  %vm6817_vm13 = vmmov %vm6816_vm1 }
 0x2da   :  { %v3061_v13 = vpop.permute.xlu0 %3060  ;;  %1941 = vmatmul.f32.gmra.mxu2 %v1847_v57  ;;  %v3067_v7 = vunpack.i.l.bf16 %v3066_v18  ;;  %v3068_v38 = vunpack.i.h.bf16 %v3066_v18 }
 0x2db   :  { %v3063_v3 = vunpack.i.h.bf16 %v3061_v13  ;;  %v3062_v61 = vunpack.i.l.bf16 %v3061_v13  ;;  %v1899_v13 = vld [vmem:[%s6377_s3 + $0x180] sm:$0xff]  ;;  %2003 = vmatpush.msrb.mxu2 %v1884_v14 }
 0x2dc   :  { %2039 = vmatpush.msrb.mxu3 %v1899_v13  ;;  %v3222_v14 = vld [vmem:[%s6376_s2] ss:$0 sm:$0xff] }
 0x2dd   :  { %v1767_v25 = vsel %vm1543_vm12, %v1763_v27, %v3062_v61  ;;  %v1555_v35 = vsel %vm1543_vm12, %v1552_v63, %v3063_v3  ;;  %2004 = vmatpush.msrb.mxu2 %v1883_v16  ;;  %v5656_v61 = vrot.slane %v5360_v36, 4  ;;  %v3088_v63 = vunpack.i.h.bf16 %v3086_v28 }
 0x2de   :  { %v1771_v22 = vsel %vm6806_vm14, %v1767_v25, %v3067_v7  ;;  %v5605_v29 = vsel %vm6807_vm3, %v1555_v35, %v3068_v38  ;;  %v3087_v27 = vunpack.i.l.bf16 %v3086_v28  ;;  %vm6819_vm14 = vmmov %vm6778_vm0 }
 0x2df   :  { %v1806_v52 = vrot.slane %v1771_v22, 7  ;;  %v1630_v12 = vsel %vm6814_vm5, %v5602_v55, %v5656_v61  ;;  %vm6820_vm3 = vmmov %vm6816_vm1 }
 0x2e0   :  { %v1765_v38 = vsel %vm1539_vm6, %v1630_v12, %v3088_v63  ;;  %v1753_v22 = vsel %vm1539_vm6, %v5296_v5, %v3087_v27 }
 0x2e1   :  { %v3081_v60 = vpop.permute.xlu1 %3080  ;;  %v1848_v6 = vsel %vm6808_vm15, %v5605_v29, %v1806_v52  ;;  %vm6821_vm15 = vmmov %vm6816_vm1 }
 0x2e2   :  { %v3076_v59 = vpop.permute.xlu0 %3075  ;;  %1976 = vmatmul.f32.gmra.mxu3 %v1848_v6  ;;  %v3083_v42 = vunpack.i.h.bf16 %v3081_v60  ;;  %v3082_v31 = vunpack.i.l.bf16 %v3081_v60 }
 0x2e3   :  { %v3078_v47 = vunpack.i.h.bf16 %v3076_v59  ;;  %v3077_v33 = vunpack.i.l.bf16 %v3076_v59 }
 0x2e5   :  { %v5639_v11 = vsel %vm1543_vm12, %v1752_v43, %v3077_v33  ;;  %v1768_v18 = vsel %vm1543_vm12, %v1764_v39, %v3078_v47 }
 0x2e6   :  { %v1760_v34 = vsel %vm6810_vm9, %v5639_v11, %v3082_v31  ;;  %v1772_v57 = vsel %vm6811_vm2, %v1768_v18, %v3083_v42  ;;  %vm6823_vm9 = vcmask 1041408   ;;  %vm6824_vm2 = vmmov %vm6778_vm0 }
 0x2e7   :  { %v1809_v51 = vrot.slane %v1760_v34, 7  ;;  %v1811_v50 = vrot.slane %v1772_v57, 7 }
 0x2e9   :  { %v1810_v24 = vsel %vm6812_vm7, %v1805_v48, %v1809_v51  ;;  %v1812_v3 = vsel %vm6813_vm8, %v1806_v52, %v1811_v50  ;;  %v3101_v48 = vpop.permute.xlu2 %3100  ;;  %vm6825_vm7 = vmmov %vm6778_vm0 }
 0x2ea   :  { %1944 = vmatmul.f32.gmra.mxu2 %v1810_v24  ;;  %1979 = vmatmul.f32.gmra.mxu3 %v1812_v3  ;;  %v3103_v20 = vunpack.i.h.bf16 %v3101_v48  ;;  %v3102_v60 = vunpack.i.l.bf16 %v3101_v48  ;;  %vm6826_vm8 = vmmov %vm6778_vm0 }
 0x2ec   :  { %v1766_v17 = vsel %vm1539_vm6, %v5656_v61, %v3103_v20  ;;  %v1754_v45 = vsel %vm1539_vm6, %v5360_v36, %v3102_v60 }
 0x2ed   :  { %v3096_v7 = vpop.permute.xlu1 %3095 }
 0x2ee   :  { %v3098_v46 = vunpack.i.h.bf16 %v3096_v7  ;;  %v3097_v56 = vunpack.i.l.bf16 %v3096_v7  ;;  %v3091_v8 = vpop.permute.xlu0 %3090 }
 0x2ef   :  { %v3093_v25 = vunpack.i.h.bf16 %v3091_v8  ;;  %v3092_v35 = vunpack.i.l.bf16 %v3091_v8  ;;  %v5712_v8 = vld [vmem:[%s6378_s4] ss:$0 sm:$0xff] }
 0x2f1   :  { %v1757_v4 = vsel %vm1543_vm12, %v1753_v22, %v3092_v35  ;;  %v1769_v23 = vsel %vm1543_vm12, %v1765_v38, %v3093_v25  ;;  %v3116_v43 = vpop.permute.xlu2 %3115 }
 0x2f2   :  { %v1761_v52 = vsel %vm6815_vm10, %v1757_v4, %v3097_v56  ;;  %v1773_v10 = vsel %vm6778_vm0, %v1769_v23, %v3098_v46  ;;  %v3117_v35 = vunpack.i.l.bf16 %v3116_v43  ;;  %vm6827_vm10 = vmmov %vm6778_vm0 }
 0x2f3   :  { %v5668_v9 = vrot.slane %v1761_v52, 7  ;;  %v5670_v2 = vrot.slane %v1773_v10, 7 }
 0x2f4   :  { %v1559_v20 = vsel %vm1539_vm6, %v5084_v58, %v3117_v35 }
 0x2f5   :  { %v5672_v6 = vpop.permute.xlu1 %3110  ;;  %v1817_v59 = vsel %vm6816_vm1, %v1809_v51, %v5668_v9  ;;  %v1818_v5 = vsel %vm6817_vm13, %v1811_v50, %v5670_v2  ;;  %vm6828_vm1 = vcmask 1045504  }
 0x2f6   :  { %v3113_v37 = vunpack.i.h.bf16 %v5672_v6  ;;  %v3112_v41 = vunpack.i.l.bf16 %v5672_v6  ;;  %v5680_v0 = vpop.permute.xlu0 %3105  ;;  %1947 = vmatmul.f32.gmra.mxu2 %v1817_v59  ;;  %1982 = vmatmul.f32.gmra.mxu3 %v1818_v5  ;;  %vm6829_vm13 = vmmov %vm6828_vm1 }
 0x2f7   :  { %v3108_v47 = vunpack.i.h.bf16 %v5680_v0  ;;  %v3107_v33 = vunpack.i.l.bf16 %v5680_v0  ;;  %v1380_v34 = vpop.f32.mrf.mxu1 }
 0x2f8   :  { %v1333_v39 = vpop.f32.mrf.mxu0 }
 0x2f9   :  { %v1758_v42 = vsel %vm1543_vm12, %v1754_v45, %v3107_v33  ;;  %v1770_v31 = vsel %vm1543_vm12, %v1766_v17, %v3108_v47  ;;  %v1334_v19 = vadd.f32 %v3222_v14, %v1333_v39  ;;  %v3131_v12 = vpop.permute.xlu2 %3130 }
 0x2fa   :  { %v1762_v28 = vsel %vm6818_vm11, %v1758_v42, %v3112_v41  ;;  %v1774_v18 = vsel %vm6819_vm14, %v1770_v31, %v3113_v37  ;;  %v3132_v38 = vunpack.i.l.bf16 %v3131_v12  ;;  %v3133_v17 = vunpack.i.h.bf16 %v3131_v12  ;;  %vm6830_vm11 = vmmov %vm6814_vm5 }
 0x2fb   :  { %v1823_v57 = vrot.slane %v1762_v28, 7  ;;  %v1825_v16 = vrot.slane %v1774_v18, 7  ;;  %v1381_v13 = vadd.f32 %v1380_v34, %v1334_v19  ;;  %vm6831_vm14 = vmmov %vm6820_vm3 }
 0x2fc   :  { %v1782_v60 = vsel %vm1539_vm6, %v5602_v55, %v3132_v38 }
 0x2fd   :  { %v3126_v51 = vpop.permute.xlu1 %3125  ;;  %v1824_v50 = vsel %vm6820_vm3, %v5668_v9, %v1823_v57  ;;  %v1826_v24 = vsel %vm6821_vm15, %v5670_v2, %v1825_v16  ;;  %v1392_v3 = vmax.f32 %v1381_v13, 0.0  ;;  %vm6832_vm15 = vmmov %vm6778_vm0 }
 0x2fe   :  { %v3121_v63 = vpop.permute.xlu0 %3120  ;;  %1950 = vmatmul.f32.gmra.mxu2 %v1824_v50  ;;  %1985 = vmatmul.f32.gmra.mxu3 %v1826_v24  ;;  %v3127_v59 = vunpack.i.l.bf16 %v3126_v51 }
 0x2ff   :  { %v1735_v27 = vrot.slane %v1392_v3, 6  ;;  %v1743_v7 = vrot.slane %v1392_v3, 7  ;;  %v3123_v33 = vunpack.i.h.bf16 %v3121_v63 }
 0x300   :  { %v1779_v55 = vsel %vm6825_vm7, %v5639_v11, %v3127_v59  ;;  %v1718_v11 = vrot.slane %v5403_v53, 4  ;;  %vm6836_vm7 = vmmov %vm6778_vm0 }
 0x301   :  { %v1744_v46 = vsel %vm6822_vm4, %v1677_v49, %v1743_v7  ;;  %v1736_v56 = vsel %vm6823_vm9, %v1658_v54, %v1735_v27  ;;  %v3122_v54 = vunpack.i.l.bf16 %v3121_v63  ;;  %v3146_v14 = vpop.permute.xlu2 %3145  ;;  %v1807_v19 = vrot.slane %v1779_v55, 7  ;;  %vm6833_vm4 = vmmov %vm6778_vm0 }
 0x302   :  { %v3159_v48 = vpack.i.bf16 %v1744_v46, %v1707_v1  ;;  %v3154_v25 = vpack.i.bf16 %v1736_v56, %v1699_v21  ;;  %v3118_v21 = vunpack.i.h.bf16 %v3116_v43  ;;  %v3128_v43 = vunpack.i.h.bf16 %v3126_v51  ;;  %vm6834_vm9 = vmmov %vm6820_vm3 }
 0x303   :  { %v1561_v41 = vsel %vm1543_vm12, %v1559_v20, %v3122_v54  ;;  %v3148_v34 = vunpack.i.h.bf16 %v3146_v14  ;;  %v3147_v16 = vunpack.i.l.bf16 %v3146_v14  ;;  %v1719_v13 = vsel %vm6830_vm11, %v5656_v61, %v1718_v11 }
 0x304   :  { %3160 = vrot.lane.b32.xlu1 %v3159_v48, %s3263_s26  ;;  %3155 = vrot.lane.b32.xlu0 %v3154_v25, %s3265_s14  ;;  %v1563_v39 = vsel %vm6824_vm2, %v1561_v41, %v3053_v30  ;;  %v1560_v58 = vsel %vm1539_vm6, %v5210_v44, %v3118_v21  ;;  %v1814_v7 = vsel %vm6831_vm14, %v1807_v19, %v5668_v9  ;;  %vm6835_vm2 = vmmov %vm6820_vm3 }
 0x305   :  { %v1936_v49 = vpop.f32.mrf.mxu2  ;;  %v3141_v23 = vpop.permute.xlu1 %3140  ;;  %v1562_v15 = vsel %vm1543_vm12, %v1560_v58, %v3123_v33  ;;  %v1783_v51 = vsel %vm1539_vm6, %v1719_v13, %v3148_v34  ;;  %v1775_v24 = vsel %vm1539_vm6, %v5360_v36, %v3147_v16  ;;  %vm6844_vm11 = vmmov %vm6835_vm2 }
 0x306   :  { %v3136_v22 = vpop.permute.xlu0 %3135  ;;  %v1937_v4 = vadd.f32 %v5712_v8, %v1936_v49  ;;  %2005 = vmatmul.f32.vlgmr.msrb.gmra.mxu2 %v5452_v32  ;;  %2040 = vmatmul.f32.vlgmr.msrb.gmra.mxu3 %v5455_v26  ;;  %v1971_v52 = vpop.f32.mrf.mxu3  ;;  %v3142_v5 = vunpack.i.l.bf16 %v3141_v23  ;;  %v1521_v32 = vrot.slane %v5225_v62, 4  ;;  %v3143_v31 = vunpack.i.h.bf16 %v3141_v23 }
 0x307   :  { %v3137_v1 = vunpack.i.l.bf16 %v3136_v22  ;;  %v3138_v45 = vunpack.i.h.bf16 %v3136_v22  ;;  %v1786_v27 = vsel %vm1543_vm12, %v1783_v51, %v3108_v47 }
 0x308   :  { %v5723_v10 = vadd.f32 %v1971_v52, %v1937_v4  ;;  %v1522_v42 = vsel %vm6814_vm5, %v1446_v40, %v1521_v32  ;;  %v1789_v36 = vsel %vm6833_vm4, %v1786_v27, %v3113_v37  ;;  %vm6838_vm5 = vmmov %vm6835_vm2 }
 0x309   :  { %v1785_v26 = vsel %vm1543_vm12, %v1782_v60, %v3137_v1  ;;  %v1565_v30 = vsel %vm1539_vm6, %v1522_v42, %v3133_v17  ;;  %v1821_v12 = vrot.slane %v1789_v36, 7  ;;  %v3151_v22 = vpop.permute.xlu2 %3150  ;;  %v2292_v36 = vld [vmem:[%s6379_s5 + $0x70] sm:$0xff] }
 0x30a   :  { %v1788_v62 = vsel %vm6826_vm8, %v1785_v26, %v3142_v5  ;;  %v1566_v28 = vsel %vm1543_vm12, %v1565_v30, %v3138_v45  ;;  %v3153_v6 = vunpack.i.h.bf16 %v3151_v22  ;;  %v3152_v4 = vunpack.i.l.bf16 %v3151_v22  ;;  %vm6837_vm8 = vmmov %vm6778_vm0  ;;  %v2290_v22 = vld [vmem:[%s6379_s5 + $0x60] sm:$0xff] }
 0x30b   :  { %v1808_v18 = vrot.slane %v1788_v62, 7  ;;  %v1567_v57 = vsel %vm6778_vm0, %v1566_v28, %v3143_v31  ;;  %v1822_v47 = vsel %vm6835_vm2, %v5670_v2, %v1821_v12 }
 0x30c   :  { %v1784_v20 = vsel %vm1539_vm6, %v1718_v11, %v3153_v6 }
 0x30d   :  { %v1850_v40 = vsel %vm6829_vm13, %v1567_v57, %v1808_v18  ;;  %v1712_v3 = vpop.permute.xlu1 %1711  ;;  %v1816_v46 = vsel %vm6820_vm3, %v1808_v18, %v5670_v2  ;;  %v1939_v25 = vpop.f32.mrf.mxu2  ;;  %v1776_v2 = vsel %vm1539_vm6, %v5403_v53, %v3152_v4  ;;  %vm6840_vm6 = vcmask 1046528  }
 0x30e   :  { %2008 = vmatmul.f32.gmra.mxu2 %v1563_v39  ;;  %2043 = vmatmul.f32.gmra.mxu3 %v5605_v29  ;;  %v1564_v29 = vsel %vm6827_vm10, %v1562_v15, %v3128_v43  ;;  %v1702_v50 = vpop.permute.xlu0 %1701  ;;  %v1974_v48 = vpop.f32.mrf.mxu3  ;;  %vm6839_vm10 = vmmov %vm6835_vm2  ;;  %v1940_v31 = vadd.f32 %v5712_v8, %v1939_v25  ;;  %vm6843_vm13 = vcmask 1042432  }
 0x30f   :  { %v1849_v44 = vsel %vm6828_vm1, %v1564_v29, %v1807_v19  ;;  %v1777_v63 = vsel %vm1543_vm12, %v1775_v24, %v1702_v50  ;;  %vm6841_vm0 = vmmov %vm6840_vm6  ;;  %vm6842_vm1 = vcmask 1044480  }
 0x310   :  { %v1780_v61 = vsel %vm6832_vm15, %v1777_v63, %v1712_v3  ;;  %v1975_v14 = vadd.f32 %v1974_v48, %v1940_v31  ;;  %vm6845_vm14 = vmmov %vm6841_vm0 }
 0x311   :  { %v1819_v56 = vrot.slane %v1780_v61, 7  ;;  %vm6846_vm3 = vmmov %vm6842_vm1 }
 0x312   :  { %vm6847_vm15 = vmmov %vm6835_vm2 }
 0x313   :  { %v1820_v0 = vsel %vm6834_vm9, %v5668_v9, %v1819_v56  ;;  %vm6848_vm4 = vmmov %vm6843_vm13 }
 0x314   :  { %vm6849_vm9 = vmmov %vm6842_vm1 }
 0x316   :  { %2011 = vmatmul.f32.gmra.mxu2 %v1849_v44  ;;  %2046 = vmatmul.f32.gmra.mxu3 %v1850_v40 }
 0x31e   :  { %2014 = vmatmul.f32.gmra.mxu2 %v1814_v7  ;;  %2049 = vmatmul.f32.gmra.mxu3 %v1816_v46 }
 0x326   :  { %2017 = vmatmul.f32.gmra.mxu2 %v1820_v0  ;;  %2052 = vmatmul.f32.gmra.mxu3 %v1822_v47  ;;  %v2291_v0 = vld [vmem:[%s6379_s5 + $0x68] sm:$0xff]  ;;  %v2308_v47 = vld [vmem:[%s6379_s5 + $0xf0] sm:$0xff] }
 0x35d   :  { %v1942_v49 = vpop.f32.mrf.mxu2 }
 0x35e   :  { %v1943_v19 = vadd.f32 %v5712_v8, %v1942_v49 }
 0x365   :  { %v1977_v35 = vpop.f32.mrf.mxu3 }
 0x366   :  { %v1978_v29 = vadd.f32 %v1977_v35, %v1943_v19  ;;  %v2285_v19 = vld [vmem:[%s6379_s5 + $0x38] sm:$0xff] }
 0x36d   :  { %v1945_v38 = vpop.f32.mrf.mxu2  ;;  %v1980_v54 = vpop.f32.mrf.mxu3 }
 0x36e   :  { %v1946_v34 = vadd.f32 %v5712_v8, %v1945_v38  ;;  %v2307_v38 = vld [vmem:[%s6379_s5 + $0xe8] sm:$0xff] }
 0x370   :  { %v1981_v16 = vadd.f32 %v1980_v54, %v1946_v34 }
 0x376   :  { %v3161_v37 = vpop.permute.xlu1 %3160  ;;  %v3156_v23 = vpop.permute.xlu0 %3155 }
 0x377   :  { %v3163_v1 = vunpack.i.h.bf16 %v3161_v37  ;;  %v3162_v52 = vunpack.i.l.bf16 %v3161_v37  ;;  %v3158_v21 = vunpack.i.h.bf16 %v3156_v23  ;;  %v3157_v9 = vunpack.i.l.bf16 %v3156_v23  ;;  %v2306_v23 = vld [vmem:[%s6379_s5 + $0xe0] sm:$0xff] }
 0x379   :  { %v1948_v60 = vpop.f32.mrf.mxu2  ;;  %v1983_v59 = vpop.f32.mrf.mxu3  ;;  %v1778_v5 = vsel %vm1543_vm12, %v1776_v2, %v3157_v9  ;;  %v1787_v41 = vsel %vm1543_vm12, %v1784_v20, %v3158_v21  ;;  %v2289_v21 = vld [vmem:[%s6379_s5 + $0x58] sm:$0xff] }
 0x37a   :  { %v1781_v32 = vsel %vm6836_vm7, %v1778_v5, %v3162_v52  ;;  %v1790_v33 = vsel %vm6837_vm8, %v1787_v41, %v3163_v1  ;;  %v1949_v27 = vadd.f32 %v5712_v8, %v1948_v60  ;;  %v2305_v60 = vld [vmem:[%s6379_s5 + $0xd8] sm:$0xff]  ;;  %v2288_v5 = vld [vmem:[%s6379_s5 + $0x50] sm:$0xff]  ;;  %vm6850_vm7 = vmmov %vm6848_vm4 }
 0x37b   :  { %v1827_v26 = vrot.slane %v1781_v32, 7  ;;  %v1829_v17 = vrot.slane %v1790_v33, 7  ;;  %vm6851_vm8 = vmmov %vm6835_vm2 }
 0x37c   :  { %v1984_v48 = vadd.f32 %v1983_v59, %v1949_v27 }
 0x37d   :  { %v1828_v45 = vsel %vm6838_vm5, %v1819_v56, %v1827_v26  ;;  %v1830_v39 = vsel %vm6839_vm10, %v1821_v12, %v1829_v17  ;;  %v2304_v26 = vld [vmem:[%s6379_s5 + $0xd0] sm:$0xff]  ;;  %vm6852_vm5 = vmmov %vm6848_vm4  ;;  %vm6853_vm10 = vcmask 1045504  }
 0x37e   :  { %2020 = vmatmul.f32.gmra.mxu2 %v1828_v45  ;;  %2055 = vmatmul.f32.gmra.mxu3 %v1830_v39  ;;  %v2287_v45 = vld [vmem:[%s6379_s5 + $0x48] sm:$0xff] }
 0x381   :  { %v1951_v58 = vpop.f32.mrf.mxu2  ;;  %v1986_v53 = vpop.f32.mrf.mxu3 }
 0x382   :  { %v1952_v43 = vadd.f32 %v5712_v8, %v1951_v58  ;;  %v2309_v8 = vld [vmem:[%s6379_s5 + $0xf8] sm:$0xff] }
 0x383   :  { %2375 = vmatpush.msrb.mxu0 %v2309_v8  ;;  %v2282_v8 = vld [vmem:[%s6379_s5 + $0x20] sm:$0xff] }
 0x384   :  { %v5783_v55 = vadd.f32 %v1986_v53, %v1952_v43  ;;  %v2303_v43 = vld [vmem:[%s6379_s5 + $0xc8] sm:$0xff] }
 0x385   :  { %2376 = vmatpush.msrb.mxu0 %v2308_v47  ;;  %v2281_v47 = vld [vmem:[%s6379_s5 + $0x18] sm:$0xff] }
 0x387   :  { %2377 = vmatpush.msrb.mxu0 %v2307_v38  ;;  %v2299_v38 = vld [vmem:[%s6379_s5 + $0xa8] sm:$0xff] }
 0x389   :  { %v2006_v62 = vpop.f32.mrf.mxu2  ;;  %v2041_v42 = vpop.f32.mrf.mxu3  ;;  %2378 = vmatpush.msrb.mxu0 %v2306_v23  ;;  %v2339_v23 = vld [vmem:[%s6379_s5 + $0x1e8] sm:$0xff] }
 0x38a   :  { %v2007_v57 = vadd.f32 %v2006_v62, %v5723_v10  ;;  %v2293_v10 = vld [vmem:[%s6379_s5 + $0x78] sm:$0xff] }
 0x38b   :  { %2346 = vmatpush.msrb.mxu1 %v2293_v10  ;;  %2379 = vmatpush.msrb.mxu0 %v2305_v60  ;;  %v2335_v60 = vld [vmem:[%s6379_s5 + $0x1c8] sm:$0xff] }
 0x38c   :  { %v2042_v13 = vadd.f32 %v2041_v42, %v2007_v57  ;;  %v2286_v42 = vld [vmem:[%s6379_s5 + $0x40] sm:$0xff] }
 0x38d   :  { %2347 = vmatpush.msrb.mxu1 %v2292_v36  ;;  %2380 = vmatpush.msrb.mxu0 %v2304_v26  ;;  %v2331_v26 = vld [vmem:[%s6379_s5 + $0x1a8] sm:$0xff] }
 0x38e   :  { %v5792_v7 = vmax.f32 %v2042_v13, 0.0 }
 0x38f   :  { %2348 = vmatpush.msrb.mxu1 %v2291_v0  ;;  %2381 = vmatpush.msrb.mxu0 %v2303_v43  ;;  %v2302_v0 = vld [vmem:[%s6379_s5 + $0xc0] sm:$0xff]  ;;  %v2328_v43 = vld [vmem:[%s6379_s5 + $0x190] sm:$0xff] }
 0x390   :  { %v2067_v25 = vrot.slane %v5792_v7, 1  ;;  %v2084_v32 = vrot.slane %v5792_v7, 3  ;;  %v2102_v33 = vrot.slane %v5792_v7, 5  ;;  %v2120_v17 = vrot.slane %v5792_v7, 7 }
 0x391   :  { %v2009_v15 = vpop.f32.mrf.mxu2  ;;  %v2044_v30 = vpop.f32.mrf.mxu3  ;;  %2349 = vmatpush.msrb.mxu1 %v2290_v22  ;;  %2382 = vmatpush.msrb.mxu0 %v2302_v0  ;;  %v2298_v22 = vld [vmem:[%s6379_s5 + $0xa0] sm:$0xff]  ;;  %v2317_v0 = vld [vmem:[%s6379_s5 + $0x138] sm:$0xff] }
 0x392   :  { %v2010_v11 = vadd.f32 %v2009_v15, %v1975_v14 }
 0x393   :  { %2350 = vmatpush.msrb.mxu1 %v2289_v21  ;;  %v2295_v21 = vld [vmem:[%s6379_s5 + $0x88] sm:$0xff] }
 0x394   :  { %v2045_v40 = vadd.f32 %v2044_v30, %v2010_v11 }
 0x395   :  { %2351 = vmatpush.msrb.mxu1 %v2288_v5  ;;  %v2333_v5 = vld [vmem:[%s6379_s5 + $0x1b8] sm:$0xff] }
 0x396   :  { %v5789_v3 = vmax.f32 %v2045_v40, 0.0  ;;  %v2283_v40 = vld [vmem:[%s6379_s5 + $0x28] sm:$0xff] }
 0x397   :  { %2352 = vmatpush.msrb.mxu1 %v2287_v45 }
 0x398   :  { %v2068_v12 = vrot.slane %v5789_v3, 1  ;;  %v2085_v20 = vrot.slane %v5789_v3, 3  ;;  %v2103_v2 = vrot.slane %v5789_v3, 5  ;;  %v2121_v59 = vrot.slane %v5789_v3, 7 }
 0x399   :  { %v2012_v28 = vpop.f32.mrf.mxu2  ;;  %v2047_v18 = vpop.f32.mrf.mxu3  ;;  %2353 = vmatpush.msrb.mxu1 %v2286_v42 }
 0x39a   :  { %v2013_v44 = vadd.f32 %v2012_v28, %v1978_v29  ;;  %v2069_v4 = vsel %vm6840_vm6, %v2067_v25, %v2068_v12  ;;  %v2086_v58 = vsel %vm6842_vm1, %v2084_v32, %v2085_v20  ;;  %v2104_v53 = vsel %vm6843_vm13, %v2102_v33, %v2103_v2  ;;  %v2280_v25 = vld [vmem:[%s6379_s5 + $0x10] sm:$0xff]  ;;  %v2325_v32 = vld [vmem:[%s6379_s5 + $0x178] sm:$0xff]  ;;  %vm6855_vm1 = vmmov %vm6853_vm10 }
 0x39b   :  { %v2122_v62 = vsel %vm6844_vm11, %v2120_v17, %v2121_v59  ;;  %v3179_v14 = vpack.i.bf16 %v2104_v53, %v2086_v58  ;;  %2354 = vmatpush.msrb.mxu1 %v2285_v19  ;;  %v2332_v33 = vld [vmem:[%s6379_s5 + $0x1b0] sm:$0xff]  ;;  %v2330_v17 = vld [vmem:[%s6379_s5 + $0x1a0] sm:$0xff]  ;;  %v2323_v19 = vld [vmem:[%s6379_s5 + $0x168] sm:$0xff]  ;;  %vm6854_vm6 = vcmask 1041408  }
 0x39c   :  { %v2048_v51 = vadd.f32 %v2047_v18, %v2013_v44  ;;  %v2284_v18 = vld [vmem:[%s6379_s5 + $0x30] sm:$0xff]  ;;  %vm6856_vm13 = vmmov %vm6835_vm2 }
 0x39d   :  { %2355 = vmatpush.msrb.mxu1 %v2284_v18  ;;  %vm6857_vm11 = vmmov %vm6854_vm6 }
 0x39e   :  { %v5794_v46 = vmax.f32 %v2048_v51, 0.0 }
 0x39f   :  { %2356 = vmatpush.msrb.mxu1 %v2283_v40 }
 0x3a0   :  { %v2141_v35 = vrot.slane %v5794_v46, 1  ;;  %v2087_v28 = vrot.slane %v5794_v46, 3  ;;  %v2123_v11 = vrot.slane %v5794_v46, 7  ;;  %v2105_v34 = vrot.slane %v5794_v46, 5 }
 0x3a1   :  { %v2015_v50 = vpop.f32.mrf.mxu2  ;;  %v2050_v24 = vpop.f32.mrf.mxu3  ;;  %2357 = vmatpush.msrb.mxu1 %v2282_v8  ;;  %v2318_v8 = vld [vmem:[%s6379_s5 + $0x140] sm:$0xff] }
 0x3a2   :  { %v2016_v63 = vadd.f32 %v2015_v50, %v1981_v16  ;;  %v2088_v16 = vsel %vm6846_vm3, %v2085_v20, %v2087_v28  ;;  %v2124_v51 = vsel %vm6847_vm15, %v2121_v59, %v2123_v11  ;;  %v2106_v50 = vsel %vm6848_vm4, %v2103_v2, %v2105_v34  ;;  %v2337_v20 = vld [vmem:[%s6379_s5 + $0x1d8] sm:$0xff]  ;;  %v2336_v2 = vld [vmem:[%s6379_s5 + $0x1d0] sm:$0xff]  ;;  %v2334_v59 = vld [vmem:[%s6379_s5 + $0x1c0] sm:$0xff] }
 0x3a3   :  { %2358 = vmatpush.msrb.mxu1 %v2281_v47  ;;  %v2326_v28 = vld [vmem:[%s6379_s5 + $0x180] sm:$0xff]  ;;  %v2316_v47 = vld [vmem:[%s6379_s5 + $0x130] sm:$0xff]  ;;  %vm6859_vm3 = vmmov %vm6841_vm0 }
 0x3a4   :  { %v2051_v61 = vadd.f32 %v2050_v24, %v2016_v63  ;;  %v2322_v34 = vld [vmem:[%s6379_s5 + $0x160] sm:$0xff]  ;;  %vm6860_vm15 = vmmov %vm6855_vm1 }
 0x3a5   :  { %2359 = vmatpush.msrb.mxu1 %v2280_v25  ;;  %v2314_v25 = vld [vmem:[%s6379_s5 + $0x120] sm:$0xff]  ;;  %vm6861_vm4 = vmmov %vm6854_vm6 }
 0x3a6   :  { %v5802_v56 = vmax.f32 %v2051_v61, 0.0 }
 0x3a8   :  { %v2142_v49 = vrot.slane %v5802_v56, 1  ;;  %v2161_v29 = vrot.slane %v5802_v56, 3  ;;  %v2204_v57 = vrot.slane %v5802_v56, 7  ;;  %v2182_v44 = vrot.slane %v5802_v56, 5 }
 0x3a9   :  { %v2018_v54 = vpop.f32.mrf.mxu2  ;;  %v2053_v1 = vpop.f32.mrf.mxu3 }
 0x3aa   :  { %v2019_v6 = vadd.f32 %v2018_v54, %v1984_v48  ;;  %v2143_v37 = vsel %vm6841_vm0, %v2141_v35, %v2142_v49  ;;  %v3189_v13 = vpack.i.bf16 %v2088_v16, %v2161_v29  ;;  %v3184_v24 = vpack.i.bf16 %v2124_v51, %v2204_v57  ;;  %v2301_v48 = vld [vmem:[%s6379_s5 + $0xb8] sm:$0xff]  ;;  %v2300_v35 = vld [vmem:[%s6379_s5 + $0xb0] sm:$0xff]  ;;  %v2278_v54 = vld [vmem:[%s6379_s5] sm:$0xff] }
 0x3ab   :  { %v3164_v52 = vpack.i.bf16 %v2143_v37, %v2069_v4  ;;  %v3194_v63 = vpack.i.bf16 %v2106_v50, %v2182_v44  ;;  %2383 = vmatpush.msrb.mxu0 %v2301_v48  ;;  %v2340_v4 = vld [vmem:[%s6379_s5 + $0x1f0] sm:$0xff]  ;;  %v2297_v37 = vld [vmem:[%s6379_s5 + $0x98] sm:$0xff]  ;;  %v2315_v48 = vld [vmem:[%s6379_s5 + $0x128] sm:$0xff] }
 0x3ac   :  { %v2054_v9 = vadd.f32 %v2053_v1, %v2019_v6  ;;  %v2341_v6 = vld [vmem:[%s6379_s5 + $0x1f8] sm:$0xff]  ;;  %v2296_v1 = vld [vmem:[%s6379_s5 + $0x90] sm:$0xff] }
 0x3ad   :  { %3165 = vrot.lane.b32.xlu2 %v3164_v52, %s3265_s14  ;;  %2384 = vmatpush.msrb.mxu0 %v2300_v35  ;;  %v2338_v52 = vld [vmem:[%s6379_s5 + $0x1e0] sm:$0xff]  ;;  %v2321_v50 = vld [vmem:[%s6379_s5 + $0x158] sm:$0xff] }
 0x3ae   :  { %v5841_v41 = vmax.f32 %v2054_v9, 0.0  ;;  %2433 = vmatpush.msra.mxu2 %v2341_v6  ;;  %v2294_v9 = vld [vmem:[%s6379_s5 + $0x80] sm:$0xff]  ;;  %v2313_v35 = vld [vmem:[%s6379_s5 + $0x118] sm:$0xff]  ;;  %v2114_v6 = vrot.slane %v5789_v3, 6 }
 0x3af   :  { %2385 = vmatpush.msrb.mxu0 %v2299_v38  ;;  %v2311_v38 = vld [vmem:[%s6379_s5 + $0x108] sm:$0xff] }
 0x3b0   :  { %v2144_v39 = vrot.slane %v5841_v41, 1  ;;  %v2162_v27 = vrot.slane %v5841_v41, 3  ;;  %v2205_v61 = vrot.slane %v5841_v41, 7  ;;  %2434 = vmatpush.msra.mxu2 %v2340_v4 }
 0x3b1   :  { %2386 = vmatpush.msrb.mxu0 %v2298_v22  ;;  %v2310_v22 = vld [vmem:[%s6379_s5 + $0x100] sm:$0xff] }
 0x3b2   :  { %v3174_v15 = vpack.i.bf16 %v2122_v62, %v2144_v39  ;;  %v2145_v30 = vsel %vm6845_vm14, %v2142_v49, %v2144_v39  ;;  %v2163_v10 = vsel %vm6849_vm9, %v2161_v29, %v2162_v27  ;;  %v2206_v36 = vsel %vm6835_vm2, %v2204_v57, %v2205_v61  ;;  %v2279_v49 = vld [vmem:[%s6379_s5 + $0x8] sm:$0xff]  ;;  %2435 = vmatpush.msra.mxu2 %v2339_v23  ;;  %v2329_v39 = vld [vmem:[%s6379_s5 + $0x198] sm:$0xff]  ;;  %vm6858_vm14 = vmmov %vm6841_vm0 }
 0x3b3   :  { %v3169_v31 = vpack.i.bf16 %v2145_v30, %v2068_v12  ;;  %v3199_v12 = vpack.i.bf16 %v2163_v10, %v2206_v36  ;;  %2360 = vmatpush.msrb.mxu1 %v2279_v49  ;;  %2387 = vmatpush.msrb.mxu0 %v2297_v37  ;;  %v2183_v30 = vrot.slane %v5841_v41, 5  ;;  %v2319_v10 = vld [vmem:[%s6379_s5 + $0x148] sm:$0xff]  ;;  %v2312_v49 = vld [vmem:[%s6379_s5 + $0x110] sm:$0xff]  ;;  %v2113_v37 = vrot.slane %v5792_v7, 6  ;;  %vm6862_vm9 = vmmov %vm6835_vm2 }
 0x3b4   :  { %3175 = vrot.lane.b32.xlu1 %v3174_v15, %s3265_s14  ;;  %2436 = vmatpush.msra.mxu2 %v2338_v52 }
 0x3b5   :  { %3170 = vrot.lane.b32.xlu0 %v3169_v31, %s3265_s14  ;;  %3180 = vrot.lane.b32.xlu2 %v3179_v14, %s3265_s14  ;;  %v2324_v31 = vld [vmem:[%s6379_s5 + $0x170] sm:$0xff]  ;;  %v2184_v57 = vsel %vm6850_vm7, %v2182_v44, %v2183_v30  ;;  %vm6863_vm7 = vmmov %vm6835_vm2 }
 0x3b6   :  { %2361 = vmatpush.msrb.mxu1 %v2278_v54  ;;  %2388 = vmatpush.msrb.mxu0 %v2296_v1 }
 0x3b7   :  { %2437 = vmatpush.msra.mxu2 %v2337_v20  ;;  %v2115_v20 = vsel %vm6854_vm6, %v2113_v37, %v2114_v6  ;;  %v2174_v37 = vrot.slane %v5802_v56, 4  ;;  %vm6867_vm6 = vmmov %vm6835_vm2 }
 0x3b8   :  { %2389 = vmatpush.msrb.mxu0 %v2295_v21  ;;  %2404 = vmatpush.msra.mxu1 %v2325_v32 }
 0x3b9   :  { %2438 = vmatpush.msra.mxu2 %v2336_v2 }
 0x3ba   :  { %2390 = vmatpush.msrb.mxu0 %v2294_v9  ;;  %2405 = vmatpush.msra.mxu1 %v2324_v31  ;;  %v2196_v31 = vrot.slane %v5802_v56, 6 }
 0x3bb   :  { %2439 = vmatpush.msra.mxu2 %v2335_v60 }
 0x3bc   :  { %3190 = vrot.lane.b32.xlu1 %v3189_v13, %s3265_s14  ;;  %2406 = vmatpush.msra.mxu1 %v2323_v19 }
 0x3bd   :  { %3185 = vrot.lane.b32.xlu0 %v3184_v24, %s3265_s14  ;;  %3195 = vrot.lane.b32.xlu2 %v3194_v63, %s3265_s14  ;;  %v2078_v24 = vrot.slane %v5789_v3, 2  ;;  %v2077_v63 = vrot.slane %v5792_v7, 2 }
 0x3be   :  { %2440 = vmatpush.msra.mxu2 %v2334_v59  ;;  %2407 = vmatpush.msra.mxu1 %v2322_v34 }
 0x3bf   :  { %v2079_v36 = vsel %vm6853_vm10, %v2077_v63, %v2078_v24  ;;  %vm6866_vm10 = vmmov %vm6841_vm0 }
 0x3c0   :  { %2441 = vmatpush.msra.mxu2 %v2333_v5  ;;  %2408 = vmatpush.msra.mxu1 %v2321_v50  ;;  %v2197_v50 = vrot.slane %v5841_v41, 6 }
 0x3c2   :  { %2442 = vmatpush.msra.mxu2 %v2332_v33 }
 0x3c4   :  { %2443 = vmatpush.msra.mxu2 %v2331_v26  ;;  %v2080_v26 = vrot.slane %v5794_v46, 2 }
 0x3c5   :  { %3200 = vrot.lane.b32.xlu0 %v3199_v12, %s3265_s14 }
 0x3c6   :  { %2444 = vmatpush.msra.mxu2 %v2330_v17  ;;  %v2116_v17 = vrot.slane %v5794_v46, 6 }
 0x3c8   :  { %2445 = vmatpush.msra.mxu2 %v2329_v39 }
 0x3ca   :  { %2446 = vmatpush.msra.mxu2 %v2328_v43  ;;  %v2155_v43 = vrot.slane %v5802_v56, 2 }
 0x401   :  { %v2021_v45 = vpop.f32.mrf.mxu2  ;;  %v2056_v53 = vpop.f32.mrf.mxu3 }
 0x402   :  { %v2022_v58 = vadd.f32 %v2021_v45, %v5783_v55  ;;  %v2327_v55 = vld [vmem:[%s6379_s5 + $0x188] sm:$0xff] }
 0x403   :  { %2447 = vmatpush.msra.mxu2 %v2327_v55 }
 0x404   :  { %v2057_v62 = vadd.f32 %v2056_v53, %v2022_v58 }
 0x405   :  { %2448 = vmatpush.msra.mxu2 %v2326_v28 }
 0x406   :  { %v5986_v42 = vmax.f32 %v2057_v62, 0.0 }
 0x407   :  { %v3166_v15 = vpop.permute.xlu2 %3165 }
 0x408   :  { %v3167_v14 = vunpack.i.l.bf16 %v3166_v15  ;;  %v2185_v18 = vrot.slane %v5986_v42, 5  ;;  %v2207_v29 = vrot.slane %v5986_v42, 7  ;;  %v3168_v54 = vunpack.i.h.bf16 %v3166_v15 }
 0x40a   :  { %v2131_v11 = vsel %vm1543_vm12, %v5792_v7, %v3167_v14  ;;  %v2208_v40 = vsel %vm6851_vm8, %v2205_v61, %v2207_v29  ;;  %v2186_v16 = vsel %vm6852_vm5, %v2183_v30, %v2185_v18  ;;  %v2218_v23 = vsel %vm1543_vm12, %v5794_v46, %v3168_v54 }
 0x40b   :  { %2362 = vmatmul.f32.vlgmr.msrb.gmra.mxu1 %v2131_v11  ;;  %v3204_v13 = vpack.i.bf16 %v2208_v40, %v2184_v57  ;;  %v3209_v51 = vpack.i.bf16 %v2186_v16, %v2162_v27  ;;  %v2320_v27 = vld [vmem:[%s6379_s5 + $0x150] sm:$0xff]  ;;  %v2242_v60 = vrot.slane %v2218_v23, 7  ;;  %v2081_v14 = vsel %vm6855_vm1, %v2078_v24, %v2080_v26  ;;  %vm6869_vm1 = vmmov %vm6861_vm4 }
 0x40c   :  { %2409 = vmatpush.msra.mxu1 %v2320_v27  ;;  %v2117_v11 = vsel %vm6857_vm11, %v2114_v6, %v2116_v17  ;;  %v2095_v6 = vrot.slane %v5792_v7, 4  ;;  %vm6864_vm8 = vcmask 1043456   ;;  %vm6871_vm11 = vmmov %vm6835_vm2 }
 0x40d   :  { %3205 = vrot.lane.b32.xlu1 %v3204_v13, %s3265_s14  ;;  %3210 = vrot.lane.b32.xlu2 %v3209_v51, %s3265_s14  ;;  %v2156_v51 = vrot.slane %v5841_v41, 2  ;;  %vm6865_vm5 = vmmov %vm6864_vm8 }
 0x40e   :  { %2410 = vmatpush.msra.mxu1 %v2319_v10 }
 0x40f   :  { %v6023_v44 = vpop.permute.xlu2 %3180  ;;  %v2157_v10 = vsel %vm6860_vm15, %v2155_v43, %v2156_v51  ;;  %vm6874_vm15 = vcmask 785408  }
 0x410   :  { %v3182_v61 = vunpack.i.l.bf16 %v6023_v44  ;;  %2411 = vmatpush.msra.mxu1 %v2318_v8  ;;  %v3183_v54 = vunpack.i.h.bf16 %v6023_v44 }
 0x412   :  { %v2133_v12 = vsel %vm1543_vm12, %v2079_v36, %v3182_v61  ;;  %2412 = vmatpush.msra.mxu1 %v2317_v0  ;;  %v2198_v36 = vsel %vm6861_vm4, %v2196_v31, %v2197_v50  ;;  %vm2476_vm4 = vcmask 785415  }
 0x413   :  { %2391 = vmatmul.f32.vlgmr.msrb.gmra.mxu0 %v2133_v12 }
 0x414   :  { %2413 = vmatpush.msra.mxu1 %v2316_v47 }
 0x416   :  { %2414 = vmatpush.msra.mxu1 %v2315_v48 }
 0x418   :  { %2415 = vmatpush.msra.mxu1 %v2314_v25  ;;  %v3196_v25 = vpop.permute.xlu2 %3195 }
 0x41a   :  { %2416 = vmatpush.msra.mxu1 %v2313_v35 }
 0x41c   :  { %2417 = vmatpush.msra.mxu1 %v2312_v49 }
 0x41e   :  { %2418 = vmatpush.msra.mxu1 %v2311_v38  ;;  %v2096_v38 = vrot.slane %v5789_v3, 4 }
 0x420   :  { %2419 = vmatpush.msra.mxu1 %v2310_v22  ;;  %v3197_v22 = vunpack.i.l.bf16 %v3196_v25 }
 0x426   :  { %v3176_v4 = vpop.permute.xlu1 %3175 }
 0x427   :  { %v3178_v1 = vunpack.i.h.bf16 %v3176_v4  ;;  %v3171_v52 = vpop.permute.xlu0 %3170  ;;  %v3177_v62 = vunpack.i.l.bf16 %v3176_v4  ;;  %v2097_v4 = vsel %vm6864_vm8, %v2095_v6, %v2096_v38  ;;  %v2501_v6 = vld [vmem:[%s6381_s7 + $0x58] sm:$0xff] }
 0x428   :  { %v3173_v21 = vunpack.i.h.bf16 %v3171_v52  ;;  %v3172_v9 = vunpack.i.l.bf16 %v3171_v52  ;;  %v2135_v23 = vsel %vm1543_vm12, %v2097_v4, %v3183_v54  ;;  %v2098_v52 = vrot.slane %v5794_v46, 4  ;;  %v2503_v54 = vld [vmem:[%s6381_s7 + $0x68] sm:$0xff] }
 0x429   :  { %v2137_v2 = vsel %vm1543_vm12, %v2115_v20, %v3178_v1  ;;  %v2220_v16 = vsel %vm1543_vm12, %v5841_v41, %v3177_v62  ;;  %v2224_v1 = vsel %vm1543_vm12, %v2174_v37, %v3197_v22  ;;  %v2175_v46 = vrot.slane %v5841_v41, 4 }
 0x42a   :  { %2449 = vmatmul.f32.vlgmr.msra.gmra.mxu2 %v2137_v2  ;;  %v2132_v59 = vsel %vm1543_vm12, %v5789_v3, %v3172_v9  ;;  %v2219_v32 = vsel %vm1543_vm12, %v5802_v56, %v3173_v21  ;;  %v2254_v63 = vrot.slane %v2220_v16, 7  ;;  %v3198_v21 = vunpack.i.h.bf16 %v3196_v25 }
 0x42b   :  { %v2274_v5 = vsel %vm6841_vm0, %v2132_v59, %v2242_v60  ;;  %v2246_v53 = vrot.slane %v2219_v32, 7  ;;  %v2244_v9 = vrot.slane %v2224_v1, 7  ;;  %v2099_v3 = vsel %vm6865_vm5, %v2096_v38, %v2098_v52  ;;  %vm6868_vm0 = vmmov %vm6865_vm5  ;;  %v2499_v1 = vld [vmem:[%s6381_s7 + $0x48] sm:$0xff]  ;;  %v2496_v52 = vld [vmem:[%s6381_s7 + $0x30] sm:$0xff] }
 0x42c   :  { %2365 = vmatmul.f32.gmra.mxu1 %v2274_v5  ;;  %v2136_v44 = vsel %vm1543_vm12, %v2099_v3, %v3198_v21  ;;  %v2199_v5 = vrot.slane %v5986_v42, 6  ;;  %v2176_v17 = vsel %vm6868_vm0, %v2174_v37, %v2175_v46  ;;  %v2497_v3 = vld [vmem:[%s6381_s7 + $0x38] sm:$0xff] }
 0x42d   :  { %v2247_v18 = vsel %vm6856_vm13, %v2242_v60, %v2246_v53  ;;  %v2255_v0 = vsel %vm6862_vm9, %v2246_v53, %v2254_v63  ;;  %v2276_v20 = vsel %vm6866_vm10, %v2136_v44, %v2244_v9  ;;  %v2177_v53 = vrot.slane %v5986_v42, 4  ;;  %vm6870_vm13 = vmmov %vm6835_vm2  ;;  %v2512_v42 = vld [vmem:[%s6381_s7 + $0xb0] sm:$0xff]  ;;  %v2511_v63 = vld [vmem:[%s6381_s7 + $0xa8] sm:$0xff] }
 0x42e   :  { %v3191_v33 = vpop.permute.xlu1 %3190  ;;  %2527 = vmatpush.msra.mxu3 %v2512_v42  ;;  %v2495_v44 = vld [vmem:[%s6381_s7 + $0x28] sm:$0xff]  ;;  %v2592_v42 = vld [vmem:[%s6383_s9 + $0xd8] sm:$0xff]  ;;  %vm6875_vm9 = vmmov %vm6874_vm15  ;;  %vm2682_vm10 = vcmask 402432  }
 0x42f   :  { %v3193_v45 = vunpack.i.h.bf16 %v3191_v33  ;;  %v3192_v39 = vunpack.i.l.bf16 %v3191_v33  ;;  %v3186_v58 = vpop.permute.xlu0 %3185  ;;  %vm6877_vm8 = vmmov %vm6875_vm9 }
 0x430   :  { %v3188_v15 = vunpack.i.h.bf16 %v3186_v58  ;;  %v3187_v30 = vunpack.i.l.bf16 %v3186_v58  ;;  %vm6878_vm5 = vmmov %vm6877_vm8 }
 0x431   :  { %v2221_v55 = vsel %vm1543_vm12, %v2155_v43, %v3192_v39  ;;  %v2134_v29 = vsel %vm1543_vm12, %v2081_v14, %v3193_v45  ;;  %v2200_v45 = vsel %vm6869_vm1, %v2197_v50, %v2199_v5  ;;  %v2513_v50 = vld [vmem:[%s6381_s7 + $0xb8] sm:$0xff] }
 0x432   :  { %v2243_v19 = vrot.slane %v2221_v55, 7  ;;  %v2227_v28 = vsel %vm1543_vm12, %v2196_v31, %v3187_v30  ;;  %v2138_v40 = vsel %vm1543_vm12, %v2117_v11, %v3188_v15  ;;  %v2508_v11 = vld [vmem:[%s6381_s7 + $0x90] sm:$0xff]  ;;  %2547 = vmatpush.msra.mxu0 %v2513_v50  ;;  %v2590_v50 = vld [vmem:[%s6383_s9 + $0xc8] sm:$0xff] }
 0x433   :  { %v2245_v34 = vrot.slane %v2227_v28, 7 }
 0x434   :  { %2368 = vmatmul.f32.gmra.mxu1 %v2247_v18  ;;  %v2275_v57 = vsel %vm6858_vm14, %v2134_v29, %v2243_v19  ;;  %vm6872_vm14 = vmmov %vm6868_vm0  ;;  %v2510_v18 = vld [vmem:[%s6381_s7 + $0xa0] sm:$0xff]  ;;  %2548 = vmatpush.msra.mxu0 %v2511_v63 }
 0x435   :  { %2394 = vmatmul.f32.gmra.mxu0 %v2275_v57  ;;  %v2277_v13 = vsel %vm6859_vm3, %v2138_v40, %v2245_v34  ;;  %v2178_v31 = vsel %vm6872_vm14, %v2175_v46, %v2177_v53  ;;  %vm6873_vm3 = vmmov %vm6835_vm2  ;;  %2528 = vmatpush.msra.mxu3 %v2510_v18  ;;  %v2504_v57 = vld [vmem:[%s6381_s7 + $0x70] sm:$0xff]  ;;  %v2490_v46 = vld [vmem:[%s6381_s7] sm:$0xff] }
 0x436   :  { %2452 = vmatmul.f32.gmra.mxu2 %v2277_v13  ;;  %v2576_v18 = vld [vmem:[%s6383_s9 + $0x58] sm:$0xff] }
 0x437   :  { %v3201_v24 = vpop.permute.xlu0 %3200  ;;  %2529 = vmatpush.msra.mxu3 %v2508_v11 }
 0x438   :  { %v3203_v27 = vunpack.i.h.bf16 %v3201_v24  ;;  %v3202_v61 = vunpack.i.l.bf16 %v3201_v24  ;;  %v2502_v24 = vld [vmem:[%s6381_s7 + $0x60] sm:$0xff] }
 0x43a   :  { %v2222_v12 = vsel %vm1543_vm12, %v2157_v10, %v3203_v27  ;;  %v2228_v8 = vsel %vm1543_vm12, %v2198_v36, %v3202_v61  ;;  %v2500_v27 = vld [vmem:[%s6381_s7 + $0x50] sm:$0xff]  ;;  %v2509_v61 = vld [vmem:[%s6381_s7 + $0x98] sm:$0xff]  ;;  %v6161_v10 = vld [vmem:[%s6380_s6] ss:$0 sm:$0xff]  ;;  %s2689_s6 = sshll.u32 %s3267_s0, 4  ;;  %s2690_s6 = int_to_ptr.vmem [resolvable:$true] %s2689_s6 }
 0x43b   :  { %v2248_v47 = vrot.slane %v2222_v12, 7  ;;  %v2252_v48 = vrot.slane %v2228_v8, 7  ;;  %2549 = vmatpush.msra.mxu0 %v2509_v61 }
 0x43c   :  { %2371 = vmatmul.f32.gmra.mxu1 %v2255_v0  ;;  %v2507_v0 = vld [vmem:[%s6381_s7 + $0x88] sm:$0xff] }
 0x43d   :  { %v2249_v35 = vsel %vm6835_vm2, %v2243_v19, %v2248_v47  ;;  %v2253_v49 = vsel %vm6863_vm7, %v2245_v34, %v2252_v48  ;;  %v2506_v34 = vld [vmem:[%s6381_s7 + $0x80] sm:$0xff]  ;;  %2550 = vmatpush.msra.mxu0 %v2507_v0  ;;  %vm2479_vm2 = vcmask 783360   ;;  %vm6876_vm7 = vmmov %vm6873_vm3 }
 0x43e   :  { %2397 = vmatmul.f32.gmra.mxu0 %v2249_v35  ;;  %2455 = vmatmul.f32.gmra.mxu2 %v2253_v49  ;;  %v2505_v35 = vld [vmem:[%s6381_s7 + $0x78] sm:$0xff] }
 0x43f   :  { %2530 = vmatpush.msra.mxu3 %v2506_v34  ;;  %2551 = vmatpush.msra.mxu0 %v2505_v35 }
 0x441   :  { %2531 = vmatpush.msra.mxu3 %v2504_v57  ;;  %2552 = vmatpush.msra.mxu0 %v2503_v54  ;;  %v2571_v54 = vld [vmem:[%s6383_s9 + $0x30] sm:$0xff] }
 0x443   :  { %2532 = vmatpush.msra.mxu3 %v2502_v24  ;;  %2553 = vmatpush.msra.mxu0 %v2501_v6  ;;  %v2574_v24 = vld [vmem:[%s6383_s9 + $0x48] sm:$0xff] }
 0x444   :  { %2420 = vmatmul.f32.vlgmr.msra.gmra.mxu1 %v2135_v23  ;;  %v2498_v23 = vld [vmem:[%s6381_s7 + $0x40] sm:$0xff]  ;;  %v2586_v6 = vld [vmem:[%s6383_s9 + $0xa8] sm:$0xff] }
 0x445   :  { %2533 = vmatpush.msra.mxu3 %v2500_v27  ;;  %2554 = vmatpush.msra.mxu0 %v2499_v1  ;;  %v2585_v1 = vld [vmem:[%s6383_s9 + $0xa0] sm:$0xff] }
 0x447   :  { %2534 = vmatpush.msra.mxu3 %v2498_v23  ;;  %2555 = vmatpush.msra.mxu0 %v2497_v3 }
 0x449   :  { %2535 = vmatpush.msra.mxu3 %v2496_v52  ;;  %2556 = vmatpush.msra.mxu0 %v2495_v44 }
 0x44c   :  { %2423 = vmatmul.f32.gmra.mxu1 %v2276_v20 }
 0x467   :  { %v3211_v7 = vpop.permute.xlu2 %3210 }
 0x468   :  { %v3212_v2 = vunpack.i.l.bf16 %v3211_v7  ;;  %v3213_v15 = vunpack.i.h.bf16 %v3211_v7 }
 0x46a   :  { %v2223_v56 = vsel %vm1543_vm12, %v2156_v51, %v3212_v2  ;;  %v2226_v55 = vsel %vm1543_vm12, %v2178_v31, %v3213_v15  ;;  %v2578_v15 = vld [vmem:[%s6383_s9 + $0x68] sm:$0xff] }
 0x46b   :  { %v2256_v60 = vrot.slane %v2223_v56, 7  ;;  %v2258_v14 = vrot.slane %v2226_v55, 7  ;;  %v2492_v56 = vld [vmem:[%s6381_s7 + $0x10] sm:$0xff] }
 0x46d   :  { %v2257_v59 = vsel %vm6867_vm6, %v2248_v47, %v2256_v60  ;;  %v2493_v60 = vld [vmem:[%s6381_s7 + $0x18] sm:$0xff] }
 0x46e   :  { %2400 = vmatmul.f32.gmra.mxu0 %v2257_v59 }
 0x46f   :  { %2557 = vmatpush.msra.mxu0 %v2493_v60  ;;  %v2569_v60 = vld [vmem:[%s6383_s9 + $0x20] sm:$0xff] }
 0x47f   :  { %v3206_v32 = vpop.permute.xlu1 %3205 }
 0x480   :  { %v3208_v33 = vunpack.i.h.bf16 %v3206_v32  ;;  %v3207_v26 = vunpack.i.l.bf16 %v3206_v32  ;;  %v2491_v32 = vld [vmem:[%s6381_s7 + $0x8] sm:$0xff] }
 0x481   :  { %2558 = vmatpush.msra.mxu0 %v2491_v32  ;;  %v2567_v32 = vld [vmem:[%s6383_s9 + $0x10] sm:$0xff] }
 0x482   :  { %v2229_v39 = vsel %vm1543_vm12, %v2200_v45, %v3208_v33  ;;  %v2225_v58 = vsel %vm1543_vm12, %v2176_v17, %v3207_v26  ;;  %vm2467_vm12 = vcmask 784384   ;;  %v2596_v33 = vld [vmem:[%s6383_s9 + $0xf8] sm:$0xff]  ;;  %v2595_v17 = vld [vmem:[%s6383_s9 + $0xf0] sm:$0xff] }
 0x483   :  { %v2250_v43 = vrot.slane %v2225_v58, 7  ;;  %v2260_v62 = vrot.slane %v2229_v39, 7  ;;  %v2580_v45 = vld [vmem:[%s6383_s9 + $0x78] sm:$0xff]  ;;  %v2579_v39 = vld [vmem:[%s6383_s9 + $0x70] sm:$0xff]  ;;  %2621 = vmatpush.msrb.mxu2 %v2596_v33  ;;  %v2566_v33 = vld [vmem:[%s6383_s9 + $0x8] sm:$0xff] }
 0x484   :  { %2601 = vmatpush.msrb.mxu1 %v2580_v45  ;;  %v2656_v45 = vld [vmem:[%s6385_s11 + $0x70] sm:$0xff] }
 0x485   :  { %v2251_v30 = vsel %vm6870_vm13, %v2244_v9, %v2250_v43  ;;  %v2261_v41 = vsel %vm6871_vm11, %v2252_v48, %v2260_v62  ;;  %v2259_v19 = vsel %vm6873_vm3, %v2250_v43, %v2258_v14  ;;  %v2494_v9 = vld [vmem:[%s6381_s7 + $0x20] sm:$0xff]  ;;  %v2594_v62 = vld [vmem:[%s6383_s9 + $0xe8] sm:$0xff]  ;;  %2622 = vmatpush.msrb.mxu2 %v2595_v17  ;;  %v2657_v17 = vld [vmem:[%s6385_s11 + $0x78] sm:$0xff] }
 0x486   :  { %2426 = vmatmul.f32.gmra.mxu1 %v2251_v30  ;;  %2458 = vmatmul.f32.gmra.mxu2 %v2261_v41  ;;  %v2593_v14 = vld [vmem:[%s6383_s9 + $0xe0] sm:$0xff] }
 0x487   :  { %2536 = vmatpush.msra.mxu3 %v2494_v9  ;;  %2602 = vmatpush.msrb.mxu1 %v2579_v39  ;;  %v2655_v39 = vld [vmem:[%s6385_s11 + $0x68] sm:$0xff] }
 0x488   :  { %v2363_v28 = vpop.f32.mrf.mxu1  ;;  %2623 = vmatpush.msrb.mxu2 %v2594_v62  ;;  %v2651_v62 = vld [vmem:[%s6385_s11 + $0x48] sm:$0xff] }
 0x489   :  { %v2364_v48 = vadd.f32 %v6161_v10, %v2363_v28  ;;  %2537 = vmatpush.msra.mxu3 %v2492_v56  ;;  %2603 = vmatpush.msrb.mxu1 %v2578_v15  ;;  %v2583_v56 = vld [vmem:[%s6383_s9 + $0x90] sm:$0xff]  ;;  %v2650_v15 = vld [vmem:[%s6385_s11 + $0x40] sm:$0xff] }
 0x48a   :  { %2624 = vmatpush.msrb.mxu2 %v2593_v14  ;;  %v2647_v14 = vld [vmem:[%s6385_s11 + $0x28] sm:$0xff] }
 0x48b   :  { %2538 = vmatpush.msra.mxu3 %v2490_v46  ;;  %v2581_v46 = vld [vmem:[%s6383_s9 + $0x80] sm:$0xff] }
 0x48c   :  { %2625 = vmatpush.msrb.mxu2 %v2592_v42 }
 0x48d   :  { %2662 = vmatpush.msrb.mxu3 %v2657_v17 }
 0x48e   :  { %2429 = vmatmul.f32.gmra.mxu1 %v2259_v19  ;;  %v2577_v19 = vld [vmem:[%s6383_s9 + $0x60] sm:$0xff] }
 0x48f   :  { %2604 = vmatpush.msrb.mxu1 %v2577_v19  ;;  %2663 = vmatpush.msrb.mxu3 %v2656_v45  ;;  %v2646_v19 = vld [vmem:[%s6385_s11 + $0x20] sm:$0xff] }
 0x490   :  { %v2392_v13 = vpop.f32.mrf.mxu0 }
 0x491   :  { %v2393_v49 = vadd.f32 %v2392_v13, %v2364_v48  ;;  %2605 = vmatpush.msrb.mxu1 %v2576_v18  ;;  %v2572_v48 = vld [vmem:[%s6383_s9 + $0x38] sm:$0xff]  ;;  %2664 = vmatpush.msrb.mxu3 %v2655_v39 }
 0x4a9   :  { %v2366_v29 = vpop.f32.mrf.mxu1 }
 0x4aa   :  { %v2367_v8 = vadd.f32 %v6161_v10, %v2366_v29 }
 0x4ad   :  { %v2450_v36 = vpop.f32.mrf.mxu2 }
 0x4b1   :  { %v2369_v40 = vpop.f32.mrf.mxu1 }
 0x4b2   :  { %v2395_v12 = vpop.f32.mrf.mxu0  ;;  %v2370_v7 = vadd.f32 %v6161_v10, %v2369_v40  ;;  %v2591_v40 = vld [vmem:[%s6383_s9 + $0xd0] sm:$0xff] }
 0x4b3   :  { %v2396_v25 = vadd.f32 %v2395_v12, %v2367_v8  ;;  %2626 = vmatpush.msrb.mxu2 %v2591_v40  ;;  %v2645_v40 = vld [vmem:[%s6385_s11 + $0x18] sm:$0xff] }
 0x4b5   :  { %2627 = vmatpush.msrb.mxu2 %v2590_v50  ;;  %v3217_v50 = vld [vmem:[%s6384_s10] ss:$0 sm:$0xff] }
 0x4b9   :  { %v6141_v16 = vpop.f32.mrf.mxu1  ;;  %v2453_v4 = vpop.f32.mrf.mxu2 }
 0x4ba   :  { %v2373_v28 = vadd.f32 %v6161_v10, %v6141_v16  ;;  %v2575_v16 = vld [vmem:[%s6383_s9 + $0x50] sm:$0xff]  ;;  %v2589_v10 = vld [vmem:[%s6383_s9 + $0xc0] sm:$0xff] }
 0x4bb   :  { %v2398_v20 = vpop.f32.mrf.mxu0  ;;  %2606 = vmatpush.msrb.mxu1 %v2575_v16  ;;  %2628 = vmatpush.msrb.mxu2 %v2589_v10  ;;  %v2644_v16 = vld [vmem:[%s6385_s11 + $0x10] sm:$0xff] }
 0x4bc   :  { %v2399_v59 = vadd.f32 %v2398_v20, %v2370_v7 }
 0x4bd   :  { %2607 = vmatpush.msrb.mxu1 %v2574_v24 }
 0x4c1   :  { %v2421_v51 = vpop.f32.mrf.mxu1  ;;  %v2456_v43 = vpop.f32.mrf.mxu2 }
 0x4c2   :  { %v2422_v22 = vadd.f32 %v2421_v51, %v2393_v49 }
 0x4c4   :  { %v2451_v21 = vadd.f32 %v2450_v36, %v2422_v22  ;;  %v2573_v36 = vld [vmem:[%s6383_s9 + $0x40] sm:$0xff] }
 0x4c5   :  { %2608 = vmatpush.msrb.mxu1 %v2573_v36  ;;  %v3218_v36 = vld [vmem:[%s6386_s12] ss:$0 sm:$0xff] }
 0x4c6   :  { %v2462_v5 = vmax.f32 %v2451_v21, 0.0  ;;  %v2584_v21 = vld [vmem:[%s6383_s9 + $0x98] sm:$0xff] }
 0x4c7   :  { %2609 = vmatpush.msrb.mxu1 %v2572_v48 }
 0x4c8   :  { %v2466_v30 = vsel %vm6874_vm15, %v2462_v5, -inf  ;;  %v2568_v5 = vld [vmem:[%s6383_s9 + $0x18] sm:$0xff] }
 0x4c9   :  { %v2424_v47 = vpop.f32.mrf.mxu1  ;;  %2610 = vmatpush.msrb.mxu1 %v2571_v54 }
 0x4ca   :  { %v2425_v38 = vadd.f32 %v2424_v47, %v2396_v25  ;;  %v2588_v47 = vld [vmem:[%s6383_s9 + $0xb8] sm:$0xff] }
 0x4cb   :  { %2629 = vmatpush.msrb.mxu2 %v2588_v47 }
 0x4cc   :  { %v6177_v37 = vadd.f32 %v2453_v4, %v2425_v38  ;;  %v2587_v38 = vld [vmem:[%s6383_s9 + $0xb0] sm:$0xff]  ;;  %v2570_v4 = vld [vmem:[%s6383_s9 + $0x28] sm:$0xff] }
 0x4cd   :  { %2630 = vmatpush.msrb.mxu2 %v2587_v38  ;;  %2611 = vmatpush.msrb.mxu1 %v2570_v4 }
 0x4ce   :  { %v2463_v2 = vmax.f32 %v6177_v37, 0.0 }
 0x4cf   :  { %2631 = vmatpush.msrb.mxu2 %v2586_v6  ;;  %2612 = vmatpush.msrb.mxu1 %v2569_v60 }
 0x4d0   :  { %v2468_v58 = vsel %vm2467_vm12, %v2463_v2, -inf  ;;  %v2477_v12 = vsel %vm2476_vm4, %v2463_v2, -inf }
 0x4d1   :  { %v2469_v31 = vmax.f32 %v2466_v30, %v2468_v58  ;;  %2632 = vmatpush.msrb.mxu2 %v2585_v1  ;;  %2613 = vmatpush.msrb.mxu1 %v2568_v5  ;;  %v2654_v58 = vld [vmem:[%s6385_s11 + $0x60] sm:$0xff]  ;;  %v2649_v30 = vld [vmem:[%s6385_s11 + $0x38] sm:$0xff] }
 0x4d2   :  { %2665 = vmatpush.msrb.mxu3 %v2654_v58 }
 0x4d3   :  { %v2470_v34 = vrot.slane %v2469_v31, 4  ;;  %2633 = vmatpush.msrb.mxu2 %v2584_v21  ;;  %2614 = vmatpush.msrb.mxu1 %v2567_v32 }
 0x4d5   :  { %v2471_v61 = vmax.f32 %v2469_v31, %v2470_v34  ;;  %2634 = vmatpush.msrb.mxu2 %v2583_v56  ;;  %2615 = vmatpush.msrb.mxu1 %v2566_v33  ;;  %v2648_v31 = vld [vmem:[%s6385_s11 + $0x30] sm:$0xff] }
 0x4d7   :  { %v2472_v35 = vrot.slane %v2471_v61, 2 }
 0x4d9   :  { %v2473_v37 = vmax.f32 %v2471_v61, %v2472_v35 }
 0x4db   :  { %v2474_v9 = vrot.slane %v2473_v37, 1 }
 0x4dd   :  { %v2475_v20 = vmax.f32 %v2473_v37, %v2474_v9 }
 0x4eb   :  { %v2401_v55 = vpop.f32.mrf.mxu0 }
 0x4ec   :  { %v2402_v29 = vadd.f32 %v2401_v55, %v2373_v28 }
 0x503   :  { %v2427_v26 = vpop.f32.mrf.mxu1 }
 0x504   :  { %v2428_v53 = vadd.f32 %v2427_v26, %v2399_v59  ;;  %v2582_v59 = vld [vmem:[%s6383_s9 + $0x88] sm:$0xff]  ;;  %v2565_v26 = vld [vmem:[%s6383_s9] sm:$0xff] }
 0x505   :  { %2635 = vmatpush.msrb.mxu2 %v2582_v59  ;;  %2616 = vmatpush.msrb.mxu1 %v2565_v26 }
 0x506   :  { %v2457_v41 = vadd.f32 %v2456_v43, %v2428_v53  ;;  %v2653_v53 = vld [vmem:[%s6385_s11 + $0x58] sm:$0xff]  ;;  %v2652_v43 = vld [vmem:[%s6385_s11 + $0x50] sm:$0xff] }
 0x507   :  { %2636 = vmatpush.msrb.mxu2 %v2581_v46  ;;  %2666 = vmatpush.msrb.mxu3 %v2653_v53 }
 0x508   :  { %v2464_v11 = vmax.f32 %v2457_v41, 0.0  ;;  %v2514_v41 = vld [vmem:[%s6382_s8] sm:$0x3] }
 0x509   :  { %v2459_v51 = vpop.f32.mrf.mxu2  ;;  %2667 = vmatpush.msrb.mxu3 %v2652_v43  ;;  %v2517_v55 = vperm.slane %v2514_v41, 1 }
 0x50a   :  { %v2478_v63 = vsel %vm6875_vm9, %v2464_v11, -inf }
 0x50b   :  { %v2430_v57 = vpop.f32.mrf.mxu1  ;;  %v2481_v0 = vmax.f32 %v2477_v12, %v2478_v63  ;;  %2668 = vmatpush.msrb.mxu3 %v2651_v62 }
 0x50c   :  { %v2431_v13 = vadd.f32 %v2430_v57, %v2402_v29  ;;  %v2516_v29 = vperm.slane %v2514_v41, 0 }
 0x50d   :  { %2669 = vmatpush.msrb.mxu3 %v2650_v15 }
 0x50e   :  { %v2460_v27 = vadd.f32 %v2459_v51, %v2431_v13  ;;  %v2643_v13 = vld [vmem:[%s6385_s11 + $0x8] sm:$0xff]  ;;  %v2642_v51 = vld [vmem:[%s6385_s11] sm:$0xff] }
 0x50f   :  { %2670 = vmatpush.msrb.mxu3 %v2649_v30 }
 0x510   :  { %v2465_v8 = vmax.f32 %v2460_v27, 0.0 }
 0x511   :  { %2671 = vmatpush.msrb.mxu3 %v2648_v31 }
 0x512   :  { %v2480_v25 = vsel %vm2479_vm2, %v2465_v8, -inf }
 0x513   :  { %v2482_v49 = vmax.f32 %v2481_v0, %v2480_v25  ;;  %2672 = vmatpush.msrb.mxu3 %v2647_v14 }
 0x515   :  { %v2483_v22 = vrot.slane %v2482_v49, 4  ;;  %2673 = vmatpush.msrb.mxu3 %v2646_v19 }
 0x517   :  { %v2484_v23 = vmax.f32 %v2482_v49, %v2483_v22  ;;  %2674 = vmatpush.msrb.mxu3 %v2645_v40 }
 0x519   :  { %v2485_v52 = vrot.slane %v2484_v23, 2  ;;  %2675 = vmatpush.msrb.mxu3 %v2644_v16 }
 0x51b   :  { %v2486_v3 = vmax.f32 %v2484_v23, %v2485_v52  ;;  %2676 = vmatpush.msrb.mxu3 %v2643_v13 }
 0x51d   :  { %v2487_v44 = vrot.slane %v2486_v3, 1  ;;  %2677 = vmatpush.msrb.mxu3 %v2642_v51 }
 0x51f   :  { %v2488_v7 = vmax.f32 %v2486_v3, %v2487_v44 }
 0x521   :  { %v2489_v2 = vsel %vm6876_vm7, %v2475_v20, %v2488_v7 }
 0x522   :  { %2718 = vmatmul.msk.f32.vlgmr.msra.gmra.mxu3 %vm6877_vm8, %v2489_v2  ;;  %2719 = vmatmul.msk.f32.vlgmr.msra.gmra.mxu0 %vm6878_vm5, %v2489_v2 }
 0x59f   :  { %v2560_v28 = vpop.f32.mrf.mxu0 }
 0x5a0   :  { %v2561_v42 = vadd.f32 %v2560_v28, %v2517_v55 }
 0x5a2   :  { %v2564_v18 = vmax.f32 %v2561_v42, 0.0 }
 0x5a4   :  { %2637 = vmatmul.f32.vlgmr.msrb.gmra.mxu2 %v2564_v18 }
 0x5a5   :  { %v2540_v11 = vpop.f32.mrf.mxu3 }
 0x5a6   :  { %v2541_v34 = vadd.f32 %v2540_v11, %v2516_v29 }
 0x5a8   :  { %v2563_v57 = vmax.f32 %v2541_v34, 0.0 }
 0x5aa   :  { %2617 = vmatmul.f32.vlgmr.msrb.gmra.mxu1 %v2563_v57 }
 0x627   :  { %v2618_v24 = vpop.f32.mrf.mxu1  ;;  %v2638_v27 = vpop.f32.mrf.mxu2 }
 0x628   :  { %v2619_v63 = vadd.f32 %v3217_v50, %v2618_v24 }
 0x62a   :  { %v2639_v61 = vadd.f32 %v2638_v27, %v2619_v63 }
 0x62c   :  { %v2641_v10 = vmax.f32 %v2639_v61, 0.0 }
 0x62e   :  { %2678 = vmatmul.f32.vlgmr.msrb.gmra.mxu3 %v2641_v10 }
 0x6b1   :  { %v2679_v12 = vpop.f32.mrf.mxu3 }
 0x6b2   :  { %v2680_v8 = vadd.f32 %v3218_v36, %v2679_v12 }
 0x6b4   :  { %2683 = vst.msk [vmem:[#allocation2] sm:$0x3] %vm2682_vm10, %v2680_v8 }
 0x6b5   :  { %2694 = dma.vmem_to_hbm [thread:$0]  %s2690_s6, 32, %s2692_s20, [#allocation3]  }
 0x6b6   :  { %3247 = dma.done.wait [#allocation3], 32  }
 0x6b7   :  { %3248 = vsyncadd [#allocation3], 4294967264 }
 0x6b8   :  { %2699 = vsyncpa [#allocation3], 1 }

</bundles_post_ra>
